<compile_context>
chip_gen: v6e
topology: v6e:2x2x1
jax: 0.10.0
libtpu: 0.0.40
codegen_flags: <defaults>
</compile_context>

<pallas_src>
import functools

import jax
import jax.numpy as jnp
import numpy as np
from jax.experimental import pallas as pl
from jax.experimental.pallas import tpu as pltpu

CHANNELS = [8, 16, 32]


# --------------------------- fused kernel ----------------------------
def occ_decoder_kernel(x_ref, m_ref, w1_ref, b1_ref, w2_ref, b2_ref,
                       cw1_ref, cb1_ref, cw2_ref, cb2_ref, cw3_ref, cb3_ref,
                       o_ref, y_scr, *, feat, b_tile):
    F = feat
    HW = F * F
    N = b_tile * HW
    C32, C16, C8 = CHANNELS[2], CHANNELS[1], CHANNELS[0]

    # ---- decoder_fc: Linear(F,64)+ReLU, Linear(64,32*F*F)+ReLU (MXU, f32 acc) ----
    h1 = jnp.dot(x_ref[...], w1_ref[...], preferred_element_type=jnp.float32) + b1_ref[...]
    h1 = jnp.maximum(h1, 0.0)
    h2 = jnp.dot(h1, w2_ref[...], preferred_element_type=jnp.float32) + b2_ref[...]
    h2 = jnp.maximum(h2, 0.0)                       # (b_tile, 32*HW), lanes = (c, j)

    # ---- relayout (b_tile, 32*HW) -> (32, b_tile*HW): channels on sublanes, ----
    # ---- (image, spatial) on lanes == PyTorch view(-1, 32, F, F) flat order.  ----
    # Explicit static-slice stores into VMEM scratch (replaces the old HBM round trip).
    for b in range(b_tile):
        for c in range(C32):
            y_scr[c:c + 1, b * HW:(b + 1) * HW] = h2[b:b + 1, c * HW:(c + 1) * HW]
    x0 = y_scr[...]                                 # (32, N)

    # ---- hoisted tap masks: broadcast each non-center row once to max Cin=32 ----
    taps = [(dh, dw) for dh in (-1, 0, 1) for dw in (-1, 0, 1)]
    m = m_ref[...]                                  # (9, N), {0,1}
    mask32 = [None if t == 4 else jnp.broadcast_to(m[t:t + 1, :], (C32, N))
              for t in range(9)]

    def im2col(x, cin):
        # (cin, N) -> (9*cin, N): tap (dh,dw) is a lane roll by dh*F+dw; positions whose
        # tap leaves the image (incl. any cross-image roll wrap) are zeroed by the mask.
        parts = []
        for t, (dh, dw) in enumerate(taps):
            s = dh * F + dw
            if s == 0:
                parts.append(x)                     # center tap: mask is all-ones
            else:
                xs = pltpu.roll(x, (-s) % N, axis=1)
                msk = mask32[t] if cin == C32 else mask32[t][:cin, :]
                parts.append(xs * msk)
        return jnp.concatenate(parts, axis=0)

    # layer 1: ConvTranspose2d(32->16) with BatchNorm(16, eval) folded into weights, +ReLU
    h = jnp.dot(cw1_ref[...], im2col(x0, C32), preferred_element_type=jnp.float32) + cb1_ref[...]
    h = jnp.maximum(h, 0.0)
    # layer 2: ConvTranspose2d(16->8) + ReLU
    h = jnp.dot(cw2_ref[...], im2col(h, C16), preferred_element_type=jnp.float32) + cb2_ref[...]
    h = jnp.maximum(h, 0.0)
    # layer 3: ConvTranspose2d(8->1) + Sigmoid.  Cout=1: VPU multiply + sublane reduce
    # beats an M=1 MXU call; exp rides the EUP slot.
    z = jnp.sum(cw3_ref[...] * im2col(h, C8), axis=0, keepdims=True) + cb3_ref[...]
    sig = 1.0 / (1.0 + jnp.exp(-z))                 # (1, N); saturates cleanly, no NaN

    # lane-dense 2-D output block (b_tile, HW)
    for b in range(b_tile):
        o_ref[b:b + 1, :] = sig[:, b * HW:(b + 1) * HW]


def _num_batch_steps(batch):
    # v7x has 2 TensorCores per chip: split the batch 2-way ("parallel").  On 1-TC
    # chips (v5e/v6e) a single whole-batch step avoids per-step overhead.
    try:
        kind = jax.devices()[0].device_kind.lower()
    except Exception:
        kind = ""
    if ("v7" in kind or "7x" in kind) and batch % 2 == 0 and batch >= 2:
        return 2
    return 1


def occ_decoder_forward(x, p, feature_size):
    F = feature_size
    HW = F * F
    B = x.shape[0]
    n_steps = _num_batch_steps(B)
    b_tile = B // n_steps
    N = b_tile * HW

    x3 = x.reshape(n_steps, b_tile, F)                      # free HBM view
    masks_tiled = jnp.tile(p['masks'], (1, b_tile))         # (9, b_tile*HW)

    def full(a):
        nd = a.ndim
        return pl.BlockSpec(a.shape, lambda s, _n=nd: (0,) * _n)

    kernel = functools.partial(occ_decoder_kernel, feat=F, b_tile=b_tile)
    # TODO(synk): if B or F grows, tile the FC N = 32*F*F dim and set
    # pltpu.CompilerParams(vmem_limit_bytes=...) (v7x: 64 MiB phys / 32 MiB scoped).
    # TODO(synk): on v6e/v7x, casting weights/activations to bf16 for the MXU would
    # halve vreg/DMA traffic; kept f32 here to preserve rtol=1e-4 vs the f32 reference.
    out = pl.pallas_call(
        kernel,
        out_shape=jax.ShapeDtypeStruct((n_steps, b_tile, HW), jnp.float32),
        grid=(n_steps,),
        in_specs=[
            pl.BlockSpec((None, b_tile, F), lambda s: (s, 0, 0)),
            full(masks_tiled),
            full(p['fc_w1']), full(p['fc_b1']), full(p['fc_w2']), full(p['fc_b2']),
            full(p['cw1_bn']), full(p['cb1_bn']),
            full(p['cw2']), full(p['cb2']),
            full(p['cw3']), full(p['cb3']),
        ],
        out_specs=pl.BlockSpec((None, b_tile, HW), lambda s: (s, 0, 0)),
        scratch_shapes=[pltpu.VMEM((CHANNELS[2], N), jnp.float32)],
        compiler_params=pltpu.CompilerParams(dimension_semantics=("parallel",)),
    )(x3, masks_tiled, p['fc_w1'], p['fc_b1'], p['fc_w2'], p['fc_b2'],
      p['cw1_bn'], p['cb1_bn'], p['cw2'], p['cb2'], p['cw3'], p['cb3'])

    # Kernel output is lane-dense (B, F*F); the NCHW view is kept only for module
    # parity — consumers that accept (B, F*F) can skip it.
    return out.reshape(B, 1, F, F)


# ------------------------- parameter setup ---------------------------
def make_tap_masks(F):
    # masks[t, j] = 1 iff spatial position j shifted by tap t stays inside the image.
    hw = F * F
    idx = np.arange(hw)
    h, w = idx // F, idx % F
    rows = []
    for dh in (-1, 0, 1):
        for dw in (-1, 0, 1):
            valid = (h + dh >= 0) & (h + dh < F) & (w + dw >= 0) & (w + dw < F)
            rows.append(valid.astype(np.float32))
    return jnp.asarray(np.stack(rows))                      # (9, F*F)


def convT_to_col(wt):
    # wt: PyTorch ConvTranspose2d weight (Cin, Cout, 3, 3).
    # Returns (Cout, 9*Cin) with column t*Cin + c = wt[c, o, 1-dh, 1-dw],
    # t = (dh+1)*3 + (dw+1) -- matching the kernel's im2col row order.
    cin, cout = wt.shape[0], wt.shape[1]
    wf = jnp.flip(wt, axis=(2, 3))
    return wf.transpose(2, 3, 0, 1).reshape(9 * cin, cout).T


def init_params(key, feature_size):
    F = feature_size
    fc_out = F * F * CHANNELS[2]
    ks = jax.random.split(key, 16)
    s = 0.1
    p = {}
    p['fc_w1'] = jax.random.normal(ks[0], (F, 64), jnp.float32) * s
    p['fc_b1'] = jax.random.normal(ks[1], (1, 64), jnp.float32) * s
    p['fc_w2'] = jax.random.normal(ks[2], (64, fc_out), jnp.float32) * s
    p['fc_b2'] = jax.random.normal(ks[3], (1, fc_out), jnp.float32) * s
    wt1 = jax.random.normal(ks[4], (CHANNELS[2], CHANNELS[1], 3, 3), jnp.float32) * s
    wt2 = jax.random.normal(ks[5], (CHANNELS[1], CHANNELS[0], 3, 3), jnp.float32) * s
    wt3 = jax.random.normal(ks[6], (CHANNELS[0], 1, 3, 3), jnp.float32) * s
    p['wt1_raw'], p['wt2_raw'], p['wt3_raw'] = wt1, wt2, wt3
    cw1 = convT_to_col(wt1)                                  # (16, 288)
    p['cw2'] = convT_to_col(wt2)                             # (8, 144)
    p['cw3'] = convT_to_col(wt3).T                           # (72, 1): Cout=1 VPU path
    p['cb1'] = jax.random.normal(ks[7], (CHANNELS[1], 1), jnp.float32) * s
    p['cb2'] = jax.random.normal(ks[8], (CHANNELS[0], 1), jnp.float32) * s
    p['cb3'] = jax.random.normal(ks[9], (1, 1), jnp.float32) * s
    # BatchNorm2d(16) eval-mode affine.
    gamma = 1.0 + s * jax.random.normal(ks[10], (CHANNELS[1], 1), jnp.float32)
    beta = s * jax.random.normal(ks[11], (CHANNELS[1], 1), jnp.float32)
    rmean = s * jax.random.normal(ks[12], (CHANNELS[1], 1), jnp.float32)
    rvar = 1.0 + s * jnp.abs(jax.random.normal(ks[13], (CHANNELS[1], 1), jnp.float32))
    eps = 1e-5
    p['bn_scale'] = gamma / jnp.sqrt(rvar + eps)
    p['bn_shift'] = beta - rmean * p['bn_scale']
    # Fold BatchNorm and the layer-1 conv bias into the packed weights (done once).
    p['cw1_bn'] = p['bn_scale'] * cw1                        # (16, 288)
    p['cb1_bn'] = p['bn_scale'] * p['cb1'] + p['bn_shift']   # (16, 1)
    p['masks'] = make_tap_masks(F)
    return p


# ----------------------- pure-JAX reference ---------------------------
def reference_forward(x, p, feature_size):
    # XLA-only reference built from RAW ConvTranspose2d weights and un-folded BN,
    # independent of the kernel's im2col packing / BN folding / batch-on-lanes fold.
    F = feature_size
    B = x.shape[0]
    h = jax.nn.relu(x @ p['fc_w1'] + p['fc_b1'])
    h = jax.nn.relu(h @ p['fc_w2'] + p['fc_b2'])
    y = h.reshape(B, CHANNELS[2], F, F)                      # PyTorch view(-1, 32, F, F)

    def conv_transpose_3x3(y, wt, b):
        yp = jnp.pad(y, ((0, 0), (0, 0), (1, 1), (1, 1)))
        cout = wt.shape[1]
        out = jnp.zeros((B, cout, F, F), jnp.float32)
        for dh in (-1, 0, 1):
            for dw in (-1, 0, 1):
                out = out + jnp.einsum(
                    'bihw,io->bohw',
                    yp[:, :, 1 + dh:1 + dh + F, 1 + dw:1 + dw + F],
                    wt[:, :, 1 - dh, 1 - dw])
        return out + b.reshape(1, cout, 1, 1)

    y = conv_transpose_3x3(y, p['wt1_raw'], p['cb1'])
    y = y * p['bn_scale'].reshape(1, -1, 1, 1) + p['bn_shift'].reshape(1, -1, 1, 1)
    y = jax.nn.relu(y)
    y = jax.nn.relu(conv_transpose_3x3(y, p['wt2_raw'], p['cb2']))
    z = conv_transpose_3x3(y, p['wt3_raw'], p['cb3'])
    return 1.0 / (1.0 + jnp.exp(-z))


if __name__ == "__main__":
    feature_size = 16
    batch = 2
    key = jax.random.PRNGKey(0)
    pkey, xkey = jax.random.split(key)
    params = init_params(pkey, feature_size)
    x = jax.random.normal(xkey, (batch, feature_size), jnp.float32)

    out = jax.block_until_ready(occ_decoder_forward(x, params, feature_size))
    ref = jax.block_until_ready(reference_forward(x, params, feature_size))

    assert out.shape == (batch, 1, feature_size, feature_size)
    np.testing.assert_allclose(np.asarray(out), np.asarray(ref), rtol=1e-4, atol=1e-5)
    print("KERNEL_OK")
</pallas_src>

<mosaic_0001>
module attributes {stable_mosaic.version = 11 : i64} {
  func.func @occ_decoder_kernel(%arg0: i32, %arg1: memref<1x2x16xf32, #tpu.memory_space<vmem>>, %arg2: memref<9x512xf32, #tpu.memory_space<vmem>>, %arg3: memref<16x64xf32, #tpu.memory_space<vmem>>, %arg4: memref<1x64xf32, #tpu.memory_space<vmem>>, %arg5: memref<64x8192xf32, #tpu.memory_space<vmem>>, %arg6: memref<1x8192xf32, #tpu.memory_space<vmem>>, %arg7: memref<16x288xf32, #tpu.memory_space<vmem>>, %arg8: memref<16x1xf32, #tpu.memory_space<vmem>>, %arg9: memref<8x144xf32, #tpu.memory_space<vmem>>, %arg10: memref<8x1xf32, #tpu.memory_space<vmem>>, %arg11: memref<72x1xf32, #tpu.memory_space<vmem>>, %arg12: memref<1x1xf32, #tpu.memory_space<vmem>>, %arg13: memref<1x2x256xf32, #tpu.memory_space<vmem>>, %arg14: memref<32x512xf32, #tpu.memory_space<vmem>>) attributes {dimension_semantics = [#tpu.dimension_semantics<parallel>], iteration_bounds = array<i64: 1>, scalar_prefetch = 0 : i64, scratch_operands = 1 : i64, tpu.core_type = #tpu.core_type<tc>, window_params = [{transform_indices = @transform_0, window_bounds = array<i64: 1, 2, 16>}, {pipeline_mode = #tpu.pipeline_mode<synchronous>, transform_indices = @transform_1, window_bounds = array<i64: 9, 512>}, {pipeline_mode = #tpu.pipeline_mode<synchronous>, transform_indices = @transform_2, window_bounds = array<i64: 16, 64>}, {pipeline_mode = #tpu.pipeline_mode<synchronous>, transform_indices = @transform_3, window_bounds = array<i64: 1, 64>}, {pipeline_mode = #tpu.pipeline_mode<synchronous>, transform_indices = @transform_4, window_bounds = array<i64: 64, 8192>}, {pipeline_mode = #tpu.pipeline_mode<synchronous>, transform_indices = @transform_5, window_bounds = array<i64: 1, 8192>}, {pipeline_mode = #tpu.pipeline_mode<synchronous>, transform_indices = @transform_6, window_bounds = array<i64: 16, 288>}, {pipeline_mode = #tpu.pipeline_mode<synchronous>, transform_indices = @transform_7, window_bounds = array<i64: 16, 1>}, {pipeline_mode = #tpu.pipeline_mode<synchronous>, transform_indices = @transform_8, window_bounds = array<i64: 8, 144>}, {pipeline_mode = #tpu.pipeline_mode<synchronous>, transform_indices = @transform_9, window_bounds = array<i64: 8, 1>}, {pipeline_mode = #tpu.pipeline_mode<synchronous>, transform_indices = @transform_10, window_bounds = array<i64: 72, 1>}, {pipeline_mode = #tpu.pipeline_mode<synchronous>, transform_indices = @transform_11, window_bounds = array<i64: 1, 1>}, {transform_indices = @transform_12, window_bounds = array<i64: 1, 2, 256>}]} {
    %c0 = arith.constant 0 : index
    %c0_0 = arith.constant 0 : index
    %c0_1 = arith.constant 0 : index
    %0 = vector.load %arg1[%c0, %c0_0, %c0_1] : memref<1x2x16xf32, #tpu.memory_space<vmem>>, vector<1x2x16xf32>
    %1 = vector.shape_cast %0 : vector<1x2x16xf32> to vector<2x16xf32>
    %c0_2 = arith.constant 0 : index
    %c0_3 = arith.constant 0 : index
    %2 = vector.load %arg3[%c0_2, %c0_3] : memref<16x64xf32, #tpu.memory_space<vmem>>, vector<16x64xf32>
    %cst = arith.constant dense<0.000000e+00> : vector<2x64xf32>
    %3 = tpu.matmul %1, %2, %cst {dimension_numbers = #tpu.dot_dimension_numbers<[1], [0], [0], [1], [0, 0, 1, 1], [], []>} : vector<2x16xf32>, vector<16x64xf32>, vector<2x64xf32> -> vector<2x64xf32>
    %c0_4 = arith.constant 0 : index
    %c0_5 = arith.constant 0 : index
    %4 = vector.load %arg4[%c0_4, %c0_5] : memref<1x64xf32, #tpu.memory_space<vmem>>, vector<1x64xf32>
    %5 = vector.broadcast %4 : vector<1x64xf32> to vector<2x64xf32>
    %6 = arith.addf %3, %5 : vector<2x64xf32>
    %cst_6 = arith.constant 0.000000e+00 : f32
    %7 = vector.broadcast %cst_6 : f32 to vector<2x64xf32>
    %8 = arith.maximumf %6, %7 : vector<2x64xf32>
    %c0_7 = arith.constant 0 : index
    %c0_8 = arith.constant 0 : index
    %9 = vector.load %arg5[%c0_7, %c0_8] : memref<64x8192xf32, #tpu.memory_space<vmem>>, vector<64x8192xf32>
    %cst_9 = arith.constant dense<0.000000e+00> : vector<2x8192xf32>
    %10 = tpu.matmul %8, %9, %cst_9 {dimension_numbers = #tpu.dot_dimension_numbers<[1], [0], [0], [1], [0, 0, 1, 1], [], []>} : vector<2x64xf32>, vector<64x8192xf32>, vector<2x8192xf32> -> vector<2x8192xf32>
    %c0_10 = arith.constant 0 : index
    %c0_11 = arith.constant 0 : index
    %11 = vector.load %arg6[%c0_10, %c0_11] : memref<1x8192xf32, #tpu.memory_space<vmem>>, vector<1x8192xf32>
    %12 = vector.broadcast %11 : vector<1x8192xf32> to vector<2x8192xf32>
    %13 = arith.addf %10, %12 : vector<2x8192xf32>
    %cst_12 = arith.constant 0.000000e+00 : f32
    %14 = vector.broadcast %cst_12 : f32 to vector<2x8192xf32>
    %15 = arith.maximumf %13, %14 : vector<2x8192xf32>
    %16 = vector.extract_strided_slice %15 {offsets = [0, 0], sizes = [1, 256], strides = [1, 1]} : vector<2x8192xf32> to vector<1x256xf32>
    %c0_13 = arith.constant 0 : index
    %c0_14 = arith.constant 0 : index
    %17 = vector.load %arg14[%c0_13, %c0_14] : memref<32x512xf32, #tpu.memory_space<vmem>>, vector<1x256xf32>
    tpu.vector_store %arg14[%c0_13, %c0_14], %16 {strides = array<i32>} : memref<32x512xf32, #tpu.memory_space<vmem>>, vector<1x256xf32>,
    %18 = vector.extract_strided_slice %15 {offsets = [0, 256], sizes = [1, 256], strides = [1, 1]} : vector<2x8192xf32> to vector<1x256xf32>
    %c1 = arith.constant 1 : index
    %c0_15 = arith.constant 0 : index
    %19 = vector.load %arg14[%c1, %c0_15] : memref<32x512xf32, #tpu.memory_space<vmem>>, vector<1x256xf32>
    tpu.vector_store %arg14[%c1, %c0_15], %18 {strides = array<i32>} : memref<32x512xf32, #tpu.memory_space<vmem>>, vector<1x256xf32>,
    %20 = vector.extract_strided_slice %15 {offsets = [0, 512], sizes = [1, 256], strides = [1, 1]} : vector<2x8192xf32> to vector<1x256xf32>
    %c2 = arith.constant 2 : index
    %c0_16 = arith.constant 0 : index
    %21 = vector.load %arg14[%c2, %c0_16] : memref<32x512xf32, #tpu.memory_space<vmem>>, vector<1x256xf32>
    tpu.vector_store %arg14[%c2, %c0_16], %20 {strides = array<i32>} : memref<32x512xf32, #tpu.memory_space<vmem>>, vector<1x256xf32>,
    %22 = vector.extract_strided_slice %15 {offsets = [0, 768], sizes = [1, 256], strides = [1, 1]} : vector<2x8192xf32> to vector<1x256xf32>
    %c3 = arith.constant 3 : index
    %c0_17 = arith.constant 0 : index
    %23 = vector.load %arg14[%c3, %c0_17] : memref<32x512xf32, #tpu.memory_space<vmem>>, vector<1x256xf32>
    tpu.vector_store %arg14[%c3, %c0_17], %22 {strides = array<i32>} : memref<32x512xf32, #tpu.memory_space<vmem>>, vector<1x256xf32>,
    %24 = vector.extract_strided_slice %15 {offsets = [0, 1024], sizes = [1, 256], strides = [1, 1]} : vector<2x8192xf32> to vector<1x256xf32>
    %c4 = arith.constant 4 : index
    %c0_18 = arith.constant 0 : index
    %25 = vector.load %arg14[%c4, %c0_18] : memref<32x512xf32, #tpu.memory_space<vmem>>, vector<1x256xf32>
    tpu.vector_store %arg14[%c4, %c0_18], %24 {strides = array<i32>} : memref<32x512xf32, #tpu.memory_space<vmem>>, vector<1x256xf32>,
    %26 = vector.extract_strided_slice %15 {offsets = [0, 1280], sizes = [1, 256], strides = [1, 1]} : vector<2x8192xf32> to vector<1x256xf32>
    %c5 = arith.constant 5 : index
    %c0_19 = arith.constant 0 : index
    %27 = vector.load %arg14[%c5, %c0_19] : memref<32x512xf32, #tpu.memory_space<vmem>>, vector<1x256xf32>
    tpu.vector_store %arg14[%c5, %c0_19], %26 {strides = array<i32>} : memref<32x512xf32, #tpu.memory_space<vmem>>, vector<1x256xf32>,
    %28 = vector.extract_strided_slice %15 {offsets = [0, 1536], sizes = [1, 256], strides = [1, 1]} : vector<2x8192xf32> to vector<1x256xf32>
    %c6 = arith.constant 6 : index
    %c0_20 = arith.constant 0 : index
    %29 = vector.load %arg14[%c6, %c0_20] : memref<32x512xf32, #tpu.memory_space<vmem>>, vector<1x256xf32>
    tpu.vector_store %arg14[%c6, %c0_20], %28 {strides = array<i32>} : memref<32x512xf32, #tpu.memory_space<vmem>>, vector<1x256xf32>,
    %30 = vector.extract_strided_slice %15 {offsets = [0, 1792], sizes = [1, 256], strides = [1, 1]} : vector<2x8192xf32> to vector<1x256xf32>
    %c7 = arith.constant 7 : index
    %c0_21 = arith.constant 0 : index
    %31 = vector.load %arg14[%c7, %c0_21] : memref<32x512xf32, #tpu.memory_space<vmem>>, vector<1x256xf32>
    tpu.vector_store %arg14[%c7, %c0_21], %30 {strides = array<i32>} : memref<32x512xf32, #tpu.memory_space<vmem>>, vector<1x256xf32>,
    %32 = vector.extract_strided_slice %15 {offsets = [0, 2048], sizes = [1, 256], strides = [1, 1]} : vector<2x8192xf32> to vector<1x256xf32>
    %c8 = arith.constant 8 : index
    %c0_22 = arith.constant 0 : index
    %33 = vector.load %arg14[%c8, %c0_22] : memref<32x512xf32, #tpu.memory_space<vmem>>, vector<1x256xf32>
    tpu.vector_store %arg14[%c8, %c0_22], %32 {strides = array<i32>} : memref<32x512xf32, #tpu.memory_space<vmem>>, vector<1x256xf32>,
    %34 = vector.extract_strided_slice %15 {offsets = [0, 2304], sizes = [1, 256], strides = [1, 1]} : vector<2x8192xf32> to vector<1x256xf32>
    %c9 = arith.constant 9 : index
    %c0_23 = arith.constant 0 : index
    %35 = vector.load %arg14[%c9, %c0_23] : memref<32x512xf32, #tpu.memory_space<vmem>>, vector<1x256xf32>
    tpu.vector_store %arg14[%c9, %c0_23], %34 {strides = array<i32>} : memref<32x512xf32, #tpu.memory_space<vmem>>, vector<1x256xf32>,
    %36 = vector.extract_strided_slice %15 {offsets = [0, 2560], sizes = [1, 256], strides = [1, 1]} : vector<2x8192xf32> to vector<1x256xf32>
    %c10 = arith.constant 10 : index
    %c0_24 = arith.constant 0 : index
    %37 = vector.load %arg14[%c10, %c0_24] : memref<32x512xf32, #tpu.memory_space<vmem>>, vector<1x256xf32>
    tpu.vector_store %arg14[%c10, %c0_24], %36 {strides = array<i32>} : memref<32x512xf32, #tpu.memory_space<vmem>>, vector<1x256xf32>,
    %38 = vector.extract_strided_slice %15 {offsets = [0, 2816], sizes = [1, 256], strides = [1, 1]} : vector<2x8192xf32> to vector<1x256xf32>
    %c11 = arith.constant 11 : index
    %c0_25 = arith.constant 0 : index
    %39 = vector.load %arg14[%c11, %c0_25] : memref<32x512xf32, #tpu.memory_space<vmem>>, vector<1x256xf32>
    tpu.vector_store %arg14[%c11, %c0_25], %38 {strides = array<i32>} : memref<32x512xf32, #tpu.memory_space<vmem>>, vector<1x256xf32>,
    %40 = vector.extract_strided_slice %15 {offsets = [0, 3072], sizes = [1, 256], strides = [1, 1]} : vector<2x8192xf32> to vector<1x256xf32>
    %c12 = arith.constant 12 : index
    %c0_26 = arith.constant 0 : index
    %41 = vector.load %arg14[%c12, %c0_26] : memref<32x512xf32, #tpu.memory_space<vmem>>, vector<1x256xf32>
    tpu.vector_store %arg14[%c12, %c0_26], %40 {strides = array<i32>} : memref<32x512xf32, #tpu.memory_space<vmem>>, vector<1x256xf32>,
    %42 = vector.extract_strided_slice %15 {offsets = [0, 3328], sizes = [1, 256], strides = [1, 1]} : vector<2x8192xf32> to vector<1x256xf32>
    %c13 = arith.constant 13 : index
    %c0_27 = arith.constant 0 : index
    %43 = vector.load %arg14[%c13, %c0_27] : memref<32x512xf32, #tpu.memory_space<vmem>>, vector<1x256xf32>
    tpu.vector_store %arg14[%c13, %c0_27], %42 {strides = array<i32>} : memref<32x512xf32, #tpu.memory_space<vmem>>, vector<1x256xf32>,
    %44 = vector.extract_strided_slice %15 {offsets = [0, 3584], sizes = [1, 256], strides = [1, 1]} : vector<2x8192xf32> to vector<1x256xf32>
    %c14 = arith.constant 14 : index
    %c0_28 = arith.constant 0 : index
    %45 = vector.load %arg14[%c14, %c0_28] : memref<32x512xf32, #tpu.memory_space<vmem>>, vector<1x256xf32>
    tpu.vector_store %arg14[%c14, %c0_28], %44 {strides = array<i32>} : memref<32x512xf32, #tpu.memory_space<vmem>>, vector<1x256xf32>,
    %46 = vector.extract_strided_slice %15 {offsets = [0, 3840], sizes = [1, 256], strides = [1, 1]} : vector<2x8192xf32> to vector<1x256xf32>
    %c15 = arith.constant 15 : index
    %c0_29 = arith.constant 0 : index
    %47 = vector.load %arg14[%c15, %c0_29] : memref<32x512xf32, #tpu.memory_space<vmem>>, vector<1x256xf32>
    tpu.vector_store %arg14[%c15, %c0_29], %46 {strides = array<i32>} : memref<32x512xf32, #tpu.memory_space<vmem>>, vector<1x256xf32>,
    %48 = vector.extract_strided_slice %15 {offsets = [0, 4096], sizes = [1, 256], strides = [1, 1]} : vector<2x8192xf32> to vector<1x256xf32>
    %c16 = arith.constant 16 : index
    %c0_30 = arith.constant 0 : index
    %49 = vector.load %arg14[%c16, %c0_30] : memref<32x512xf32, #tpu.memory_space<vmem>>, vector<1x256xf32>
    tpu.vector_store %arg14[%c16, %c0_30], %48 {strides = array<i32>} : memref<32x512xf32, #tpu.memory_space<vmem>>, vector<1x256xf32>,
    %50 = vector.extract_strided_slice %15 {offsets = [0, 4352], sizes = [1, 256], strides = [1, 1]} : vector<2x8192xf32> to vector<1x256xf32>
    %c17 = arith.constant 17 : index
    %c0_31 = arith.constant 0 : index
    %51 = vector.load %arg14[%c17, %c0_31] : memref<32x512xf32, #tpu.memory_space<vmem>>, vector<1x256xf32>
    tpu.vector_store %arg14[%c17, %c0_31], %50 {strides = array<i32>} : memref<32x512xf32, #tpu.memory_space<vmem>>, vector<1x256xf32>,
    %52 = vector.extract_strided_slice %15 {offsets = [0, 4608], sizes = [1, 256], strides = [1, 1]} : vector<2x8192xf32> to vector<1x256xf32>
    %c18 = arith.constant 18 : index
    %c0_32 = arith.constant 0 : index
    %53 = vector.load %arg14[%c18, %c0_32] : memref<32x512xf32, #tpu.memory_space<vmem>>, vector<1x256xf32>
    tpu.vector_store %arg14[%c18, %c0_32], %52 {strides = array<i32>} : memref<32x512xf32, #tpu.memory_space<vmem>>, vector<1x256xf32>,
    %54 = vector.extract_strided_slice %15 {offsets = [0, 4864], sizes = [1, 256], strides = [1, 1]} : vector<2x8192xf32> to vector<1x256xf32>
    %c19 = arith.constant 19 : index
    %c0_33 = arith.constant 0 : index
    %55 = vector.load %arg14[%c19, %c0_33] : memref<32x512xf32, #tpu.memory_space<vmem>>, vector<1x256xf32>
    tpu.vector_store %arg14[%c19, %c0_33], %54 {strides = array<i32>} : memref<32x512xf32, #tpu.memory_space<vmem>>, vector<1x256xf32>,
    %56 = vector.extract_strided_slice %15 {offsets = [0, 5120], sizes = [1, 256], strides = [1, 1]} : vector<2x8192xf32> to vector<1x256xf32>
    %c20 = arith.constant 20 : index
    %c0_34 = arith.constant 0 : index
    %57 = vector.load %arg14[%c20, %c0_34] : memref<32x512xf32, #tpu.memory_space<vmem>>, vector<1x256xf32>
    tpu.vector_store %arg14[%c20, %c0_34], %56 {strides = array<i32>} : memref<32x512xf32, #tpu.memory_space<vmem>>, vector<1x256xf32>,
    %58 = vector.extract_strided_slice %15 {offsets = [0, 5376], sizes = [1, 256], strides = [1, 1]} : vector<2x8192xf32> to vector<1x256xf32>
    %c21 = arith.constant 21 : index
    %c0_35 = arith.constant 0 : index
    %59 = vector.load %arg14[%c21, %c0_35] : memref<32x512xf32, #tpu.memory_space<vmem>>, vector<1x256xf32>
    tpu.vector_store %arg14[%c21, %c0_35], %58 {strides = array<i32>} : memref<32x512xf32, #tpu.memory_space<vmem>>, vector<1x256xf32>,
    %60 = vector.extract_strided_slice %15 {offsets = [0, 5632], sizes = [1, 256], strides = [1, 1]} : vector<2x8192xf32> to vector<1x256xf32>
    %c22 = arith.constant 22 : index
    %c0_36 = arith.constant 0 : index
    %61 = vector.load %arg14[%c22, %c0_36] : memref<32x512xf32, #tpu.memory_space<vmem>>, vector<1x256xf32>
    tpu.vector_store %arg14[%c22, %c0_36], %60 {strides = array<i32>} : memref<32x512xf32, #tpu.memory_space<vmem>>, vector<1x256xf32>,
    %62 = vector.extract_strided_slice %15 {offsets = [0, 5888], sizes = [1, 256], strides = [1, 1]} : vector<2x8192xf32> to vector<1x256xf32>
    %c23 = arith.constant 23 : index
    %c0_37 = arith.constant 0 : index
    %63 = vector.load %arg14[%c23, %c0_37] : memref<32x512xf32, #tpu.memory_space<vmem>>, vector<1x256xf32>
    tpu.vector_store %arg14[%c23, %c0_37], %62 {strides = array<i32>} : memref<32x512xf32, #tpu.memory_space<vmem>>, vector<1x256xf32>,
    %64 = vector.extract_strided_slice %15 {offsets = [0, 6144], sizes = [1, 256], strides = [1, 1]} : vector<2x8192xf32> to vector<1x256xf32>
    %c24 = arith.constant 24 : index
    %c0_38 = arith.constant 0 : index
    %65 = vector.load %arg14[%c24, %c0_38] : memref<32x512xf32, #tpu.memory_space<vmem>>, vector<1x256xf32>
    tpu.vector_store %arg14[%c24, %c0_38], %64 {strides = array<i32>} : memref<32x512xf32, #tpu.memory_space<vmem>>, vector<1x256xf32>,
    %66 = vector.extract_strided_slice %15 {offsets = [0, 6400], sizes = [1, 256], strides = [1, 1]} : vector<2x8192xf32> to vector<1x256xf32>
    %c25 = arith.constant 25 : index
    %c0_39 = arith.constant 0 : index
    %67 = vector.load %arg14[%c25, %c0_39] : memref<32x512xf32, #tpu.memory_space<vmem>>, vector<1x256xf32>
    tpu.vector_store %arg14[%c25, %c0_39], %66 {strides = array<i32>} : memref<32x512xf32, #tpu.memory_space<vmem>>, vector<1x256xf32>,
    %68 = vector.extract_strided_slice %15 {offsets = [0, 6656], sizes = [1, 256], strides = [1, 1]} : vector<2x8192xf32> to vector<1x256xf32>
    %c26 = arith.constant 26 : index
    %c0_40 = arith.constant 0 : index
    %69 = vector.load %arg14[%c26, %c0_40] : memref<32x512xf32, #tpu.memory_space<vmem>>, vector<1x256xf32>
    tpu.vector_store %arg14[%c26, %c0_40], %68 {strides = array<i32>} : memref<32x512xf32, #tpu.memory_space<vmem>>, vector<1x256xf32>,
    %70 = vector.extract_strided_slice %15 {offsets = [0, 6912], sizes = [1, 256], strides = [1, 1]} : vector<2x8192xf32> to vector<1x256xf32>
    %c27 = arith.constant 27 : index
    %c0_41 = arith.constant 0 : index
    %71 = vector.load %arg14[%c27, %c0_41] : memref<32x512xf32, #tpu.memory_space<vmem>>, vector<1x256xf32>
    tpu.vector_store %arg14[%c27, %c0_41], %70 {strides = array<i32>} : memref<32x512xf32, #tpu.memory_space<vmem>>, vector<1x256xf32>,
    %72 = vector.extract_strided_slice %15 {offsets = [0, 7168], sizes = [1, 256], strides = [1, 1]} : vector<2x8192xf32> to vector<1x256xf32>
    %c28 = arith.constant 28 : index
    %c0_42 = arith.constant 0 : index
    %73 = vector.load %arg14[%c28, %c0_42] : memref<32x512xf32, #tpu.memory_space<vmem>>, vector<1x256xf32>
    tpu.vector_store %arg14[%c28, %c0_42], %72 {strides = array<i32>} : memref<32x512xf32, #tpu.memory_space<vmem>>, vector<1x256xf32>,
    %74 = vector.extract_strided_slice %15 {offsets = [0, 7424], sizes = [1, 256], strides = [1, 1]} : vector<2x8192xf32> to vector<1x256xf32>
    %c29 = arith.constant 29 : index
    %c0_43 = arith.constant 0 : index
    %75 = vector.load %arg14[%c29, %c0_43] : memref<32x512xf32, #tpu.memory_space<vmem>>, vector<1x256xf32>
    tpu.vector_store %arg14[%c29, %c0_43], %74 {strides = array<i32>} : memref<32x512xf32, #tpu.memory_space<vmem>>, vector<1x256xf32>,
    %76 = vector.extract_strided_slice %15 {offsets = [0, 7680], sizes = [1, 256], strides = [1, 1]} : vector<2x8192xf32> to vector<1x256xf32>
    %c30 = arith.constant 30 : index
    %c0_44 = arith.constant 0 : index
    %77 = vector.load %arg14[%c30, %c0_44] : memref<32x512xf32, #tpu.memory_space<vmem>>, vector<1x256xf32>
    tpu.vector_store %arg14[%c30, %c0_44], %76 {strides = array<i32>} : memref<32x512xf32, #tpu.memory_space<vmem>>, vector<1x256xf32>,
    %78 = vector.extract_strided_slice %15 {offsets = [0, 7936], sizes = [1, 256], strides = [1, 1]} : vector<2x8192xf32> to vector<1x256xf32>
    %c31 = arith.constant 31 : index
    %c0_45 = arith.constant 0 : index
    %79 = vector.load %arg14[%c31, %c0_45] : memref<32x512xf32, #tpu.memory_space<vmem>>, vector<1x256xf32>
    tpu.vector_store %arg14[%c31, %c0_45], %78 {strides = array<i32>} : memref<32x512xf32, #tpu.memory_space<vmem>>, vector<1x256xf32>,
    %80 = vector.extract_strided_slice %15 {offsets = [1, 0], sizes = [1, 256], strides = [1, 1]} : vector<2x8192xf32> to vector<1x256xf32>
    %c0_46 = arith.constant 0 : index
    %c256 = arith.constant 256 : index
    %81 = vector.load %arg14[%c0_46, %c256] : memref<32x512xf32, #tpu.memory_space<vmem>>, vector<1x256xf32>
    tpu.vector_store %arg14[%c0_46, %c256], %80 {strides = array<i32>} : memref<32x512xf32, #tpu.memory_space<vmem>>, vector<1x256xf32>,
    %82 = vector.extract_strided_slice %15 {offsets = [1, 256], sizes = [1, 256], strides = [1, 1]} : vector<2x8192xf32> to vector<1x256xf32>
    %c1_47 = arith.constant 1 : index
    %c256_48 = arith.constant 256 : index
    %83 = vector.load %arg14[%c1_47, %c256_48] : memref<32x512xf32, #tpu.memory_space<vmem>>, vector<1x256xf32>
    tpu.vector_store %arg14[%c1_47, %c256_48], %82 {strides = array<i32>} : memref<32x512xf32, #tpu.memory_space<vmem>>, vector<1x256xf32>,
    %84 = vector.extract_strided_slice %15 {offsets = [1, 512], sizes = [1, 256], strides = [1, 1]} : vector<2x8192xf32> to vector<1x256xf32>
    %c2_49 = arith.constant 2 : index
    %c256_50 = arith.constant 256 : index
    %85 = vector.load %arg14[%c2_49, %c256_50] : memref<32x512xf32, #tpu.memory_space<vmem>>, vector<1x256xf32>
    tpu.vector_store %arg14[%c2_49, %c256_50], %84 {strides = array<i32>} : memref<32x512xf32, #tpu.memory_space<vmem>>, vector<1x256xf32>,
    %86 = vector.extract_strided_slice %15 {offsets = [1, 768], sizes = [1, 256], strides = [1, 1]} : vector<2x8192xf32> to vector<1x256xf32>
    %c3_51 = arith.constant 3 : index
    %c256_52 = arith.constant 256 : index
    %87 = vector.load %arg14[%c3_51, %c256_52] : memref<32x512xf32, #tpu.memory_space<vmem>>, vector<1x256xf32>
    tpu.vector_store %arg14[%c3_51, %c256_52], %86 {strides = array<i32>} : memref<32x512xf32, #tpu.memory_space<vmem>>, vector<1x256xf32>,
    %88 = vector.extract_strided_slice %15 {offsets = [1, 1024], sizes = [1, 256], strides = [1, 1]} : vector<2x8192xf32> to vector<1x256xf32>
    %c4_53 = arith.constant 4 : index
    %c256_54 = arith.constant 256 : index
    %89 = vector.load %arg14[%c4_53, %c256_54] : memref<32x512xf32, #tpu.memory_space<vmem>>, vector<1x256xf32>
    tpu.vector_store %arg14[%c4_53, %c256_54], %88 {strides = array<i32>} : memref<32x512xf32, #tpu.memory_space<vmem>>, vector<1x256xf32>,
    %90 = vector.extract_strided_slice %15 {offsets = [1, 1280], sizes = [1, 256], strides = [1, 1]} : vector<2x8192xf32> to vector<1x256xf32>
    %c5_55 = arith.constant 5 : index
    %c256_56 = arith.constant 256 : index
    %91 = vector.load %arg14[%c5_55, %c256_56] : memref<32x512xf32, #tpu.memory_space<vmem>>, vector<1x256xf32>
    tpu.vector_store %arg14[%c5_55, %c256_56], %90 {strides = array<i32>} : memref<32x512xf32, #tpu.memory_space<vmem>>, vector<1x256xf32>,
    %92 = vector.extract_strided_slice %15 {offsets = [1, 1536], sizes = [1, 256], strides = [1, 1]} : vector<2x8192xf32> to vector<1x256xf32>
    %c6_57 = arith.constant 6 : index
    %c256_58 = arith.constant 256 : index
    %93 = vector.load %arg14[%c6_57, %c256_58] : memref<32x512xf32, #tpu.memory_space<vmem>>, vector<1x256xf32>
    tpu.vector_store %arg14[%c6_57, %c256_58], %92 {strides = array<i32>} : memref<32x512xf32, #tpu.memory_space<vmem>>, vector<1x256xf32>,
    %94 = vector.extract_strided_slice %15 {offsets = [1, 1792], sizes = [1, 256], strides = [1, 1]} : vector<2x8192xf32> to vector<1x256xf32>
    %c7_59 = arith.constant 7 : index
    %c256_60 = arith.constant 256 : index
    %95 = vector.load %arg14[%c7_59, %c256_60] : memref<32x512xf32, #tpu.memory_space<vmem>>, vector<1x256xf32>
    tpu.vector_store %arg14[%c7_59, %c256_60], %94 {strides = array<i32>} : memref<32x512xf32, #tpu.memory_space<vmem>>, vector<1x256xf32>,
    %96 = vector.extract_strided_slice %15 {offsets = [1, 2048], sizes = [1, 256], strides = [1, 1]} : vector<2x8192xf32> to vector<1x256xf32>
    %c8_61 = arith.constant 8 : index
    %c256_62 = arith.constant 256 : index
    %97 = vector.load %arg14[%c8_61, %c256_62] : memref<32x512xf32, #tpu.memory_space<vmem>>, vector<1x256xf32>
    tpu.vector_store %arg14[%c8_61, %c256_62], %96 {strides = array<i32>} : memref<32x512xf32, #tpu.memory_space<vmem>>, vector<1x256xf32>,
    %98 = vector.extract_strided_slice %15 {offsets = [1, 2304], sizes = [1, 256], strides = [1, 1]} : vector<2x8192xf32> to vector<1x256xf32>
    %c9_63 = arith.constant 9 : index
    %c256_64 = arith.constant 256 : index
    %99 = vector.load %arg14[%c9_63, %c256_64] : memref<32x512xf32, #tpu.memory_space<vmem>>, vector<1x256xf32>
    tpu.vector_store %arg14[%c9_63, %c256_64], %98 {strides = array<i32>} : memref<32x512xf32, #tpu.memory_space<vmem>>, vector<1x256xf32>,
    %100 = vector.extract_strided_slice %15 {offsets = [1, 2560], sizes = [1, 256], strides = [1, 1]} : vector<2x8192xf32> to vector<1x256xf32>
    %c10_65 = arith.constant 10 : index
    %c256_66 = arith.constant 256 : index
    %101 = vector.load %arg14[%c10_65, %c256_66] : memref<32x512xf32, #tpu.memory_space<vmem>>, vector<1x256xf32>
    tpu.vector_store %arg14[%c10_65, %c256_66], %100 {strides = array<i32>} : memref<32x512xf32, #tpu.memory_space<vmem>>, vector<1x256xf32>,
    %102 = vector.extract_strided_slice %15 {offsets = [1, 2816], sizes = [1, 256], strides = [1, 1]} : vector<2x8192xf32> to vector<1x256xf32>
    %c11_67 = arith.constant 11 : index
    %c256_68 = arith.constant 256 : index
    %103 = vector.load %arg14[%c11_67, %c256_68] : memref<32x512xf32, #tpu.memory_space<vmem>>, vector<1x256xf32>
    tpu.vector_store %arg14[%c11_67, %c256_68], %102 {strides = array<i32>} : memref<32x512xf32, #tpu.memory_space<vmem>>, vector<1x256xf32>,
    %104 = vector.extract_strided_slice %15 {offsets = [1, 3072], sizes = [1, 256], strides = [1, 1]} : vector<2x8192xf32> to vector<1x256xf32>
    %c12_69 = arith.constant 12 : index
    %c256_70 = arith.constant 256 : index
    %105 = vector.load %arg14[%c12_69, %c256_70] : memref<32x512xf32, #tpu.memory_space<vmem>>, vector<1x256xf32>
    tpu.vector_store %arg14[%c12_69, %c256_70], %104 {strides = array<i32>} : memref<32x512xf32, #tpu.memory_space<vmem>>, vector<1x256xf32>,
    %106 = vector.extract_strided_slice %15 {offsets = [1, 3328], sizes = [1, 256], strides = [1, 1]} : vector<2x8192xf32> to vector<1x256xf32>
    %c13_71 = arith.constant 13 : index
    %c256_72 = arith.constant 256 : index
    %107 = vector.load %arg14[%c13_71, %c256_72] : memref<32x512xf32, #tpu.memory_space<vmem>>, vector<1x256xf32>
    tpu.vector_store %arg14[%c13_71, %c256_72], %106 {strides = array<i32>} : memref<32x512xf32, #tpu.memory_space<vmem>>, vector<1x256xf32>,
    %108 = vector.extract_strided_slice %15 {offsets = [1, 3584], sizes = [1, 256], strides = [1, 1]} : vector<2x8192xf32> to vector<1x256xf32>
    %c14_73 = arith.constant 14 : index
    %c256_74 = arith.constant 256 : index
    %109 = vector.load %arg14[%c14_73, %c256_74] : memref<32x512xf32, #tpu.memory_space<vmem>>, vector<1x256xf32>
    tpu.vector_store %arg14[%c14_73, %c256_74], %108 {strides = array<i32>} : memref<32x512xf32, #tpu.memory_space<vmem>>, vector<1x256xf32>,
    %110 = vector.extract_strided_slice %15 {offsets = [1, 3840], sizes = [1, 256], strides = [1, 1]} : vector<2x8192xf32> to vector<1x256xf32>
    %c15_75 = arith.constant 15 : index
    %c256_76 = arith.constant 256 : index
    %111 = vector.load %arg14[%c15_75, %c256_76] : memref<32x512xf32, #tpu.memory_space<vmem>>, vector<1x256xf32>
    tpu.vector_store %arg14[%c15_75, %c256_76], %110 {strides = array<i32>} : memref<32x512xf32, #tpu.memory_space<vmem>>, vector<1x256xf32>,
    %112 = vector.extract_strided_slice %15 {offsets = [1, 4096], sizes = [1, 256], strides = [1, 1]} : vector<2x8192xf32> to vector<1x256xf32>
    %c16_77 = arith.constant 16 : index
    %c256_78 = arith.constant 256 : index
    %113 = vector.load %arg14[%c16_77, %c256_78] : memref<32x512xf32, #tpu.memory_space<vmem>>, vector<1x256xf32>
    tpu.vector_store %arg14[%c16_77, %c256_78], %112 {strides = array<i32>} : memref<32x512xf32, #tpu.memory_space<vmem>>, vector<1x256xf32>,
    %114 = vector.extract_strided_slice %15 {offsets = [1, 4352], sizes = [1, 256], strides = [1, 1]} : vector<2x8192xf32> to vector<1x256xf32>
    %c17_79 = arith.constant 17 : index
    %c256_80 = arith.constant 256 : index
    %115 = vector.load %arg14[%c17_79, %c256_80] : memref<32x512xf32, #tpu.memory_space<vmem>>, vector<1x256xf32>
    tpu.vector_store %arg14[%c17_79, %c256_80], %114 {strides = array<i32>} : memref<32x512xf32, #tpu.memory_space<vmem>>, vector<1x256xf32>,
    %116 = vector.extract_strided_slice %15 {offsets = [1, 4608], sizes = [1, 256], strides = [1, 1]} : vector<2x8192xf32> to vector<1x256xf32>
    %c18_81 = arith.constant 18 : index
    %c256_82 = arith.constant 256 : index
    %117 = vector.load %arg14[%c18_81, %c256_82] : memref<32x512xf32, #tpu.memory_space<vmem>>, vector<1x256xf32>
    tpu.vector_store %arg14[%c18_81, %c256_82], %116 {strides = array<i32>} : memref<32x512xf32, #tpu.memory_space<vmem>>, vector<1x256xf32>,
    %118 = vector.extract_strided_slice %15 {offsets = [1, 4864], sizes = [1, 256], strides = [1, 1]} : vector<2x8192xf32> to vector<1x256xf32>
    %c19_83 = arith.constant 19 : index
    %c256_84 = arith.constant 256 : index
    %119 = vector.load %arg14[%c19_83, %c256_84] : memref<32x512xf32, #tpu.memory_space<vmem>>, vector<1x256xf32>
    tpu.vector_store %arg14[%c19_83, %c256_84], %118 {strides = array<i32>} : memref<32x512xf32, #tpu.memory_space<vmem>>, vector<1x256xf32>,
    %120 = vector.extract_strided_slice %15 {offsets = [1, 5120], sizes = [1, 256], strides = [1, 1]} : vector<2x8192xf32> to vector<1x256xf32>
    %c20_85 = arith.constant 20 : index
    %c256_86 = arith.constant 256 : index
    %121 = vector.load %arg14[%c20_85, %c256_86] : memref<32x512xf32, #tpu.memory_space<vmem>>, vector<1x256xf32>
    tpu.vector_store %arg14[%c20_85, %c256_86], %120 {strides = array<i32>} : memref<32x512xf32, #tpu.memory_space<vmem>>, vector<1x256xf32>,
    %122 = vector.extract_strided_slice %15 {offsets = [1, 5376], sizes = [1, 256], strides = [1, 1]} : vector<2x8192xf32> to vector<1x256xf32>
    %c21_87 = arith.constant 21 : index
    %c256_88 = arith.constant 256 : index
    %123 = vector.load %arg14[%c21_87, %c256_88] : memref<32x512xf32, #tpu.memory_space<vmem>>, vector<1x256xf32>
    tpu.vector_store %arg14[%c21_87, %c256_88], %122 {strides = array<i32>} : memref<32x512xf32, #tpu.memory_space<vmem>>, vector<1x256xf32>,
    %124 = vector.extract_strided_slice %15 {offsets = [1, 5632], sizes = [1, 256], strides = [1, 1]} : vector<2x8192xf32> to vector<1x256xf32>
    %c22_89 = arith.constant 22 : index
    %c256_90 = arith.constant 256 : index
    %125 = vector.load %arg14[%c22_89, %c256_90] : memref<32x512xf32, #tpu.memory_space<vmem>>, vector<1x256xf32>
    tpu.vector_store %arg14[%c22_89, %c256_90], %124 {strides = array<i32>} : memref<32x512xf32, #tpu.memory_space<vmem>>, vector<1x256xf32>,
    %126 = vector.extract_strided_slice %15 {offsets = [1, 5888], sizes = [1, 256], strides = [1, 1]} : vector<2x8192xf32> to vector<1x256xf32>
    %c23_91 = arith.constant 23 : index
    %c256_92 = arith.constant 256 : index
    %127 = vector.load %arg14[%c23_91, %c256_92] : memref<32x512xf32, #tpu.memory_space<vmem>>, vector<1x256xf32>
    tpu.vector_store %arg14[%c23_91, %c256_92], %126 {strides = array<i32>} : memref<32x512xf32, #tpu.memory_space<vmem>>, vector<1x256xf32>,
    %128 = vector.extract_strided_slice %15 {offsets = [1, 6144], sizes = [1, 256], strides = [1, 1]} : vector<2x8192xf32> to vector<1x256xf32>
    %c24_93 = arith.constant 24 : index
    %c256_94 = arith.constant 256 : index
    %129 = vector.load %arg14[%c24_93, %c256_94] : memref<32x512xf32, #tpu.memory_space<vmem>>, vector<1x256xf32>
    tpu.vector_store %arg14[%c24_93, %c256_94], %128 {strides = array<i32>} : memref<32x512xf32, #tpu.memory_space<vmem>>, vector<1x256xf32>,
    %130 = vector.extract_strided_slice %15 {offsets = [1, 6400], sizes = [1, 256], strides = [1, 1]} : vector<2x8192xf32> to vector<1x256xf32>
    %c25_95 = arith.constant 25 : index
    %c256_96 = arith.constant 256 : index
    %131 = vector.load %arg14[%c25_95, %c256_96] : memref<32x512xf32, #tpu.memory_space<vmem>>, vector<1x256xf32>
    tpu.vector_store %arg14[%c25_95, %c256_96], %130 {strides = array<i32>} : memref<32x512xf32, #tpu.memory_space<vmem>>, vector<1x256xf32>,
    %132 = vector.extract_strided_slice %15 {offsets = [1, 6656], sizes = [1, 256], strides = [1, 1]} : vector<2x8192xf32> to vector<1x256xf32>
    %c26_97 = arith.constant 26 : index
    %c256_98 = arith.constant 256 : index
    %133 = vector.load %arg14[%c26_97, %c256_98] : memref<32x512xf32, #tpu.memory_space<vmem>>, vector<1x256xf32>
    tpu.vector_store %arg14[%c26_97, %c256_98], %132 {strides = array<i32>} : memref<32x512xf32, #tpu.memory_space<vmem>>, vector<1x256xf32>,
    %134 = vector.extract_strided_slice %15 {offsets = [1, 6912], sizes = [1, 256], strides = [1, 1]} : vector<2x8192xf32> to vector<1x256xf32>
    %c27_99 = arith.constant 27 : index
    %c256_100 = arith.constant 256 : index
    %135 = vector.load %arg14[%c27_99, %c256_100] : memref<32x512xf32, #tpu.memory_space<vmem>>, vector<1x256xf32>
    tpu.vector_store %arg14[%c27_99, %c256_100], %134 {strides = array<i32>} : memref<32x512xf32, #tpu.memory_space<vmem>>, vector<1x256xf32>,
    %136 = vector.extract_strided_slice %15 {offsets = [1, 7168], sizes = [1, 256], strides = [1, 1]} : vector<2x8192xf32> to vector<1x256xf32>
    %c28_101 = arith.constant 28 : index
    %c256_102 = arith.constant 256 : index
    %137 = vector.load %arg14[%c28_101, %c256_102] : memref<32x512xf32, #tpu.memory_space<vmem>>, vector<1x256xf32>
    tpu.vector_store %arg14[%c28_101, %c256_102], %136 {strides = array<i32>} : memref<32x512xf32, #tpu.memory_space<vmem>>, vector<1x256xf32>,
    %138 = vector.extract_strided_slice %15 {offsets = [1, 7424], sizes = [1, 256], strides = [1, 1]} : vector<2x8192xf32> to vector<1x256xf32>
    %c29_103 = arith.constant 29 : index
    %c256_104 = arith.constant 256 : index
    %139 = vector.load %arg14[%c29_103, %c256_104] : memref<32x512xf32, #tpu.memory_space<vmem>>, vector<1x256xf32>
    tpu.vector_store %arg14[%c29_103, %c256_104], %138 {strides = array<i32>} : memref<32x512xf32, #tpu.memory_space<vmem>>, vector<1x256xf32>,
    %140 = vector.extract_strided_slice %15 {offsets = [1, 7680], sizes = [1, 256], strides = [1, 1]} : vector<2x8192xf32> to vector<1x256xf32>
    %c30_105 = arith.constant 30 : index
    %c256_106 = arith.constant 256 : index
    %141 = vector.load %arg14[%c30_105, %c256_106] : memref<32x512xf32, #tpu.memory_space<vmem>>, vector<1x256xf32>
    tpu.vector_store %arg14[%c30_105, %c256_106], %140 {strides = array<i32>} : memref<32x512xf32, #tpu.memory_space<vmem>>, vector<1x256xf32>,
    %142 = vector.extract_strided_slice %15 {offsets = [1, 7936], sizes = [1, 256], strides = [1, 1]} : vector<2x8192xf32> to vector<1x256xf32>
    %c31_107 = arith.constant 31 : index
    %c256_108 = arith.constant 256 : index
    %143 = vector.load %arg14[%c31_107, %c256_108] : memref<32x512xf32, #tpu.memory_space<vmem>>, vector<1x256xf32>
    tpu.vector_store %arg14[%c31_107, %c256_108], %142 {strides = array<i32>} : memref<32x512xf32, #tpu.memory_space<vmem>>, vector<1x256xf32>,
    %c0_109 = arith.constant 0 : index
    %c0_110 = arith.constant 0 : index
    %144 = vector.load %arg14[%c0_109, %c0_110] : memref<32x512xf32, #tpu.memory_space<vmem>>, vector<32x512xf32>
    %c0_111 = arith.constant 0 : index
    %c0_112 = arith.constant 0 : index
    %145 = vector.load %arg2[%c0_111, %c0_112] : memref<9x512xf32, #tpu.memory_space<vmem>>, vector<9x512xf32>
    %146 = vector.extract_strided_slice %145 {offsets = [0, 0], sizes = [1, 512], strides = [1, 1]} : vector<9x512xf32> to vector<1x512xf32>
    %147 = vector.shape_cast %146 : vector<1x512xf32> to vector<1x512xf32>
    %148 = vector.broadcast %147 : vector<1x512xf32> to vector<32x512xf32>
    %149 = vector.extract_strided_slice %145 {offsets = [1, 0], sizes = [1, 512], strides = [1, 1]} : vector<9x512xf32> to vector<1x512xf32>
    %150 = vector.shape_cast %149 : vector<1x512xf32> to vector<1x512xf32>
    %151 = vector.broadcast %150 : vector<1x512xf32> to vector<32x512xf32>
    %152 = vector.extract_strided_slice %145 {offsets = [2, 0], sizes = [1, 512], strides = [1, 1]} : vector<9x512xf32> to vector<1x512xf32>
    %153 = vector.shape_cast %152 : vector<1x512xf32> to vector<1x512xf32>
    %154 = vector.broadcast %153 : vector<1x512xf32> to vector<32x512xf32>
    %155 = vector.extract_strided_slice %145 {offsets = [3, 0], sizes = [1, 512], strides = [1, 1]} : vector<9x512xf32> to vector<1x512xf32>
    %156 = vector.shape_cast %155 : vector<1x512xf32> to vector<1x512xf32>
    %157 = vector.broadcast %156 : vector<1x512xf32> to vector<32x512xf32>
    %158 = vector.extract_strided_slice %145 {offsets = [5, 0], sizes = [1, 512], strides = [1, 1]} : vector<9x512xf32> to vector<1x512xf32>
    %159 = vector.shape_cast %158 : vector<1x512xf32> to vector<1x512xf32>
    %160 = vector.broadcast %159 : vector<1x512xf32> to vector<32x512xf32>
    %161 = vector.extract_strided_slice %145 {offsets = [6, 0], sizes = [1, 512], strides = [1, 1]} : vector<9x512xf32> to vector<1x512xf32>
    %162 = vector.shape_cast %161 : vector<1x512xf32> to vector<1x512xf32>
    %163 = vector.broadcast %162 : vector<1x512xf32> to vector<32x512xf32>
    %164 = vector.extract_strided_slice %145 {offsets = [7, 0], sizes = [1, 512], strides = [1, 1]} : vector<9x512xf32> to vector<1x512xf32>
    %165 = vector.shape_cast %164 : vector<1x512xf32> to vector<1x512xf32>
    %166 = vector.broadcast %165 : vector<1x512xf32> to vector<32x512xf32>
    %167 = vector.extract_strided_slice %145 {offsets = [8, 0], sizes = [1, 512], strides = [1, 1]} : vector<9x512xf32> to vector<1x512xf32>
    %168 = vector.shape_cast %167 : vector<1x512xf32> to vector<1x512xf32>
    %169 = vector.broadcast %168 : vector<1x512xf32> to vector<32x512xf32>
    %c0_113 = arith.constant 0 : index
    %c0_114 = arith.constant 0 : index
    %170 = vector.load %arg7[%c0_113, %c0_114] : memref<16x288xf32, #tpu.memory_space<vmem>>, vector<16x288xf32>
    %c17_i32 = arith.constant 17 : i32
    %171 = tpu.dynamic_rotate %144 by %c17_i32 dim 1 : vector<32x512xf32>, i32 -> vector<32x512xf32>
    %172 = arith.mulf %171, %148 : vector<32x512xf32>
    %c16_i32 = arith.constant 16 : i32
    %173 = tpu.dynamic_rotate %144 by %c16_i32 dim 1 : vector<32x512xf32>, i32 -> vector<32x512xf32>
    %174 = arith.mulf %173, %151 : vector<32x512xf32>
    %c15_i32 = arith.constant 15 : i32
    %175 = tpu.dynamic_rotate %144 by %c15_i32 dim 1 : vector<32x512xf32>, i32 -> vector<32x512xf32>
    %176 = arith.mulf %175, %154 : vector<32x512xf32>
    %c1_i32 = arith.constant 1 : i32
    %177 = tpu.dynamic_rotate %144 by %c1_i32 dim 1 : vector<32x512xf32>, i32 -> vector<32x512xf32>
    %178 = arith.mulf %177, %157 : vector<32x512xf32>
    %c511_i32 = arith.constant 511 : i32
    %179 = tpu.dynamic_rotate %144 by %c511_i32 dim 1 : vector<32x512xf32>, i32 -> vector<32x512xf32>
    %180 = arith.mulf %179, %160 : vector<32x512xf32>
    %c497_i32 = arith.constant 497 : i32
    %181 = tpu.dynamic_rotate %144 by %c497_i32 dim 1 : vector<32x512xf32>, i32 -> vector<32x512xf32>
    %182 = arith.mulf %181, %163 : vector<32x512xf32>
    %c496_i32 = arith.constant 496 : i32
    %183 = tpu.dynamic_rotate %144 by %c496_i32 dim 1 : vector<32x512xf32>, i32 -> vector<32x512xf32>
    %184 = arith.mulf %183, %166 : vector<32x512xf32>
    %c495_i32 = arith.constant 495 : i32
    %185 = tpu.dynamic_rotate %144 by %c495_i32 dim 1 : vector<32x512xf32>, i32 -> vector<32x512xf32>
    %186 = arith.mulf %185, %169 : vector<32x512xf32>
    %187 = tpu.concatenate %172, %174, %176, %178, %144, %180, %182, %184, %186 in 0 : vector<32x512xf32>, vector<32x512xf32>, vector<32x512xf32>, vector<32x512xf32>, vector<32x512xf32>, vector<32x512xf32>, vector<32x512xf32>, vector<32x512xf32>, vector<32x512xf32> -> vector<288x512xf32>
    %cst_115 = arith.constant dense<0.000000e+00> : vector<16x512xf32>
    %188 = tpu.matmul %170, %187, %cst_115 {dimension_numbers = #tpu.dot_dimension_numbers<[1], [0], [0], [1], [0, 0, 1, 1], [], []>} : vector<16x288xf32>, vector<288x512xf32>, vector<16x512xf32> -> vector<16x512xf32>
    %c0_116 = arith.constant 0 : index
    %c0_117 = arith.constant 0 : index
    %189 = vector.load %arg8[%c0_116, %c0_117] : memref<16x1xf32, #tpu.memory_space<vmem>>, vector<16x1xf32>
    %190 = vector.broadcast %189 : vector<16x1xf32> to vector<16x512xf32>
    %191 = arith.addf %188, %190 : vector<16x512xf32>
    %cst_118 = arith.constant 0.000000e+00 : f32
    %192 = vector.broadcast %cst_118 : f32 to vector<16x512xf32>
    %193 = arith.maximumf %191, %192 : vector<16x512xf32>
    %c0_119 = arith.constant 0 : index
    %c0_120 = arith.constant 0 : index
    %194 = vector.load %arg9[%c0_119, %c0_120] : memref<8x144xf32, #tpu.memory_space<vmem>>, vector<8x144xf32>
    %c17_i32_121 = arith.constant 17 : i32
    %195 = tpu.dynamic_rotate %193 by %c17_i32_121 dim 1 : vector<16x512xf32>, i32 -> vector<16x512xf32>
    %196 = vector.extract_strided_slice %148 {offsets = [0, 0], sizes = [16, 512], strides = [1, 1]} : vector<32x512xf32> to vector<16x512xf32>
    %197 = arith.mulf %195, %196 : vector<16x512xf32>
    %c16_i32_122 = arith.constant 16 : i32
    %198 = tpu.dynamic_rotate %193 by %c16_i32_122 dim 1 : vector<16x512xf32>, i32 -> vector<16x512xf32>
    %199 = vector.extract_strided_slice %151 {offsets = [0, 0], sizes = [16, 512], strides = [1, 1]} : vector<32x512xf32> to vector<16x512xf32>
    %200 = arith.mulf %198, %199 : vector<16x512xf32>
    %c15_i32_123 = arith.constant 15 : i32
    %201 = tpu.dynamic_rotate %193 by %c15_i32_123 dim 1 : vector<16x512xf32>, i32 -> vector<16x512xf32>
    %202 = vector.extract_strided_slice %154 {offsets = [0, 0], sizes = [16, 512], strides = [1, 1]} : vector<32x512xf32> to vector<16x512xf32>
    %203 = arith.mulf %201, %202 : vector<16x512xf32>
    %c1_i32_124 = arith.constant 1 : i32
    %204 = tpu.dynamic_rotate %193 by %c1_i32_124 dim 1 : vector<16x512xf32>, i32 -> vector<16x512xf32>
    %205 = vector.extract_strided_slice %157 {offsets = [0, 0], sizes = [16, 512], strides = [1, 1]} : vector<32x512xf32> to vector<16x512xf32>
    %206 = arith.mulf %204, %205 : vector<16x512xf32>
    %c511_i32_125 = arith.constant 511 : i32
    %207 = tpu.dynamic_rotate %193 by %c511_i32_125 dim 1 : vector<16x512xf32>, i32 -> vector<16x512xf32>
    %208 = vector.extract_strided_slice %160 {offsets = [0, 0], sizes = [16, 512], strides = [1, 1]} : vector<32x512xf32> to vector<16x512xf32>
    %209 = arith.mulf %207, %208 : vector<16x512xf32>
    %c497_i32_126 = arith.constant 497 : i32
    %210 = tpu.dynamic_rotate %193 by %c497_i32_126 dim 1 : vector<16x512xf32>, i32 -> vector<16x512xf32>
    %211 = vector.extract_strided_slice %163 {offsets = [0, 0], sizes = [16, 512], strides = [1, 1]} : vector<32x512xf32> to vector<16x512xf32>
    %212 = arith.mulf %210, %211 : vector<16x512xf32>
    %c496_i32_127 = arith.constant 496 : i32
    %213 = tpu.dynamic_rotate %193 by %c496_i32_127 dim 1 : vector<16x512xf32>, i32 -> vector<16x512xf32>
    %214 = vector.extract_strided_slice %166 {offsets = [0, 0], sizes = [16, 512], strides = [1, 1]} : vector<32x512xf32> to vector<16x512xf32>
    %215 = arith.mulf %213, %214 : vector<16x512xf32>
    %c495_i32_128 = arith.constant 495 : i32
    %216 = tpu.dynamic_rotate %193 by %c495_i32_128 dim 1 : vector<16x512xf32>, i32 -> vector<16x512xf32>
    %217 = vector.extract_strided_slice %169 {offsets = [0, 0], sizes = [16, 512], strides = [1, 1]} : vector<32x512xf32> to vector<16x512xf32>
    %218 = arith.mulf %216, %217 : vector<16x512xf32>
    %219 = tpu.concatenate %197, %200, %203, %206, %193, %209, %212, %215, %218 in 0 : vector<16x512xf32>, vector<16x512xf32>, vector<16x512xf32>, vector<16x512xf32>, vector<16x512xf32>, vector<16x512xf32>, vector<16x512xf32>, vector<16x512xf32>, vector<16x512xf32> -> vector<144x512xf32>
    %cst_129 = arith.constant dense<0.000000e+00> : vector<8x512xf32>
    %220 = tpu.matmul %194, %219, %cst_129 {dimension_numbers = #tpu.dot_dimension_numbers<[1], [0], [0], [1], [0, 0, 1, 1], [], []>} : vector<8x144xf32>, vector<144x512xf32>, vector<8x512xf32> -> vector<8x512xf32>
    %c0_130 = arith.constant 0 : index
    %c0_131 = arith.constant 0 : index
    %221 = vector.load %arg10[%c0_130, %c0_131] : memref<8x1xf32, #tpu.memory_space<vmem>>, vector<8x1xf32>
    %222 = vector.broadcast %221 : vector<8x1xf32> to vector<8x512xf32>
    %223 = arith.addf %220, %222 : vector<8x512xf32>
    %cst_132 = arith.constant 0.000000e+00 : f32
    %224 = vector.broadcast %cst_132 : f32 to vector<8x512xf32>
    %225 = arith.maximumf %223, %224 : vector<8x512xf32>
    %c0_133 = arith.constant 0 : index
    %c0_134 = arith.constant 0 : index
    %226 = vector.load %arg11[%c0_133, %c0_134] : memref<72x1xf32, #tpu.memory_space<vmem>>, vector<72x1xf32>
    %c17_i32_135 = arith.constant 17 : i32
    %227 = tpu.dynamic_rotate %225 by %c17_i32_135 dim 1 : vector<8x512xf32>, i32 -> vector<8x512xf32>
    %228 = vector.extract_strided_slice %148 {offsets = [0, 0], sizes = [8, 512], strides = [1, 1]} : vector<32x512xf32> to vector<8x512xf32>
    %229 = arith.mulf %227, %228 : vector<8x512xf32>
    %c16_i32_136 = arith.constant 16 : i32
    %230 = tpu.dynamic_rotate %225 by %c16_i32_136 dim 1 : vector<8x512xf32>, i32 -> vector<8x512xf32>
    %231 = vector.extract_strided_slice %151 {offsets = [0, 0], sizes = [8, 512], strides = [1, 1]} : vector<32x512xf32> to vector<8x512xf32>
    %232 = arith.mulf %230, %231 : vector<8x512xf32>
    %c15_i32_137 = arith.constant 15 : i32
    %233 = tpu.dynamic_rotate %225 by %c15_i32_137 dim 1 : vector<8x512xf32>, i32 -> vector<8x512xf32>
    %234 = vector.extract_strided_slice %154 {offsets = [0, 0], sizes = [8, 512], strides = [1, 1]} : vector<32x512xf32> to vector<8x512xf32>
    %235 = arith.mulf %233, %234 : vector<8x512xf32>
    %c1_i32_138 = arith.constant 1 : i32
    %236 = tpu.dynamic_rotate %225 by %c1_i32_138 dim 1 : vector<8x512xf32>, i32 -> vector<8x512xf32>
    %237 = vector.extract_strided_slice %157 {offsets = [0, 0], sizes = [8, 512], strides = [1, 1]} : vector<32x512xf32> to vector<8x512xf32>
    %238 = arith.mulf %236, %237 : vector<8x512xf32>
    %c511_i32_139 = arith.constant 511 : i32
    %239 = tpu.dynamic_rotate %225 by %c511_i32_139 dim 1 : vector<8x512xf32>, i32 -> vector<8x512xf32>
    %240 = vector.extract_strided_slice %160 {offsets = [0, 0], sizes = [8, 512], strides = [1, 1]} : vector<32x512xf32> to vector<8x512xf32>
    %241 = arith.mulf %239, %240 : vector<8x512xf32>
    %c497_i32_140 = arith.constant 497 : i32
    %242 = tpu.dynamic_rotate %225 by %c497_i32_140 dim 1 : vector<8x512xf32>, i32 -> vector<8x512xf32>
    %243 = vector.extract_strided_slice %163 {offsets = [0, 0], sizes = [8, 512], strides = [1, 1]} : vector<32x512xf32> to vector<8x512xf32>
    %244 = arith.mulf %242, %243 : vector<8x512xf32>
    %c496_i32_141 = arith.constant 496 : i32
    %245 = tpu.dynamic_rotate %225 by %c496_i32_141 dim 1 : vector<8x512xf32>, i32 -> vector<8x512xf32>
    %246 = vector.extract_strided_slice %166 {offsets = [0, 0], sizes = [8, 512], strides = [1, 1]} : vector<32x512xf32> to vector<8x512xf32>
    %247 = arith.mulf %245, %246 : vector<8x512xf32>
    %c495_i32_142 = arith.constant 495 : i32
    %248 = tpu.dynamic_rotate %225 by %c495_i32_142 dim 1 : vector<8x512xf32>, i32 -> vector<8x512xf32>
    %249 = vector.extract_strided_slice %169 {offsets = [0, 0], sizes = [8, 512], strides = [1, 1]} : vector<32x512xf32> to vector<8x512xf32>
    %250 = arith.mulf %248, %249 : vector<8x512xf32>
    %251 = tpu.concatenate %229, %232, %235, %238, %225, %241, %244, %247, %250 in 0 : vector<8x512xf32>, vector<8x512xf32>, vector<8x512xf32>, vector<8x512xf32>, vector<8x512xf32>, vector<8x512xf32>, vector<8x512xf32>, vector<8x512xf32>, vector<8x512xf32> -> vector<72x512xf32>
    %252 = vector.broadcast %226 : vector<72x1xf32> to vector<72x512xf32>
    %253 = arith.mulf %252, %251 : vector<72x512xf32>
    %cst_143 = arith.constant dense<0.000000e+00> : vector<512xf32>
    %254 = vector.multi_reduction <add>, %253, %cst_143 [0] : vector<72x512xf32> to vector<512xf32>
    %255 = vector.shape_cast %254 : vector<512xf32> to vector<1x512xf32>
    %c0_144 = arith.constant 0 : index
    %c0_145 = arith.constant 0 : index
    %256 = vector.load %arg12[%c0_144, %c0_145] : memref<1x1xf32, #tpu.memory_space<vmem>>, vector<1x1xf32>
    %257 = vector.broadcast %256 : vector<1x1xf32> to vector<1x512xf32>
    %258 = arith.addf %255, %257 : vector<1x512xf32>
    %cst_146 = arith.constant 0.000000e+00 : f32
    %259 = vector.broadcast %cst_146 : f32 to vector<1x512xf32>
    %260 = arith.subf %259, %258 : vector<1x512xf32>
    %261 = math.exp %260 : vector<1x512xf32>
    %cst_147 = arith.constant 1.000000e+00 : f32
    %262 = vector.broadcast %cst_147 : f32 to vector<1x512xf32>
    %263 = arith.addf %262, %261 : vector<1x512xf32>
    %cst_148 = arith.constant 1.000000e+00 : f32
    %264 = vector.broadcast %cst_148 : f32 to vector<1x512xf32>
    %265 = arith.divf %264, %263 : vector<1x512xf32>
    %266 = vector.extract_strided_slice %265 {offsets = [0, 0], sizes = [1, 256], strides = [1, 1]} : vector<1x512xf32> to vector<1x256xf32>
    %c0_149 = arith.constant 0 : index
    %c0_150 = arith.constant 0 : index
    %c0_151 = arith.constant 0 : index
    %267 = vector.load %arg13[%c0_149, %c0_150, %c0_151] : memref<1x2x256xf32, #tpu.memory_space<vmem>>, vector<1x1x256xf32>
    %268 = vector.shape_cast %267 : vector<1x1x256xf32> to vector<1x256xf32>
    %269 = vector.shape_cast %266 : vector<1x256xf32> to vector<1x1x256xf32>
    tpu.vector_store %arg13[%c0_149, %c0_150, %c0_151], %269 {strides = array<i32>} : memref<1x2x256xf32, #tpu.memory_space<vmem>>, vector<1x1x256xf32>,
    %270 = vector.extract_strided_slice %265 {offsets = [0, 256], sizes = [1, 256], strides = [1, 1]} : vector<1x512xf32> to vector<1x256xf32>
    %c0_152 = arith.constant 0 : index
    %c1_153 = arith.constant 1 : index
    %c0_154 = arith.constant 0 : index
    %271 = vector.load %arg13[%c0_152, %c1_153, %c0_154] : memref<1x2x256xf32, #tpu.memory_space<vmem>>, vector<1x1x256xf32>
    %272 = vector.shape_cast %271 : vector<1x1x256xf32> to vector<1x256xf32>
    %273 = vector.shape_cast %270 : vector<1x256xf32> to vector<1x1x256xf32>
    tpu.vector_store %arg13[%c0_152, %c1_153, %c0_154], %273 {strides = array<i32>} : memref<1x2x256xf32, #tpu.memory_space<vmem>>, vector<1x1x256xf32>,
    return
  }
  func.func @transform_0(%arg0: i32) -> (i32, i32, i32) {
    %c0_i32 = arith.constant 0 : i32
    %c0_i32_0 = arith.constant 0 : i32
    %c0_i32_1 = arith.constant 0 : i32
    return %arg0, %c0_i32, %c0_i32_0 : i32, i32, i32
  }
  func.func @transform_1(%arg0: i32) -> (i32, i32) {
    %c0_i32 = arith.constant 0 : i32
    %c0_i32_0 = arith.constant 0 : i32
    %c0_i32_1 = arith.constant 0 : i32
    return %c0_i32, %c0_i32_0 : i32, i32
  }
  func.func @transform_2(%arg0: i32) -> (i32, i32) {
    %c0_i32 = arith.constant 0 : i32
    %c0_i32_0 = arith.constant 0 : i32
    %c0_i32_1 = arith.constant 0 : i32
    return %c0_i32, %c0_i32_0 : i32, i32
  }
  func.func @transform_3(%arg0: i32) -> (i32, i32) {
    %c0_i32 = arith.constant 0 : i32
    %c0_i32_0 = arith.constant 0 : i32
    %c0_i32_1 = arith.constant 0 : i32
    return %c0_i32, %c0_i32_0 : i32, i32
  }
  func.func @transform_4(%arg0: i32) -> (i32, i32) {
    %c0_i32 = arith.constant 0 : i32
    %c0_i32_0 = arith.constant 0 : i32
    %c0_i32_1 = arith.constant 0 : i32
    return %c0_i32, %c0_i32_0 : i32, i32
  }
  func.func @transform_5(%arg0: i32) -> (i32, i32) {
    %c0_i32 = arith.constant 0 : i32
    %c0_i32_0 = arith.constant 0 : i32
    %c0_i32_1 = arith.constant 0 : i32
    return %c0_i32, %c0_i32_0 : i32, i32
  }
  func.func @transform_6(%arg0: i32) -> (i32, i32) {
    %c0_i32 = arith.constant 0 : i32
    %c0_i32_0 = arith.constant 0 : i32
    %c0_i32_1 = arith.constant 0 : i32
    return %c0_i32, %c0_i32_0 : i32, i32
  }
  func.func @transform_7(%arg0: i32) -> (i32, i32) {
    %c0_i32 = arith.constant 0 : i32
    %c0_i32_0 = arith.constant 0 : i32
    %c0_i32_1 = arith.constant 0 : i32
    return %c0_i32, %c0_i32_0 : i32, i32
  }
  func.func @transform_8(%arg0: i32) -> (i32, i32) {
    %c0_i32 = arith.constant 0 : i32
    %c0_i32_0 = arith.constant 0 : i32
    %c0_i32_1 = arith.constant 0 : i32
    return %c0_i32, %c0_i32_0 : i32, i32
  }
  func.func @transform_9(%arg0: i32) -> (i32, i32) {
    %c0_i32 = arith.constant 0 : i32
    %c0_i32_0 = arith.constant 0 : i32
    %c0_i32_1 = arith.constant 0 : i32
    return %c0_i32, %c0_i32_0 : i32, i32
  }
  func.func @transform_10(%arg0: i32) -> (i32, i32) {
    %c0_i32 = arith.constant 0 : i32
    %c0_i32_0 = arith.constant 0 : i32
    %c0_i32_1 = arith.constant 0 : i32
    return %c0_i32, %c0_i32_0 : i32, i32
  }
  func.func @transform_11(%arg0: i32) -> (i32, i32) {
    %c0_i32 = arith.constant 0 : i32
    %c0_i32_0 = arith.constant 0 : i32
    %c0_i32_1 = arith.constant 0 : i32
    return %c0_i32, %c0_i32_0 : i32, i32
  }
  func.func @transform_12(%arg0: i32) -> (i32, i32, i32) {
    %c0_i32 = arith.constant 0 : i32
    %c0_i32_0 = arith.constant 0 : i32
    %c0_i32_1 = arith.constant 0 : i32
    return %arg0, %c0_i32, %c0_i32_0 : i32, i32, i32
  }
}

</mosaic_0001>

<bundles_post_ra>
// kernel: tpu_custom_call.1
= control target key start
LH: loop header
LB: loop body
LE: loop exit
PB: predicated region body
PF: predicated region fallthrough
CT: control target
= control target key end

     0   :  { %s9352_s0 = inlined_call_operand.hbm [shape: f32[1,2,16], index: 0, kind: input, shape index: {}]   ;;  %s9353_s1 = inlined_call_operand.hbm [shape: f32[9,512], index: 1, kind: input, shape index: {}]   ;;  %s9354_s2 = inlined_call_operand.hbm [shape: f32[16,64], index: 2, kind: input, shape index: {}]   ;;  %s9355_s3 = inlined_call_operand.hbm [shape: f32[1,64], index: 3, kind: input, shape index: {}]   ;;  %s9356_s4 = inlined_call_operand.hbm [shape: f32[64,8192], index: 4, kind: input, shape index: {}]   ;;  %s9357_s5 = inlined_call_operand.hbm [shape: f32[1,8192], index: 5, kind: input, shape index: {}]   ;;  %s9358_s6 = inlined_call_operand.hbm [shape: f32[16,288], index: 6, kind: input, shape index: {}]   ;;  %s9359_s7 = inlined_call_operand.vmem [shape: f32[16,1], index: 7, kind: input, shape index: {}]   ;;  %s9360_s8 = inlined_call_operand.hbm [shape: f32[8,144], index: 8, kind: input, shape index: {}]   ;;  %s9361_s9 = inlined_call_operand.vmem [shape: f32[8,1], index: 9, kind: input, shape index: {}]   ;;  %s9362_s10 = inlined_call_operand.vmem [shape: f32[72,1], index: 10, kind: input, shape index: {}]   ;;  %s9363_s11 = inlined_call_operand.<no memory space> [shape: f32[1,1], index: 11, kind: input, shape index: {}]   ;;  %s9364_s12 = inlined_call_operand.hbm [shape: f32[1,2,256], index: 12, kind: output, shape index: {}]  }
   0x1   :  { %v17_v0 = vstv %s9363_s11 }
   0x2   :  { %18 = vst [vmem:[#allocation3] sm:$0x1] %v17_v0 }
   0x3   :  { %19 = vsyncpa [#allocation5], 0 }
   0x4   :  { %20 = vsyncpa [#allocation8], 0 }
   0x5   :  { %21 = vsyncpa [#allocation11], 0 }
   0x6   :  { %22 = vsyncpa [#allocation14], 0 }
   0x7   :  { %23 = vsyncpa [#allocation17], 0 }
   0x8   :  { %24 = vsyncpa [#allocation6], 0  ;;  %s6589_s23 = smov [#allocation7]  }
   0x9   :  { %s40_s24 = sshll.u32 %s6589_s23, 4  ;;  %s41_s24 = int_to_ptr.vmem [resolvable:$true] %s40_s24 }
   0xa   :  { %s6405_s25 = scalar_lea.vmem %s41_s24, 1024  ;;  %p6410_p1 = scmp.lt.s32.totalorder %s41_s24, %s41_s24 }
   0xb   :  { %p6406_p0 = scmp.ne.s32.totalorder %s41_s24, %s6405_s25  ;;  %p6411_p2 = scmp.lt.s32.totalorder %s6405_s25, %s6405_s25 }
   0xd   :  { %p6412_p3 = por %p6411_p2, %p6410_p1 }
   0xf   :  { %p6413_p4 = pnand %p6412_p3, %p6406_p0 }
  0x11   :  { %6416 = shalt.err (!%p6413_p4)
}
  0x12   :  { %s6590_s26 = smov 512   ;;  %s6591_s27 = smov 32  }
  0x13   :  { %46 = dma.hbm_to_vmem [thread:$0]  %s9353_s1, 1024, %s41_s24, [#allocation8], %s6590_s26, %s6590_s26, %s6591_s27  }
  0x14   :  { %s6592_s29 = smov [#allocation10]   ;;  %s6593_s13 = smov [#allocation13]  }
  0x15   :  { %s65_s30 = sshll.u32 %s6592_s29, 4  ;;  %s87_s14 = sshll.u32 %s6593_s13, 4  ;;  %s66_s30 = int_to_ptr.vmem [resolvable:$true] %s65_s30  ;;  %s88_s14 = int_to_ptr.vmem [resolvable:$true] %s87_s14 }
  0x16   :  { %s6425_s15 = scalar_lea.vmem %s66_s30, 16  ;;  %s6429_s16 = scalar_lea.vmem %s66_s30, 32 }
  0x17   :  { %p6426_p5 = scmp.ne.s32.totalorder %s66_s30, %s6425_s15  ;;  %p6430_p6 = scmp.lt.s32.totalorder %s66_s30, %s66_s30 }
  0x18   :  { %p6431_p7 = scmp.lt.s32.totalorder %s6429_s16, %s6425_s15 }
  0x1a   :  { %p6432_p8 = por %p6431_p7, %p6430_p6 }
  0x1c   :  { %p6433_p9 = pnand %p6432_p8, %p6426_p5 }
  0x1e   :  { %6436 = shalt.err (!%p6433_p9)
}
  0x1f   :  { %68 = dma.hbm_to_vmem [thread:$0]  %s9355_s3, 16, %s66_s30, [#allocation11]  }
  0x20   :  { %s6445_s19 = scalar_lea.vmem %s88_s14, 1024  ;;  %p6450_p11 = scmp.lt.s32.totalorder %s88_s14, %s88_s14 }
  0x21   :  { %p6446_p10 = scmp.ne.s32.totalorder %s88_s14, %s6445_s19  ;;  %p6451_p12 = scmp.lt.s32.totalorder %s6445_s19, %s6445_s19 }
  0x23   :  { %p6452_p13 = por %p6451_p12, %p6450_p11 }
  0x25   :  { %p6453_p0 = pnand %p6452_p13, %p6446_p10 }
  0x27   :  { %6456 = shalt.err (!%p6453_p0)
}
  0x28   :  { %90 = dma.hbm_to_vmem [thread:$0]  %s9357_s5, 1024, %s88_s14, [#allocation14]  }
  0x29   :  { %s6594_s21 = smov [#allocation4]   ;;  %s6595_s23 = smov [#allocation9]  }
  0x2a   :  { %s31_s22 = sshll.u32 %s6594_s21, 4  ;;  %s52_s24 = sshll.u32 %s6595_s23, 4  ;;  %s32_s22 = int_to_ptr.vmem [resolvable:$true] %s31_s22  ;;  %s53_s24 = int_to_ptr.vmem [resolvable:$true] %s52_s24 }
  0x2b   :  { %s6465_s25 = scalar_lea.vmem %s32_s22, 32  ;;  %p6470_p2 = scmp.lt.s32.totalorder %s32_s22, %s32_s22 }
  0x2c   :  { %p6466_p1 = scmp.ne.s32.totalorder %s32_s22, %s6465_s25  ;;  %p6471_p3 = scmp.lt.s32.totalorder %s6465_s25, %s6465_s25 }
  0x2e   :  { %p6472_p4 = por %p6471_p3, %p6470_p2 }
  0x30   :  { %p6473_p5 = pnand %p6472_p4, %p6466_p1 }
  0x32   :  { %6476 = shalt.err (!%p6473_p5)
}
  0x33   :  { %34 = dma.hbm_to_vmem [thread:$0]  %s9352_s0, 32, %s32_s22, [#allocation5]  }
  0x34   :  { %s6485_s11 = scalar_lea.vmem %s53_s24, 256  ;;  %p6490_p7 = scmp.lt.s32.totalorder %s53_s24, %s53_s24 }
  0x35   :  { %p6486_p6 = scmp.ne.s32.totalorder %s53_s24, %s6485_s11  ;;  %p6491_p8 = scmp.lt.s32.totalorder %s6485_s11, %s6485_s11 }
  0x37   :  { %p6492_p9 = por %p6491_p8, %p6490_p7 }
  0x39   :  { %p6493_p10 = pnand %p6492_p9, %p6486_p6 }
  0x3b   :  { %6496 = shalt.err (!%p6493_p10)
}
  0x3c   :  { %s6596_s5 = smov 128   ;;  %s6597_s28 = smov 8  }
  0x3d   :  { %58 = dma.hbm_to_vmem [thread:$0]  %s9354_s2, 256, %s53_s24, [#allocation8], %s6596_s5, %s6596_s5, %s6597_s28  }
  0x3e   :  { %s6598_s13 = smov [#allocation12]  }
  0x3f   :  { %s74_s14 = sshll.u32 %s6598_s13, 4  ;;  %s75_s14 = int_to_ptr.vmem [resolvable:$true] %s74_s14 }
  0x40   :  { %s6505_s15 = scalar_lea.vmem %s75_s14, 65536  ;;  %p6510_p12 = scmp.lt.s32.totalorder %s75_s14, %s75_s14 }
  0x41   :  { %p6506_p11 = scmp.ne.s32.totalorder %s75_s14, %s6505_s15  ;;  %p6511_p13 = scmp.lt.s32.totalorder %s6505_s15, %s6505_s15 }
  0x43   :  { %p6512_p0 = por %p6511_p13, %p6510_p12 }
  0x45   :  { %p6513_p1 = pnand %p6512_p0, %p6506_p11 }
  0x47   :  { %6516 = shalt.err (!%p6513_p1)
}
  0x48   :  { %s6599_s0 = smov 8192   ;;  %s6600_s18 = smov [#allocation15]  }
  0x49   :  { %80 = dma.hbm_to_vmem [thread:$0]  %s9356_s4, 65536, %s75_s14, [#allocation11], %s6599_s0, %s6599_s0, %s6590_s26  }
  0x4a   :  { %s96_s19 = sshll.u32 %s6600_s18, 4  ;;  %s97_s19 = int_to_ptr.vmem [resolvable:$true] %s96_s19 }
  0x4b   :  { %s6525_s2 = scalar_lea.vmem %s97_s19, 768  ;;  %p6530_p3 = scmp.lt.s32.totalorder %s97_s19, %s97_s19 }
  0x4c   :  { %p6526_p2 = scmp.ne.s32.totalorder %s97_s19, %s6525_s2  ;;  %p6531_p4 = scmp.lt.s32.totalorder %s6525_s2, %s6525_s2 }
  0x4e   :  { %p6532_p5 = por %p6531_p4, %p6530_p3 }
  0x50   :  { %p6533_p6 = pnand %p6532_p5, %p6526_p2 }
  0x52   :  { %6536 = shalt.err (!%p6533_p6)
}
  0x53   :  { %s6601_s1 = smov 384   ;;  %s6602_s20 = smov 24  }
  0x54   :  { %102 = dma.hbm_to_vmem [thread:$0]  %s9358_s6, 768, %s97_s19, [#allocation14], %s6601_s1, %s6601_s1, %s6602_s20  }
  0x55   :  { %s6603_s23 = smov [#allocation16]  }
  0x56   :  { %s111_s24 = sshll.u32 %s6603_s23, 4  ;;  %s112_s24 = int_to_ptr.vmem [resolvable:$true] %s111_s24 }
  0x57   :  { %s6545_s4 = scalar_lea.vmem %s112_s24, 256  ;;  %p6550_p8 = scmp.lt.s32.totalorder %s112_s24, %s112_s24 }
  0x58   :  { %p6546_p7 = scmp.ne.s32.totalorder %s112_s24, %s6545_s4  ;;  %p6551_p9 = scmp.lt.s32.totalorder %s6545_s4, %s6545_s4 }
  0x5a   :  { %p6552_p10 = por %p6551_p9, %p6550_p8 }
  0x5c   :  { %p6553_p11 = pnand %p6552_p10, %p6546_p7 }
  0x5e   :  { %6556 = shalt.err (!%p6553_p11)
}
  0x5f   :  { %114 = dma.hbm_to_vmem [thread:$0]  %s9360_s8, 256, %s112_s24, [#allocation17]  }
  0x60   :  { %6577 = dma.done.wait [#allocation5], 32  }
  0x61   :  { %6578 = vsyncadd [#allocation5], 4294967264 }
  0x62   :  { %6579 = dma.done.wait [#allocation8], 1280  }
  0x63   :  { %6580 = vsyncadd [#allocation8], 4294966016 }
  0x64   :  { %6581 = dma.done.wait [#allocation11], 65552  }
  0x65   :  { %6582 = vsyncadd [#allocation11], 4294901744 }
  0x66   :  { %6583 = dma.done.wait [#allocation14], 1792  }
  0x67   :  { %6584 = vsyncadd [#allocation14], 4294965504 }
  0x68   :  { %6585 = dma.done.wait [#allocation17], 256  }
  0x69   :  { %6586 = vsyncadd [#allocation17], 4294967040  ;;  %v9365_v1 = vmov 0.0   ;;  %vm6605_vm0 = vmmov 0   ;;  %v147_v2 = vld [vmem:[#allocation9 + $0x8] sm:$0xff]  ;;  %v146_v3 = vld [vmem:[#allocation9] sm:$0xff] }
  0x6a   :  { %6322 = vmatprep.subr.mxu0 %v9365_v1  ;;  %6326 = vmatprep.mubr.msk.f32.mxu0 %vm6605_vm0, %v9365_v1  ;;  %v145_v4 = vld [vmem:[#allocation4] sm:$0x3]  ;;  %vm155_vm1 = vcmask 130048   ;;  %v681_v6 = vld [vmem:[#allocation12 + $0xe18] sm:$0xff]  ;;  %v678_v7 = vld [vmem:[#allocation12 + $0xe00] sm:$0xff]  ;;  %vm1078_vm2 = vcmask 523264  }
  0x6b   :  { %1146 = vmatprep.mubr.f32.mxu1 %v9365_v1  ;;  %6323 = vmatpush3.msra.mxu0 %v147_v2  ;;  %v679_v5 = vld [vmem:[#allocation12 + $0xe08] sm:$0xff]  ;;  %v680_v8 = vld [vmem:[#allocation12 + $0xe10] sm:$0xff]  ;;  %v617_v10 = vld [vmem:[#allocation12 + $0xc18] sm:$0xff]  ;;  %s6607_s6 = smov 111   ;;  %s6608_s8 = smov 1   ;;  %vm5169_vm11 = vcmask 261120  }
  0x6c   :  { %6324 = vmatprep.subr.mxu0 %v9365_v1  ;;  %1098 = vmatprep.subr.mxu1 %v679_v5  ;;  %v615_v9 = vld [vmem:[#allocation12 + $0xc08] sm:$0xff]  ;;  %v614_v11 = vld [vmem:[#allocation12 + $0xc00] sm:$0xff]  ;;  %v616_v12 = vld [vmem:[#allocation12 + $0xc10] sm:$0xff]  ;;  %s6609_s3 = smov 15   ;;  %s6610_s27 = smov 16  }
  0x6d   :  { %6325 = vmatpush3.msra.mxu0 %v146_v3  ;;  %1099 = vmatpush1.msra.mxu1 %v678_v7  ;;  %v551_v13 = vld [vmem:[#allocation12 + $0xa08] sm:$0xff]  ;;  %v553_v14 = vld [vmem:[#allocation12 + $0xa18] sm:$0xff]  ;;  %v550_v15 = vld [vmem:[#allocation12 + $0xa00] sm:$0xff]  ;;  %s6611_s11 = smov 17   ;;  %s6612_s5 = smov 112  }
  0x6e   :  { %6327 = vmatmul.mubr.msk.f32.vlgmr.msra.gmra.mxu0 %vm155_vm1, %v145_v4  ;;  %1169 = vmatprep.subr.mxu0 %v681_v6  ;;  %v552_v16 = vld [vmem:[#allocation12 + $0xa10] sm:$0xff]  ;;  %v487_v17 = vld [vmem:[#allocation12 + $0x808] sm:$0xff]  ;;  %v489_v18 = vld [vmem:[#allocation12 + $0x818] sm:$0xff]  ;;  %s6613_s28 = smov 113   ;;  %s6614_s29 = smov 127  }
  0x6f   :  { %1170 = vmatpush1.msra.mxu0 %v680_v8  ;;  %1100 = vmatprep.subr.mxu1 %v615_v9  ;;  %v486_v19 = vld [vmem:[#allocation12 + $0x800] sm:$0xff]  ;;  %v488_v20 = vld [vmem:[#allocation12 + $0x810] sm:$0xff]  ;;  %v423_v21 = vld [vmem:[#allocation12 + $0x608] sm:$0xff] }
  0x70   :  { %1171 = vmatprep.subr.mxu0 %v617_v10  ;;  %1101 = vmatpush1.msra.mxu1 %v614_v11  ;;  %v425_v22 = vld [vmem:[#allocation12 + $0x618] sm:$0xff]  ;;  %v422_v23 = vld [vmem:[#allocation12 + $0x600] sm:$0xff]  ;;  %v424_v24 = vld [vmem:[#allocation12 + $0x610] sm:$0xff] }
  0x71   :  { %1172 = vmatpush1.msra.mxu0 %v616_v12  ;;  %1102 = vmatprep.subr.mxu1 %v551_v13  ;;  %v359_v25 = vld [vmem:[#allocation12 + $0x408] sm:$0xff]  ;;  %v361_v26 = vld [vmem:[#allocation12 + $0x418] sm:$0xff]  ;;  %v358_v27 = vld [vmem:[#allocation12 + $0x400] sm:$0xff] }
  0x72   :  { %1173 = vmatprep.subr.mxu0 %v553_v14  ;;  %1103 = vmatpush1.msra.mxu1 %v550_v15  ;;  %v360_v28 = vld [vmem:[#allocation12 + $0x410] sm:$0xff]  ;;  %v295_v29 = vld [vmem:[#allocation12 + $0x208] sm:$0xff]  ;;  %v297_v30 = vld [vmem:[#allocation12 + $0x218] sm:$0xff] }
  0x73   :  { %1174 = vmatpush1.msra.mxu0 %v552_v16  ;;  %1104 = vmatprep.subr.mxu1 %v487_v17  ;;  %v294_v31 = vld [vmem:[#allocation12 + $0x200] sm:$0xff]  ;;  %v296_v32 = vld [vmem:[#allocation12 + $0x210] sm:$0xff]  ;;  %v231_v33 = vld [vmem:[#allocation12 + $0x8] sm:$0xff] }
  0x74   :  { %1175 = vmatprep.subr.mxu0 %v489_v18  ;;  %1105 = vmatpush1.msra.mxu1 %v486_v19  ;;  %v233_v34 = vld [vmem:[#allocation12 + $0x18] sm:$0xff]  ;;  %v230_v35 = vld [vmem:[#allocation12] sm:$0xff]  ;;  %v232_v36 = vld [vmem:[#allocation12 + $0x10] sm:$0xff] }
  0x75   :  { %1176 = vmatpush1.msra.mxu0 %v488_v20  ;;  %1106 = vmatprep.subr.mxu1 %v423_v21  ;;  %v683_v37 = vld [vmem:[#allocation12 + $0xe28] sm:$0xff]  ;;  %v685_v38 = vld [vmem:[#allocation12 + $0xe38] sm:$0xff]  ;;  %v682_v44 = vld [vmem:[#allocation12 + $0xe20] sm:$0xff] }
  0x76   :  { %1177 = vmatprep.subr.mxu0 %v425_v22  ;;  %1107 = vmatpush1.msra.mxu1 %v422_v23  ;;  %v6275_v39 = vld [vmem:[#allocation10] ss:$0 sm:$0xff]  ;;  %v684_v45 = vld [vmem:[#allocation12 + $0xe30] sm:$0xff]  ;;  %v619_v46 = vld [vmem:[#allocation12 + $0xc28] sm:$0xff] }
  0x77   :  { %1178 = vmatpush1.msra.mxu0 %v424_v24  ;;  %1108 = vmatprep.subr.mxu1 %v359_v25  ;;  %v621_v47 = vld [vmem:[#allocation12 + $0xc38] sm:$0xff]  ;;  %v618_v48 = vld [vmem:[#allocation12 + $0xc20] sm:$0xff]  ;;  %v620_v49 = vld [vmem:[#allocation12 + $0xc30] sm:$0xff] }
  0x78   :  { %1179 = vmatprep.subr.mxu0 %v361_v26  ;;  %1109 = vmatpush1.msra.mxu1 %v358_v27  ;;  %v555_v50 = vld [vmem:[#allocation12 + $0xa28] sm:$0xff]  ;;  %v557_v51 = vld [vmem:[#allocation12 + $0xa38] sm:$0xff]  ;;  %v554_v52 = vld [vmem:[#allocation12 + $0xa20] sm:$0xff] }
  0x79   :  { %1180 = vmatpush1.msra.mxu0 %v360_v28  ;;  %1217 = vmatprep.mubr.f32.mxu0 %v9365_v1  ;;  %v556_v53 = vld [vmem:[#allocation12 + $0xa30] sm:$0xff]  ;;  %v491_v54 = vld [vmem:[#allocation12 + $0x828] sm:$0xff]  ;;  %v493_v55 = vld [vmem:[#allocation12 + $0x838] sm:$0xff] }
  0x7a   :  { %1110 = vmatprep.subr.mxu1 %v295_v29  ;;  %1181 = vmatprep.subr.mxu0 %v297_v30  ;;  %v490_v56 = vld [vmem:[#allocation12 + $0x820] sm:$0xff]  ;;  %v492_v57 = vld [vmem:[#allocation12 + $0x830] sm:$0xff]  ;;  %v427_v58 = vld [vmem:[#allocation12 + $0x628] sm:$0xff] }
  0x7b   :  { %1111 = vmatpush1.msra.mxu1 %v294_v31  ;;  %1182 = vmatpush1.msra.mxu0 %v296_v32  ;;  %v429_v59 = vld [vmem:[#allocation12 + $0x638] sm:$0xff]  ;;  %v426_v60 = vld [vmem:[#allocation12 + $0x620] sm:$0xff]  ;;  %v428_v61 = vld [vmem:[#allocation12 + $0x630] sm:$0xff] }
  0x7c   :  { %1112 = vmatprep.subr.mxu1 %v231_v33  ;;  %1183 = vmatprep.subr.mxu0 %v233_v34  ;;  %v363_v62 = vld [vmem:[#allocation12 + $0x428] sm:$0xff]  ;;  %v365_v63 = vld [vmem:[#allocation12 + $0x438] sm:$0xff]  ;;  %v362_v0 = vld [vmem:[#allocation12 + $0x420] sm:$0xff] }
  0x7d   :  { %1113 = vmatpush1.msra.mxu1 %v230_v35  ;;  %1184 = vmatpush1.msra.mxu0 %v232_v36  ;;  %v364_v2 = vld [vmem:[#allocation12 + $0x430] sm:$0xff]  ;;  %v299_v3 = vld [vmem:[#allocation12 + $0x228] sm:$0xff]  ;;  %v301_v4 = vld [vmem:[#allocation12 + $0x238] sm:$0xff] }
  0x7e   :  { %1240 = vmatprep.subr.mxu1 %v683_v37  ;;  %1311 = vmatprep.subr.mxu0 %v685_v38  ;;  %v298_v5 = vld [vmem:[#allocation12 + $0x220] sm:$0xff]  ;;  %v300_v6 = vld [vmem:[#allocation12 + $0x230] sm:$0xff]  ;;  %v235_v7 = vld [vmem:[#allocation12 + $0x28] sm:$0xff] }
  0x7f   :  { %v237_v8 = vld [vmem:[#allocation12 + $0x38] sm:$0xff]  ;;  %v234_v9 = vld [vmem:[#allocation12 + $0x20] sm:$0xff]  ;;  %v236_v10 = vld [vmem:[#allocation12 + $0x30] sm:$0xff] }
  0x80   :  { %v687_v11 = vld [vmem:[#allocation12 + $0xe48] sm:$0xff]  ;;  %v689_v12 = vld [vmem:[#allocation12 + $0xe58] sm:$0xff]  ;;  %v686_v13 = vld [vmem:[#allocation12 + $0xe40] sm:$0xff] }
  0x81   :  { %v688_v14 = vld [vmem:[#allocation12 + $0xe50] sm:$0xff]  ;;  %v623_v15 = vld [vmem:[#allocation12 + $0xc48] sm:$0xff]  ;;  %v625_v16 = vld [vmem:[#allocation12 + $0xc58] sm:$0xff] }
  0x82   :  { %v622_v17 = vld [vmem:[#allocation12 + $0xc40] sm:$0xff]  ;;  %v624_v18 = vld [vmem:[#allocation12 + $0xc50] sm:$0xff]  ;;  %v559_v19 = vld [vmem:[#allocation12 + $0xa48] sm:$0xff] }
  0x83   :  { %v561_v20 = vld [vmem:[#allocation12 + $0xa58] sm:$0xff]  ;;  %v558_v21 = vld [vmem:[#allocation12 + $0xa40] sm:$0xff]  ;;  %v560_v22 = vld [vmem:[#allocation12 + $0xa50] sm:$0xff] }
  0x84   :  { %v495_v23 = vld [vmem:[#allocation12 + $0x848] sm:$0xff]  ;;  %v497_v24 = vld [vmem:[#allocation12 + $0x858] sm:$0xff]  ;;  %v494_v25 = vld [vmem:[#allocation12 + $0x840] sm:$0xff] }
  0x85   :  { %v496_v26 = vld [vmem:[#allocation12 + $0x850] sm:$0xff]  ;;  %v431_v27 = vld [vmem:[#allocation12 + $0x648] sm:$0xff]  ;;  %v433_v28 = vld [vmem:[#allocation12 + $0x658] sm:$0xff] }
  0x86   :  { %v430_v29 = vld [vmem:[#allocation12 + $0x640] sm:$0xff]  ;;  %v432_v30 = vld [vmem:[#allocation12 + $0x650] sm:$0xff]  ;;  %v367_v31 = vld [vmem:[#allocation12 + $0x448] sm:$0xff] }
  0x87   :  { %v369_v32 = vld [vmem:[#allocation12 + $0x458] sm:$0xff]  ;;  %v366_v33 = vld [vmem:[#allocation12 + $0x440] sm:$0xff]  ;;  %v368_v34 = vld [vmem:[#allocation12 + $0x450] sm:$0xff] }
  0x88   :  { %v303_v35 = vld [vmem:[#allocation12 + $0x248] sm:$0xff]  ;;  %v305_v36 = vld [vmem:[#allocation12 + $0x258] sm:$0xff]  ;;  %v302_v37 = vld [vmem:[#allocation12 + $0x240] sm:$0xff] }
  0x89   :  { %v304_v38 = vld [vmem:[#allocation12 + $0x250] sm:$0xff] }
 0x12e   :  { %v225_v40 = vpop.f32.mrf.mxu0 }
 0x12f   :  { %v226_v41 = vadd.f32 %v6275_v39, %v225_v40  ;;  %v239_v39 = vld [vmem:[#allocation12 + $0x48] sm:$0xff]  ;;  %v241_v40 = vld [vmem:[#allocation12 + $0x58] sm:$0xff] }
 0x130   :  { %v6328_v42 = vpop.f32.mrf.mxu0 }
 0x131   :  { %v6718_v43 = vmax.f32 %v226_v41, 0.0  ;;  %v238_v41 = vld [vmem:[#allocation12 + $0x40] sm:$0xff]  ;;  %v240_v42 = vld [vmem:[#allocation12 + $0x50] sm:$0xff] }
 0x133   :  { %6277 = vmatmul.mubr.msk.f32.vlgmr.msra.gmra.mxu1 %vm1078_vm2, %v6718_v43  ;;  %6278 = vmatmul.mubr.msk.f32.vlgmr.msra.gmra.mxu0 %vm1078_vm2, %v6718_v43 }
 0x134   :  { %1241 = vmatpush1.msra.mxu1 %v682_v44  ;;  %1312 = vmatpush1.msra.mxu0 %v684_v45  ;;  %v691_v44 = vld [vmem:[#allocation12 + $0xe68] sm:$0xff]  ;;  %v693_v45 = vld [vmem:[#allocation12 + $0xe78] sm:$0xff] }
 0x135   :  { %1242 = vmatprep.subr.mxu1 %v619_v46  ;;  %1313 = vmatprep.subr.mxu0 %v621_v47  ;;  %v690_v46 = vld [vmem:[#allocation12 + $0xe60] sm:$0xff]  ;;  %v692_v47 = vld [vmem:[#allocation12 + $0xe70] sm:$0xff] }
 0x136   :  { %1243 = vmatpush1.msra.mxu1 %v618_v48  ;;  %1314 = vmatpush1.msra.mxu0 %v620_v49  ;;  %v627_v48 = vld [vmem:[#allocation12 + $0xc68] sm:$0xff]  ;;  %v629_v49 = vld [vmem:[#allocation12 + $0xc78] sm:$0xff] }
 0x137   :  { %1244 = vmatprep.subr.mxu1 %v555_v50  ;;  %1315 = vmatprep.subr.mxu0 %v557_v51  ;;  %v626_v50 = vld [vmem:[#allocation12 + $0xc60] sm:$0xff]  ;;  %v628_v51 = vld [vmem:[#allocation12 + $0xc70] sm:$0xff] }
 0x138   :  { %1245 = vmatpush1.msra.mxu1 %v554_v52  ;;  %1316 = vmatpush1.msra.mxu0 %v556_v53  ;;  %v563_v52 = vld [vmem:[#allocation12 + $0xa68] sm:$0xff]  ;;  %v565_v53 = vld [vmem:[#allocation12 + $0xa78] sm:$0xff] }
 0x139   :  { %1246 = vmatprep.subr.mxu1 %v491_v54  ;;  %1317 = vmatprep.subr.mxu0 %v493_v55  ;;  %v562_v54 = vld [vmem:[#allocation12 + $0xa60] sm:$0xff]  ;;  %v564_v55 = vld [vmem:[#allocation12 + $0xa70] sm:$0xff] }
 0x13a   :  { %1247 = vmatpush1.msra.mxu1 %v490_v56  ;;  %1318 = vmatpush1.msra.mxu0 %v492_v57  ;;  %v499_v56 = vld [vmem:[#allocation12 + $0x868] sm:$0xff]  ;;  %v501_v57 = vld [vmem:[#allocation12 + $0x878] sm:$0xff] }
 0x13b   :  { %1248 = vmatprep.subr.mxu1 %v427_v58  ;;  %1319 = vmatprep.subr.mxu0 %v429_v59  ;;  %v498_v58 = vld [vmem:[#allocation12 + $0x860] sm:$0xff]  ;;  %v500_v59 = vld [vmem:[#allocation12 + $0x870] sm:$0xff] }
 0x13c   :  { %1249 = vmatpush1.msra.mxu1 %v426_v60  ;;  %1320 = vmatpush1.msra.mxu0 %v428_v61  ;;  %v435_v60 = vld [vmem:[#allocation12 + $0x668] sm:$0xff]  ;;  %v437_v61 = vld [vmem:[#allocation12 + $0x678] sm:$0xff] }
 0x13d   :  { %1250 = vmatprep.subr.mxu1 %v363_v62  ;;  %1321 = vmatprep.subr.mxu0 %v365_v63  ;;  %v434_v62 = vld [vmem:[#allocation12 + $0x660] sm:$0xff]  ;;  %v436_v63 = vld [vmem:[#allocation12 + $0x670] sm:$0xff] }
 0x13e   :  { %1251 = vmatpush1.msra.mxu1 %v362_v0  ;;  %1322 = vmatpush1.msra.mxu0 %v364_v2  ;;  %v371_v0 = vld [vmem:[#allocation12 + $0x468] sm:$0xff]  ;;  %v373_v2 = vld [vmem:[#allocation12 + $0x478] sm:$0xff] }
 0x13f   :  { %1252 = vmatprep.subr.mxu1 %v299_v3  ;;  %1323 = vmatprep.subr.mxu0 %v301_v4  ;;  %v370_v3 = vld [vmem:[#allocation12 + $0x460] sm:$0xff]  ;;  %v372_v4 = vld [vmem:[#allocation12 + $0x470] sm:$0xff] }
 0x140   :  { %1253 = vmatpush1.msra.mxu1 %v298_v5  ;;  %1324 = vmatpush1.msra.mxu0 %v300_v6  ;;  %v307_v5 = vld [vmem:[#allocation12 + $0x268] sm:$0xff]  ;;  %v309_v6 = vld [vmem:[#allocation12 + $0x278] sm:$0xff] }
 0x141   :  { %1254 = vmatprep.subr.mxu1 %v235_v7  ;;  %1325 = vmatprep.subr.mxu0 %v237_v8  ;;  %v306_v7 = vld [vmem:[#allocation12 + $0x260] sm:$0xff]  ;;  %v308_v8 = vld [vmem:[#allocation12 + $0x270] sm:$0xff] }
 0x142   :  { %1255 = vmatpush1.msra.mxu1 %v234_v9  ;;  %1288 = vmatprep.mubr.f32.mxu1 %v9365_v1  ;;  %v243_v9 = vld [vmem:[#allocation12 + $0x68] sm:$0xff] }
 0x143   :  { %1326 = vmatpush1.msra.mxu0 %v236_v10  ;;  %1359 = vmatprep.mubr.f32.mxu0 %v9365_v1  ;;  %v245_v10 = vld [vmem:[#allocation12 + $0x78] sm:$0xff] }
 0x144   :  { %6279 = vmatmul.mubr.msk.f32.vlgmr.msra.gmra.mxu1 %vm1078_vm2, %v6718_v43  ;;  %6280 = vmatmul.mubr.msk.f32.vlgmr.msra.gmra.mxu0 %vm1078_vm2, %v6718_v43 }
 0x145   :  { %1382 = vmatprep.subr.mxu1 %v687_v11  ;;  %1453 = vmatprep.subr.mxu0 %v689_v12  ;;  %v242_v11 = vld [vmem:[#allocation12 + $0x60] sm:$0xff]  ;;  %v244_v12 = vld [vmem:[#allocation12 + $0x70] sm:$0xff] }
 0x146   :  { %1383 = vmatpush1.msra.mxu1 %v686_v13  ;;  %1454 = vmatpush1.msra.mxu0 %v688_v14  ;;  %v695_v13 = vld [vmem:[#allocation12 + $0xe88] sm:$0xff]  ;;  %v697_v14 = vld [vmem:[#allocation12 + $0xe98] sm:$0xff] }
 0x147   :  { %1384 = vmatprep.subr.mxu1 %v623_v15  ;;  %1455 = vmatprep.subr.mxu0 %v625_v16  ;;  %v694_v15 = vld [vmem:[#allocation12 + $0xe80] sm:$0xff]  ;;  %v696_v16 = vld [vmem:[#allocation12 + $0xe90] sm:$0xff] }
 0x148   :  { %1385 = vmatpush1.msra.mxu1 %v622_v17  ;;  %1456 = vmatpush1.msra.mxu0 %v624_v18  ;;  %v631_v17 = vld [vmem:[#allocation12 + $0xc88] sm:$0xff]  ;;  %v633_v18 = vld [vmem:[#allocation12 + $0xc98] sm:$0xff] }
 0x149   :  { %1386 = vmatprep.subr.mxu1 %v559_v19  ;;  %1457 = vmatprep.subr.mxu0 %v561_v20  ;;  %v630_v19 = vld [vmem:[#allocation12 + $0xc80] sm:$0xff]  ;;  %v632_v20 = vld [vmem:[#allocation12 + $0xc90] sm:$0xff] }
 0x14a   :  { %1387 = vmatpush1.msra.mxu1 %v558_v21  ;;  %1458 = vmatpush1.msra.mxu0 %v560_v22  ;;  %v567_v21 = vld [vmem:[#allocation12 + $0xa88] sm:$0xff]  ;;  %v569_v22 = vld [vmem:[#allocation12 + $0xa98] sm:$0xff] }
 0x14b   :  { %1388 = vmatprep.subr.mxu1 %v495_v23  ;;  %1459 = vmatprep.subr.mxu0 %v497_v24  ;;  %v566_v23 = vld [vmem:[#allocation12 + $0xa80] sm:$0xff]  ;;  %v568_v24 = vld [vmem:[#allocation12 + $0xa90] sm:$0xff] }
 0x14c   :  { %1389 = vmatpush1.msra.mxu1 %v494_v25  ;;  %1460 = vmatpush1.msra.mxu0 %v496_v26  ;;  %v503_v25 = vld [vmem:[#allocation12 + $0x888] sm:$0xff]  ;;  %v505_v26 = vld [vmem:[#allocation12 + $0x898] sm:$0xff] }
 0x14d   :  { %1390 = vmatprep.subr.mxu1 %v431_v27  ;;  %1461 = vmatprep.subr.mxu0 %v433_v28  ;;  %v502_v27 = vld [vmem:[#allocation12 + $0x880] sm:$0xff]  ;;  %v504_v28 = vld [vmem:[#allocation12 + $0x890] sm:$0xff] }
 0x14e   :  { %1391 = vmatpush1.msra.mxu1 %v430_v29  ;;  %1462 = vmatpush1.msra.mxu0 %v432_v30  ;;  %v439_v29 = vld [vmem:[#allocation12 + $0x688] sm:$0xff]  ;;  %v441_v30 = vld [vmem:[#allocation12 + $0x698] sm:$0xff] }
 0x14f   :  { %1392 = vmatprep.subr.mxu1 %v367_v31  ;;  %1463 = vmatprep.subr.mxu0 %v369_v32  ;;  %v438_v31 = vld [vmem:[#allocation12 + $0x680] sm:$0xff]  ;;  %v440_v32 = vld [vmem:[#allocation12 + $0x690] sm:$0xff] }
 0x150   :  { %1393 = vmatpush1.msra.mxu1 %v366_v33  ;;  %1464 = vmatpush1.msra.mxu0 %v368_v34  ;;  %v375_v33 = vld [vmem:[#allocation12 + $0x488] sm:$0xff]  ;;  %v377_v34 = vld [vmem:[#allocation12 + $0x498] sm:$0xff] }
 0x151   :  { %1394 = vmatprep.subr.mxu1 %v303_v35  ;;  %1465 = vmatprep.subr.mxu0 %v305_v36  ;;  %v374_v35 = vld [vmem:[#allocation12 + $0x480] sm:$0xff]  ;;  %v376_v36 = vld [vmem:[#allocation12 + $0x490] sm:$0xff] }
 0x152   :  { %1395 = vmatpush1.msra.mxu1 %v302_v37  ;;  %1466 = vmatpush1.msra.mxu0 %v304_v38  ;;  %v311_v37 = vld [vmem:[#allocation12 + $0x288] sm:$0xff]  ;;  %v313_v38 = vld [vmem:[#allocation12 + $0x298] sm:$0xff] }
 0x153   :  { %1396 = vmatprep.subr.mxu1 %v239_v39  ;;  %1467 = vmatprep.subr.mxu0 %v241_v40  ;;  %v310_v39 = vld [vmem:[#allocation12 + $0x280] sm:$0xff]  ;;  %v312_v40 = vld [vmem:[#allocation12 + $0x290] sm:$0xff] }
 0x154   :  { %1397 = vmatpush1.msra.mxu1 %v238_v41  ;;  %1430 = vmatprep.mubr.f32.mxu1 %v9365_v1  ;;  %v247_v41 = vld [vmem:[#allocation12 + $0x88] sm:$0xff] }
 0x155   :  { %1468 = vmatpush1.msra.mxu0 %v240_v42  ;;  %1501 = vmatprep.mubr.f32.mxu0 %v9365_v1  ;;  %v249_v42 = vld [vmem:[#allocation12 + $0x98] sm:$0xff] }
 0x156   :  { %6281 = vmatmul.mubr.msk.f32.vlgmr.msra.gmra.mxu1 %vm1078_vm2, %v6718_v43  ;;  %6282 = vmatmul.mubr.msk.f32.vlgmr.msra.gmra.mxu0 %vm1078_vm2, %v6718_v43 }
 0x157   :  { %1524 = vmatprep.subr.mxu1 %v691_v44  ;;  %1595 = vmatprep.subr.mxu0 %v693_v45  ;;  %v246_v44 = vld [vmem:[#allocation12 + $0x80] sm:$0xff]  ;;  %v248_v45 = vld [vmem:[#allocation12 + $0x90] sm:$0xff] }
 0x158   :  { %1525 = vmatpush1.msra.mxu1 %v690_v46  ;;  %1596 = vmatpush1.msra.mxu0 %v692_v47  ;;  %v699_v46 = vld [vmem:[#allocation12 + $0xea8] sm:$0xff]  ;;  %v701_v47 = vld [vmem:[#allocation12 + $0xeb8] sm:$0xff] }
 0x159   :  { %1526 = vmatprep.subr.mxu1 %v627_v48  ;;  %1597 = vmatprep.subr.mxu0 %v629_v49  ;;  %v698_v48 = vld [vmem:[#allocation12 + $0xea0] sm:$0xff]  ;;  %v700_v49 = vld [vmem:[#allocation12 + $0xeb0] sm:$0xff] }
 0x15a   :  { %1527 = vmatpush1.msra.mxu1 %v626_v50  ;;  %1598 = vmatpush1.msra.mxu0 %v628_v51  ;;  %v635_v50 = vld [vmem:[#allocation12 + $0xca8] sm:$0xff]  ;;  %v637_v51 = vld [vmem:[#allocation12 + $0xcb8] sm:$0xff] }
 0x15b   :  { %1528 = vmatprep.subr.mxu1 %v563_v52  ;;  %1599 = vmatprep.subr.mxu0 %v565_v53  ;;  %v634_v52 = vld [vmem:[#allocation12 + $0xca0] sm:$0xff]  ;;  %v636_v53 = vld [vmem:[#allocation12 + $0xcb0] sm:$0xff] }
 0x15c   :  { %1529 = vmatpush1.msra.mxu1 %v562_v54  ;;  %1600 = vmatpush1.msra.mxu0 %v564_v55  ;;  %v571_v54 = vld [vmem:[#allocation12 + $0xaa8] sm:$0xff]  ;;  %v573_v55 = vld [vmem:[#allocation12 + $0xab8] sm:$0xff] }
 0x15d   :  { %1530 = vmatprep.subr.mxu1 %v499_v56  ;;  %1601 = vmatprep.subr.mxu0 %v501_v57  ;;  %v570_v56 = vld [vmem:[#allocation12 + $0xaa0] sm:$0xff]  ;;  %v572_v57 = vld [vmem:[#allocation12 + $0xab0] sm:$0xff] }
 0x15e   :  { %1531 = vmatpush1.msra.mxu1 %v498_v58  ;;  %1602 = vmatpush1.msra.mxu0 %v500_v59  ;;  %v507_v58 = vld [vmem:[#allocation12 + $0x8a8] sm:$0xff]  ;;  %v509_v59 = vld [vmem:[#allocation12 + $0x8b8] sm:$0xff] }
 0x15f   :  { %1532 = vmatprep.subr.mxu1 %v435_v60  ;;  %1603 = vmatprep.subr.mxu0 %v437_v61  ;;  %v506_v60 = vld [vmem:[#allocation12 + $0x8a0] sm:$0xff]  ;;  %v508_v61 = vld [vmem:[#allocation12 + $0x8b0] sm:$0xff] }
 0x160   :  { %1533 = vmatpush1.msra.mxu1 %v434_v62  ;;  %1604 = vmatpush1.msra.mxu0 %v436_v63  ;;  %v443_v62 = vld [vmem:[#allocation12 + $0x6a8] sm:$0xff]  ;;  %v445_v63 = vld [vmem:[#allocation12 + $0x6b8] sm:$0xff] }
 0x161   :  { %1534 = vmatprep.subr.mxu1 %v371_v0  ;;  %1605 = vmatprep.subr.mxu0 %v373_v2  ;;  %v442_v0 = vld [vmem:[#allocation12 + $0x6a0] sm:$0xff]  ;;  %v444_v2 = vld [vmem:[#allocation12 + $0x6b0] sm:$0xff] }
 0x162   :  { %1535 = vmatpush1.msra.mxu1 %v370_v3  ;;  %1606 = vmatpush1.msra.mxu0 %v372_v4  ;;  %v379_v3 = vld [vmem:[#allocation12 + $0x4a8] sm:$0xff]  ;;  %v381_v4 = vld [vmem:[#allocation12 + $0x4b8] sm:$0xff] }
 0x163   :  { %1536 = vmatprep.subr.mxu1 %v307_v5  ;;  %1607 = vmatprep.subr.mxu0 %v309_v6  ;;  %v378_v5 = vld [vmem:[#allocation12 + $0x4a0] sm:$0xff]  ;;  %v380_v6 = vld [vmem:[#allocation12 + $0x4b0] sm:$0xff] }
 0x164   :  { %1537 = vmatpush1.msra.mxu1 %v306_v7  ;;  %1608 = vmatpush1.msra.mxu0 %v308_v8  ;;  %v315_v7 = vld [vmem:[#allocation12 + $0x2a8] sm:$0xff]  ;;  %v317_v8 = vld [vmem:[#allocation12 + $0x2b8] sm:$0xff] }
 0x165   :  { %1538 = vmatprep.subr.mxu1 %v243_v9  ;;  %1609 = vmatprep.subr.mxu0 %v245_v10  ;;  %v314_v9 = vld [vmem:[#allocation12 + $0x2a0] sm:$0xff]  ;;  %v316_v10 = vld [vmem:[#allocation12 + $0x2b0] sm:$0xff] }
 0x166   :  { %1539 = vmatpush1.msra.mxu1 %v242_v11  ;;  %1572 = vmatprep.mubr.f32.mxu1 %v9365_v1  ;;  %v251_v11 = vld [vmem:[#allocation12 + $0xa8] sm:$0xff] }
 0x167   :  { %1610 = vmatpush1.msra.mxu0 %v244_v12  ;;  %1643 = vmatprep.mubr.f32.mxu0 %v9365_v1  ;;  %v253_v12 = vld [vmem:[#allocation12 + $0xb8] sm:$0xff] }
 0x168   :  { %6283 = vmatmul.mubr.msk.f32.vlgmr.msra.gmra.mxu1 %vm1078_vm2, %v6718_v43  ;;  %6284 = vmatmul.mubr.msk.f32.vlgmr.msra.gmra.mxu0 %vm1078_vm2, %v6718_v43 }
 0x169   :  { %1666 = vmatprep.subr.mxu1 %v695_v13  ;;  %1737 = vmatprep.subr.mxu0 %v697_v14  ;;  %v250_v13 = vld [vmem:[#allocation12 + $0xa0] sm:$0xff]  ;;  %v252_v14 = vld [vmem:[#allocation12 + $0xb0] sm:$0xff] }
 0x16a   :  { %1667 = vmatpush1.msra.mxu1 %v694_v15  ;;  %1738 = vmatpush1.msra.mxu0 %v696_v16  ;;  %v703_v15 = vld [vmem:[#allocation12 + $0xec8] sm:$0xff]  ;;  %v705_v16 = vld [vmem:[#allocation12 + $0xed8] sm:$0xff] }
 0x16b   :  { %1668 = vmatprep.subr.mxu1 %v631_v17  ;;  %1739 = vmatprep.subr.mxu0 %v633_v18  ;;  %v702_v17 = vld [vmem:[#allocation12 + $0xec0] sm:$0xff]  ;;  %v704_v18 = vld [vmem:[#allocation12 + $0xed0] sm:$0xff] }
 0x16c   :  { %1669 = vmatpush1.msra.mxu1 %v630_v19  ;;  %1740 = vmatpush1.msra.mxu0 %v632_v20  ;;  %v639_v19 = vld [vmem:[#allocation12 + $0xcc8] sm:$0xff]  ;;  %v641_v20 = vld [vmem:[#allocation12 + $0xcd8] sm:$0xff] }
 0x16d   :  { %1670 = vmatprep.subr.mxu1 %v567_v21  ;;  %1741 = vmatprep.subr.mxu0 %v569_v22  ;;  %v638_v21 = vld [vmem:[#allocation12 + $0xcc0] sm:$0xff]  ;;  %v640_v22 = vld [vmem:[#allocation12 + $0xcd0] sm:$0xff] }
 0x16e   :  { %1671 = vmatpush1.msra.mxu1 %v566_v23  ;;  %1742 = vmatpush1.msra.mxu0 %v568_v24  ;;  %v575_v23 = vld [vmem:[#allocation12 + $0xac8] sm:$0xff]  ;;  %v577_v24 = vld [vmem:[#allocation12 + $0xad8] sm:$0xff] }
 0x16f   :  { %1672 = vmatprep.subr.mxu1 %v503_v25  ;;  %1743 = vmatprep.subr.mxu0 %v505_v26  ;;  %v574_v25 = vld [vmem:[#allocation12 + $0xac0] sm:$0xff]  ;;  %v576_v26 = vld [vmem:[#allocation12 + $0xad0] sm:$0xff] }
 0x170   :  { %1673 = vmatpush1.msra.mxu1 %v502_v27  ;;  %1744 = vmatpush1.msra.mxu0 %v504_v28  ;;  %v511_v27 = vld [vmem:[#allocation12 + $0x8c8] sm:$0xff]  ;;  %v513_v28 = vld [vmem:[#allocation12 + $0x8d8] sm:$0xff] }
 0x171   :  { %1674 = vmatprep.subr.mxu1 %v439_v29  ;;  %1745 = vmatprep.subr.mxu0 %v441_v30  ;;  %v510_v29 = vld [vmem:[#allocation12 + $0x8c0] sm:$0xff]  ;;  %v512_v30 = vld [vmem:[#allocation12 + $0x8d0] sm:$0xff] }
 0x172   :  { %1675 = vmatpush1.msra.mxu1 %v438_v31  ;;  %1746 = vmatpush1.msra.mxu0 %v440_v32  ;;  %v447_v31 = vld [vmem:[#allocation12 + $0x6c8] sm:$0xff]  ;;  %v449_v32 = vld [vmem:[#allocation12 + $0x6d8] sm:$0xff] }
 0x173   :  { %1676 = vmatprep.subr.mxu1 %v375_v33  ;;  %1747 = vmatprep.subr.mxu0 %v377_v34  ;;  %v446_v33 = vld [vmem:[#allocation12 + $0x6c0] sm:$0xff]  ;;  %v448_v34 = vld [vmem:[#allocation12 + $0x6d0] sm:$0xff] }
 0x174   :  { %1677 = vmatpush1.msra.mxu1 %v374_v35  ;;  %1748 = vmatpush1.msra.mxu0 %v376_v36  ;;  %v383_v35 = vld [vmem:[#allocation12 + $0x4c8] sm:$0xff]  ;;  %v385_v36 = vld [vmem:[#allocation12 + $0x4d8] sm:$0xff] }
 0x175   :  { %1678 = vmatprep.subr.mxu1 %v311_v37  ;;  %1749 = vmatprep.subr.mxu0 %v313_v38  ;;  %v382_v37 = vld [vmem:[#allocation12 + $0x4c0] sm:$0xff]  ;;  %v384_v38 = vld [vmem:[#allocation12 + $0x4d0] sm:$0xff] }
 0x176   :  { %1679 = vmatpush1.msra.mxu1 %v310_v39  ;;  %1750 = vmatpush1.msra.mxu0 %v312_v40  ;;  %v319_v39 = vld [vmem:[#allocation12 + $0x2c8] sm:$0xff]  ;;  %v321_v40 = vld [vmem:[#allocation12 + $0x2d8] sm:$0xff] }
 0x177   :  { %1680 = vmatprep.subr.mxu1 %v247_v41  ;;  %1751 = vmatprep.subr.mxu0 %v249_v42  ;;  %v318_v41 = vld [vmem:[#allocation12 + $0x2c0] sm:$0xff]  ;;  %v320_v42 = vld [vmem:[#allocation12 + $0x2d0] sm:$0xff] }
 0x178   :  { %1681 = vmatpush1.msra.mxu1 %v246_v44  ;;  %1714 = vmatprep.mubr.f32.mxu1 %v9365_v1  ;;  %v255_v44 = vld [vmem:[#allocation12 + $0xc8] sm:$0xff] }
 0x179   :  { %1752 = vmatpush1.msra.mxu0 %v248_v45  ;;  %1785 = vmatprep.mubr.f32.mxu0 %v9365_v1  ;;  %v257_v45 = vld [vmem:[#allocation12 + $0xd8] sm:$0xff] }
 0x17a   :  { %6285 = vmatmul.mubr.msk.f32.vlgmr.msra.gmra.mxu1 %vm1078_vm2, %v6718_v43  ;;  %6286 = vmatmul.mubr.msk.f32.vlgmr.msra.gmra.mxu0 %vm1078_vm2, %v6718_v43 }
 0x17b   :  { %1808 = vmatprep.subr.mxu1 %v699_v46  ;;  %1879 = vmatprep.subr.mxu0 %v701_v47  ;;  %v254_v46 = vld [vmem:[#allocation12 + $0xc0] sm:$0xff]  ;;  %v256_v47 = vld [vmem:[#allocation12 + $0xd0] sm:$0xff] }
 0x17c   :  { %1809 = vmatpush1.msra.mxu1 %v698_v48  ;;  %1880 = vmatpush1.msra.mxu0 %v700_v49  ;;  %v707_v48 = vld [vmem:[#allocation12 + $0xee8] sm:$0xff]  ;;  %v709_v49 = vld [vmem:[#allocation12 + $0xef8] sm:$0xff] }
 0x17d   :  { %1810 = vmatprep.subr.mxu1 %v635_v50  ;;  %1881 = vmatprep.subr.mxu0 %v637_v51  ;;  %v706_v50 = vld [vmem:[#allocation12 + $0xee0] sm:$0xff]  ;;  %v708_v51 = vld [vmem:[#allocation12 + $0xef0] sm:$0xff] }
 0x17e   :  { %1811 = vmatpush1.msra.mxu1 %v634_v52  ;;  %1882 = vmatpush1.msra.mxu0 %v636_v53  ;;  %v643_v52 = vld [vmem:[#allocation12 + $0xce8] sm:$0xff]  ;;  %v645_v53 = vld [vmem:[#allocation12 + $0xcf8] sm:$0xff] }
 0x17f   :  { %1812 = vmatprep.subr.mxu1 %v571_v54  ;;  %1883 = vmatprep.subr.mxu0 %v573_v55  ;;  %v642_v54 = vld [vmem:[#allocation12 + $0xce0] sm:$0xff]  ;;  %v644_v55 = vld [vmem:[#allocation12 + $0xcf0] sm:$0xff] }
 0x180   :  { %1813 = vmatpush1.msra.mxu1 %v570_v56  ;;  %1884 = vmatpush1.msra.mxu0 %v572_v57  ;;  %v579_v56 = vld [vmem:[#allocation12 + $0xae8] sm:$0xff]  ;;  %v581_v57 = vld [vmem:[#allocation12 + $0xaf8] sm:$0xff] }
 0x181   :  { %1814 = vmatprep.subr.mxu1 %v507_v58  ;;  %1885 = vmatprep.subr.mxu0 %v509_v59  ;;  %v578_v58 = vld [vmem:[#allocation12 + $0xae0] sm:$0xff]  ;;  %v580_v59 = vld [vmem:[#allocation12 + $0xaf0] sm:$0xff] }
 0x182   :  { %1815 = vmatpush1.msra.mxu1 %v506_v60  ;;  %1886 = vmatpush1.msra.mxu0 %v508_v61  ;;  %v515_v60 = vld [vmem:[#allocation12 + $0x8e8] sm:$0xff]  ;;  %v517_v61 = vld [vmem:[#allocation12 + $0x8f8] sm:$0xff] }
 0x183   :  { %1816 = vmatprep.subr.mxu1 %v443_v62  ;;  %1887 = vmatprep.subr.mxu0 %v445_v63  ;;  %v514_v62 = vld [vmem:[#allocation12 + $0x8e0] sm:$0xff]  ;;  %v516_v63 = vld [vmem:[#allocation12 + $0x8f0] sm:$0xff] }
 0x184   :  { %1817 = vmatpush1.msra.mxu1 %v442_v0  ;;  %1888 = vmatpush1.msra.mxu0 %v444_v2  ;;  %v451_v0 = vld [vmem:[#allocation12 + $0x6e8] sm:$0xff]  ;;  %v453_v2 = vld [vmem:[#allocation12 + $0x6f8] sm:$0xff] }
 0x185   :  { %1818 = vmatprep.subr.mxu1 %v379_v3  ;;  %1889 = vmatprep.subr.mxu0 %v381_v4  ;;  %v450_v3 = vld [vmem:[#allocation12 + $0x6e0] sm:$0xff]  ;;  %v452_v4 = vld [vmem:[#allocation12 + $0x6f0] sm:$0xff] }
 0x186   :  { %1819 = vmatpush1.msra.mxu1 %v378_v5  ;;  %1890 = vmatpush1.msra.mxu0 %v380_v6  ;;  %v387_v5 = vld [vmem:[#allocation12 + $0x4e8] sm:$0xff]  ;;  %v389_v6 = vld [vmem:[#allocation12 + $0x4f8] sm:$0xff] }
 0x187   :  { %1820 = vmatprep.subr.mxu1 %v315_v7  ;;  %1891 = vmatprep.subr.mxu0 %v317_v8  ;;  %v386_v7 = vld [vmem:[#allocation12 + $0x4e0] sm:$0xff]  ;;  %v388_v8 = vld [vmem:[#allocation12 + $0x4f0] sm:$0xff] }
 0x188   :  { %1821 = vmatpush1.msra.mxu1 %v314_v9  ;;  %1892 = vmatpush1.msra.mxu0 %v316_v10  ;;  %v323_v9 = vld [vmem:[#allocation12 + $0x2e8] sm:$0xff]  ;;  %v325_v10 = vld [vmem:[#allocation12 + $0x2f8] sm:$0xff] }
 0x189   :  { %1822 = vmatprep.subr.mxu1 %v251_v11  ;;  %1893 = vmatprep.subr.mxu0 %v253_v12  ;;  %v322_v11 = vld [vmem:[#allocation12 + $0x2e0] sm:$0xff]  ;;  %v324_v12 = vld [vmem:[#allocation12 + $0x2f0] sm:$0xff] }
 0x18a   :  { %1823 = vmatpush1.msra.mxu1 %v250_v13  ;;  %1856 = vmatprep.mubr.f32.mxu1 %v9365_v1  ;;  %v259_v13 = vld [vmem:[#allocation12 + $0xe8] sm:$0xff] }
 0x18b   :  { %1894 = vmatpush1.msra.mxu0 %v252_v14  ;;  %1927 = vmatprep.mubr.f32.mxu0 %v9365_v1  ;;  %v261_v14 = vld [vmem:[#allocation12 + $0xf8] sm:$0xff] }
 0x18c   :  { %6287 = vmatmul.mubr.msk.f32.vlgmr.msra.gmra.mxu1 %vm1078_vm2, %v6718_v43  ;;  %6288 = vmatmul.mubr.msk.f32.vlgmr.msra.gmra.mxu0 %vm1078_vm2, %v6718_v43 }
 0x18d   :  { %1950 = vmatprep.subr.mxu1 %v703_v15  ;;  %2021 = vmatprep.subr.mxu0 %v705_v16  ;;  %v258_v15 = vld [vmem:[#allocation12 + $0xe0] sm:$0xff]  ;;  %v260_v16 = vld [vmem:[#allocation12 + $0xf0] sm:$0xff] }
 0x18e   :  { %1951 = vmatpush1.msra.mxu1 %v702_v17  ;;  %2022 = vmatpush1.msra.mxu0 %v704_v18  ;;  %v711_v17 = vld [vmem:[#allocation12 + $0xf08] sm:$0xff]  ;;  %v713_v18 = vld [vmem:[#allocation12 + $0xf18] sm:$0xff] }
 0x18f   :  { %1952 = vmatprep.subr.mxu1 %v639_v19  ;;  %2023 = vmatprep.subr.mxu0 %v641_v20  ;;  %v710_v19 = vld [vmem:[#allocation12 + $0xf00] sm:$0xff]  ;;  %v712_v20 = vld [vmem:[#allocation12 + $0xf10] sm:$0xff] }
 0x190   :  { %1953 = vmatpush1.msra.mxu1 %v638_v21  ;;  %2024 = vmatpush1.msra.mxu0 %v640_v22  ;;  %v647_v21 = vld [vmem:[#allocation12 + $0xd08] sm:$0xff]  ;;  %v649_v22 = vld [vmem:[#allocation12 + $0xd18] sm:$0xff] }
 0x191   :  { %1954 = vmatprep.subr.mxu1 %v575_v23  ;;  %2025 = vmatprep.subr.mxu0 %v577_v24  ;;  %v646_v23 = vld [vmem:[#allocation12 + $0xd00] sm:$0xff]  ;;  %v648_v24 = vld [vmem:[#allocation12 + $0xd10] sm:$0xff] }
 0x192   :  { %1955 = vmatpush1.msra.mxu1 %v574_v25  ;;  %2026 = vmatpush1.msra.mxu0 %v576_v26  ;;  %v583_v25 = vld [vmem:[#allocation12 + $0xb08] sm:$0xff]  ;;  %v585_v26 = vld [vmem:[#allocation12 + $0xb18] sm:$0xff] }
 0x193   :  { %1956 = vmatprep.subr.mxu1 %v511_v27  ;;  %2027 = vmatprep.subr.mxu0 %v513_v28  ;;  %v582_v27 = vld [vmem:[#allocation12 + $0xb00] sm:$0xff]  ;;  %v584_v28 = vld [vmem:[#allocation12 + $0xb10] sm:$0xff] }
 0x194   :  { %1957 = vmatpush1.msra.mxu1 %v510_v29  ;;  %2028 = vmatpush1.msra.mxu0 %v512_v30  ;;  %v519_v29 = vld [vmem:[#allocation12 + $0x908] sm:$0xff]  ;;  %v521_v30 = vld [vmem:[#allocation12 + $0x918] sm:$0xff] }
 0x195   :  { %1958 = vmatprep.subr.mxu1 %v447_v31  ;;  %2029 = vmatprep.subr.mxu0 %v449_v32  ;;  %v518_v31 = vld [vmem:[#allocation12 + $0x900] sm:$0xff]  ;;  %v520_v32 = vld [vmem:[#allocation12 + $0x910] sm:$0xff] }
 0x196   :  { %1959 = vmatpush1.msra.mxu1 %v446_v33  ;;  %2030 = vmatpush1.msra.mxu0 %v448_v34  ;;  %v455_v33 = vld [vmem:[#allocation12 + $0x708] sm:$0xff]  ;;  %v457_v34 = vld [vmem:[#allocation12 + $0x718] sm:$0xff] }
 0x197   :  { %1960 = vmatprep.subr.mxu1 %v383_v35  ;;  %2031 = vmatprep.subr.mxu0 %v385_v36  ;;  %v454_v35 = vld [vmem:[#allocation12 + $0x700] sm:$0xff]  ;;  %v456_v36 = vld [vmem:[#allocation12 + $0x710] sm:$0xff] }
 0x198   :  { %1961 = vmatpush1.msra.mxu1 %v382_v37  ;;  %2032 = vmatpush1.msra.mxu0 %v384_v38  ;;  %v391_v37 = vld [vmem:[#allocation12 + $0x508] sm:$0xff]  ;;  %v393_v38 = vld [vmem:[#allocation12 + $0x518] sm:$0xff] }
 0x199   :  { %1962 = vmatprep.subr.mxu1 %v319_v39  ;;  %2033 = vmatprep.subr.mxu0 %v321_v40  ;;  %v390_v39 = vld [vmem:[#allocation12 + $0x500] sm:$0xff]  ;;  %v392_v40 = vld [vmem:[#allocation12 + $0x510] sm:$0xff] }
 0x19a   :  { %1963 = vmatpush1.msra.mxu1 %v318_v41  ;;  %2034 = vmatpush1.msra.mxu0 %v320_v42  ;;  %v327_v41 = vld [vmem:[#allocation12 + $0x308] sm:$0xff]  ;;  %v329_v42 = vld [vmem:[#allocation12 + $0x318] sm:$0xff] }
 0x19b   :  { %1964 = vmatprep.subr.mxu1 %v255_v44  ;;  %2035 = vmatprep.subr.mxu0 %v257_v45  ;;  %v326_v44 = vld [vmem:[#allocation12 + $0x300] sm:$0xff]  ;;  %v328_v45 = vld [vmem:[#allocation12 + $0x310] sm:$0xff] }
 0x19c   :  { %1965 = vmatpush1.msra.mxu1 %v254_v46  ;;  %1998 = vmatprep.mubr.f32.mxu1 %v9365_v1  ;;  %v263_v46 = vld [vmem:[#allocation12 + $0x108] sm:$0xff] }
 0x19d   :  { %2036 = vmatpush1.msra.mxu0 %v256_v47  ;;  %2069 = vmatprep.mubr.f32.mxu0 %v9365_v1  ;;  %v265_v47 = vld [vmem:[#allocation12 + $0x118] sm:$0xff] }
 0x19e   :  { %6289 = vmatmul.mubr.msk.f32.vlgmr.msra.gmra.mxu1 %vm1078_vm2, %v6718_v43  ;;  %6290 = vmatmul.mubr.msk.f32.vlgmr.msra.gmra.mxu0 %vm1078_vm2, %v6718_v43 }
 0x19f   :  { %2092 = vmatprep.subr.mxu1 %v707_v48  ;;  %2163 = vmatprep.subr.mxu0 %v709_v49  ;;  %v262_v48 = vld [vmem:[#allocation12 + $0x100] sm:$0xff]  ;;  %v264_v49 = vld [vmem:[#allocation12 + $0x110] sm:$0xff] }
 0x1a0   :  { %2093 = vmatpush1.msra.mxu1 %v706_v50  ;;  %2164 = vmatpush1.msra.mxu0 %v708_v51  ;;  %v715_v50 = vld [vmem:[#allocation12 + $0xf28] sm:$0xff]  ;;  %v717_v51 = vld [vmem:[#allocation12 + $0xf38] sm:$0xff] }
 0x1a1   :  { %2094 = vmatprep.subr.mxu1 %v643_v52  ;;  %2165 = vmatprep.subr.mxu0 %v645_v53  ;;  %v714_v52 = vld [vmem:[#allocation12 + $0xf20] sm:$0xff]  ;;  %v716_v53 = vld [vmem:[#allocation12 + $0xf30] sm:$0xff] }
 0x1a2   :  { %2095 = vmatpush1.msra.mxu1 %v642_v54  ;;  %2166 = vmatpush1.msra.mxu0 %v644_v55  ;;  %v651_v54 = vld [vmem:[#allocation12 + $0xd28] sm:$0xff]  ;;  %v653_v55 = vld [vmem:[#allocation12 + $0xd38] sm:$0xff] }
 0x1a3   :  { %2096 = vmatprep.subr.mxu1 %v579_v56  ;;  %2167 = vmatprep.subr.mxu0 %v581_v57  ;;  %v650_v56 = vld [vmem:[#allocation12 + $0xd20] sm:$0xff]  ;;  %v652_v57 = vld [vmem:[#allocation12 + $0xd30] sm:$0xff] }
 0x1a4   :  { %2097 = vmatpush1.msra.mxu1 %v578_v58  ;;  %2168 = vmatpush1.msra.mxu0 %v580_v59  ;;  %v587_v58 = vld [vmem:[#allocation12 + $0xb28] sm:$0xff]  ;;  %v589_v59 = vld [vmem:[#allocation12 + $0xb38] sm:$0xff] }
 0x1a5   :  { %2098 = vmatprep.subr.mxu1 %v515_v60  ;;  %2169 = vmatprep.subr.mxu0 %v517_v61  ;;  %v586_v60 = vld [vmem:[#allocation12 + $0xb20] sm:$0xff]  ;;  %v588_v61 = vld [vmem:[#allocation12 + $0xb30] sm:$0xff] }
 0x1a6   :  { %2099 = vmatpush1.msra.mxu1 %v514_v62  ;;  %2170 = vmatpush1.msra.mxu0 %v516_v63  ;;  %v523_v62 = vld [vmem:[#allocation12 + $0x928] sm:$0xff]  ;;  %v525_v63 = vld [vmem:[#allocation12 + $0x938] sm:$0xff] }
 0x1a7   :  { %2100 = vmatprep.subr.mxu1 %v451_v0  ;;  %2171 = vmatprep.subr.mxu0 %v453_v2  ;;  %v522_v0 = vld [vmem:[#allocation12 + $0x920] sm:$0xff]  ;;  %v524_v2 = vld [vmem:[#allocation12 + $0x930] sm:$0xff] }
 0x1a8   :  { %2101 = vmatpush1.msra.mxu1 %v450_v3  ;;  %2172 = vmatpush1.msra.mxu0 %v452_v4  ;;  %v459_v3 = vld [vmem:[#allocation12 + $0x728] sm:$0xff]  ;;  %v461_v4 = vld [vmem:[#allocation12 + $0x738] sm:$0xff] }
 0x1a9   :  { %2102 = vmatprep.subr.mxu1 %v387_v5  ;;  %2173 = vmatprep.subr.mxu0 %v389_v6  ;;  %v458_v5 = vld [vmem:[#allocation12 + $0x720] sm:$0xff]  ;;  %v460_v6 = vld [vmem:[#allocation12 + $0x730] sm:$0xff] }
 0x1aa   :  { %2103 = vmatpush1.msra.mxu1 %v386_v7  ;;  %2174 = vmatpush1.msra.mxu0 %v388_v8  ;;  %v395_v7 = vld [vmem:[#allocation12 + $0x528] sm:$0xff]  ;;  %v397_v8 = vld [vmem:[#allocation12 + $0x538] sm:$0xff] }
 0x1ab   :  { %2104 = vmatprep.subr.mxu1 %v323_v9  ;;  %2175 = vmatprep.subr.mxu0 %v325_v10  ;;  %v394_v9 = vld [vmem:[#allocation12 + $0x520] sm:$0xff]  ;;  %v396_v10 = vld [vmem:[#allocation12 + $0x530] sm:$0xff] }
 0x1ac   :  { %2105 = vmatpush1.msra.mxu1 %v322_v11  ;;  %2176 = vmatpush1.msra.mxu0 %v324_v12  ;;  %v331_v11 = vld [vmem:[#allocation12 + $0x328] sm:$0xff]  ;;  %v333_v12 = vld [vmem:[#allocation12 + $0x338] sm:$0xff] }
 0x1ad   :  { %2106 = vmatprep.subr.mxu1 %v259_v13  ;;  %2177 = vmatprep.subr.mxu0 %v261_v14  ;;  %v330_v13 = vld [vmem:[#allocation12 + $0x320] sm:$0xff]  ;;  %v332_v14 = vld [vmem:[#allocation12 + $0x330] sm:$0xff] }
 0x1ae   :  { %2107 = vmatpush1.msra.mxu1 %v258_v15  ;;  %2140 = vmatprep.mubr.f32.mxu1 %v9365_v1  ;;  %v267_v15 = vld [vmem:[#allocation12 + $0x128] sm:$0xff] }
 0x1af   :  { %2178 = vmatpush1.msra.mxu0 %v260_v16  ;;  %2211 = vmatprep.mubr.f32.mxu0 %v9365_v1  ;;  %v269_v16 = vld [vmem:[#allocation12 + $0x138] sm:$0xff] }
 0x1b0   :  { %6291 = vmatmul.mubr.msk.f32.vlgmr.msra.gmra.mxu1 %vm1078_vm2, %v6718_v43  ;;  %6292 = vmatmul.mubr.msk.f32.vlgmr.msra.gmra.mxu0 %vm1078_vm2, %v6718_v43 }
 0x1b1   :  { %2234 = vmatprep.subr.mxu1 %v711_v17  ;;  %2305 = vmatprep.subr.mxu0 %v713_v18  ;;  %v266_v17 = vld [vmem:[#allocation12 + $0x120] sm:$0xff]  ;;  %v268_v18 = vld [vmem:[#allocation12 + $0x130] sm:$0xff] }
 0x1b2   :  { %2235 = vmatpush1.msra.mxu1 %v710_v19  ;;  %2306 = vmatpush1.msra.mxu0 %v712_v20  ;;  %v719_v19 = vld [vmem:[#allocation12 + $0xf48] sm:$0xff]  ;;  %v721_v20 = vld [vmem:[#allocation12 + $0xf58] sm:$0xff] }
 0x1b3   :  { %2236 = vmatprep.subr.mxu1 %v647_v21  ;;  %2307 = vmatprep.subr.mxu0 %v649_v22  ;;  %v718_v21 = vld [vmem:[#allocation12 + $0xf40] sm:$0xff]  ;;  %v720_v22 = vld [vmem:[#allocation12 + $0xf50] sm:$0xff] }
 0x1b4   :  { %2237 = vmatpush1.msra.mxu1 %v646_v23  ;;  %2308 = vmatpush1.msra.mxu0 %v648_v24  ;;  %v655_v23 = vld [vmem:[#allocation12 + $0xd48] sm:$0xff]  ;;  %v657_v24 = vld [vmem:[#allocation12 + $0xd58] sm:$0xff] }
 0x1b5   :  { %2238 = vmatprep.subr.mxu1 %v583_v25  ;;  %2309 = vmatprep.subr.mxu0 %v585_v26  ;;  %v654_v25 = vld [vmem:[#allocation12 + $0xd40] sm:$0xff]  ;;  %v656_v26 = vld [vmem:[#allocation12 + $0xd50] sm:$0xff] }
 0x1b6   :  { %2239 = vmatpush1.msra.mxu1 %v582_v27  ;;  %2310 = vmatpush1.msra.mxu0 %v584_v28  ;;  %v591_v27 = vld [vmem:[#allocation12 + $0xb48] sm:$0xff]  ;;  %v593_v28 = vld [vmem:[#allocation12 + $0xb58] sm:$0xff] }
 0x1b7   :  { %2240 = vmatprep.subr.mxu1 %v519_v29  ;;  %2311 = vmatprep.subr.mxu0 %v521_v30  ;;  %v590_v29 = vld [vmem:[#allocation12 + $0xb40] sm:$0xff]  ;;  %v592_v30 = vld [vmem:[#allocation12 + $0xb50] sm:$0xff] }
 0x1b8   :  { %2241 = vmatpush1.msra.mxu1 %v518_v31  ;;  %2312 = vmatpush1.msra.mxu0 %v520_v32  ;;  %v527_v31 = vld [vmem:[#allocation12 + $0x948] sm:$0xff]  ;;  %v529_v32 = vld [vmem:[#allocation12 + $0x958] sm:$0xff] }
 0x1b9   :  { %2242 = vmatprep.subr.mxu1 %v455_v33  ;;  %2313 = vmatprep.subr.mxu0 %v457_v34  ;;  %v526_v33 = vld [vmem:[#allocation12 + $0x940] sm:$0xff]  ;;  %v528_v34 = vld [vmem:[#allocation12 + $0x950] sm:$0xff] }
 0x1ba   :  { %2243 = vmatpush1.msra.mxu1 %v454_v35  ;;  %2314 = vmatpush1.msra.mxu0 %v456_v36  ;;  %v463_v35 = vld [vmem:[#allocation12 + $0x748] sm:$0xff]  ;;  %v465_v36 = vld [vmem:[#allocation12 + $0x758] sm:$0xff] }
 0x1bb   :  { %2244 = vmatprep.subr.mxu1 %v391_v37  ;;  %2315 = vmatprep.subr.mxu0 %v393_v38  ;;  %v462_v37 = vld [vmem:[#allocation12 + $0x740] sm:$0xff]  ;;  %v464_v38 = vld [vmem:[#allocation12 + $0x750] sm:$0xff] }
 0x1bc   :  { %2245 = vmatpush1.msra.mxu1 %v390_v39  ;;  %2316 = vmatpush1.msra.mxu0 %v392_v40  ;;  %v399_v39 = vld [vmem:[#allocation12 + $0x548] sm:$0xff]  ;;  %v401_v40 = vld [vmem:[#allocation12 + $0x558] sm:$0xff] }
 0x1bd   :  { %2246 = vmatprep.subr.mxu1 %v327_v41  ;;  %2317 = vmatprep.subr.mxu0 %v329_v42  ;;  %v398_v41 = vld [vmem:[#allocation12 + $0x540] sm:$0xff]  ;;  %v400_v42 = vld [vmem:[#allocation12 + $0x550] sm:$0xff] }
 0x1be   :  { %2247 = vmatpush1.msra.mxu1 %v326_v44  ;;  %2318 = vmatpush1.msra.mxu0 %v328_v45  ;;  %v335_v44 = vld [vmem:[#allocation12 + $0x348] sm:$0xff]  ;;  %v337_v45 = vld [vmem:[#allocation12 + $0x358] sm:$0xff] }
 0x1bf   :  { %2248 = vmatprep.subr.mxu1 %v263_v46  ;;  %2319 = vmatprep.subr.mxu0 %v265_v47  ;;  %v334_v46 = vld [vmem:[#allocation12 + $0x340] sm:$0xff]  ;;  %v336_v47 = vld [vmem:[#allocation12 + $0x350] sm:$0xff] }
 0x1c0   :  { %2249 = vmatpush1.msra.mxu1 %v262_v48  ;;  %2282 = vmatprep.mubr.f32.mxu1 %v9365_v1  ;;  %v271_v48 = vld [vmem:[#allocation12 + $0x148] sm:$0xff] }
 0x1c1   :  { %2320 = vmatpush1.msra.mxu0 %v264_v49  ;;  %2353 = vmatprep.mubr.f32.mxu0 %v9365_v1  ;;  %v273_v49 = vld [vmem:[#allocation12 + $0x158] sm:$0xff] }
 0x1c2   :  { %6293 = vmatmul.mubr.msk.f32.vlgmr.msra.gmra.mxu1 %vm1078_vm2, %v6718_v43  ;;  %6294 = vmatmul.mubr.msk.f32.vlgmr.msra.gmra.mxu0 %vm1078_vm2, %v6718_v43 }
 0x1c3   :  { %2376 = vmatprep.subr.mxu1 %v715_v50  ;;  %2447 = vmatprep.subr.mxu0 %v717_v51  ;;  %v270_v50 = vld [vmem:[#allocation12 + $0x140] sm:$0xff]  ;;  %v272_v51 = vld [vmem:[#allocation12 + $0x150] sm:$0xff] }
 0x1c4   :  { %2377 = vmatpush1.msra.mxu1 %v714_v52  ;;  %2448 = vmatpush1.msra.mxu0 %v716_v53  ;;  %v723_v52 = vld [vmem:[#allocation12 + $0xf68] sm:$0xff]  ;;  %v725_v53 = vld [vmem:[#allocation12 + $0xf78] sm:$0xff] }
 0x1c5   :  { %2378 = vmatprep.subr.mxu1 %v651_v54  ;;  %2449 = vmatprep.subr.mxu0 %v653_v55  ;;  %v9367_v54 = vlaneseq  ;;  %v722_v55 = vld [vmem:[#allocation12 + $0xf60] sm:$0xff] }
 0x1c6   :  { %2379 = vmatpush1.msra.mxu1 %v650_v56  ;;  %2450 = vmatpush1.msra.mxu0 %v652_v57  ;;  %v724_v56 = vld [vmem:[#allocation12 + $0xf70] sm:$0xff]  ;;  %v659_v57 = vld [vmem:[#allocation12 + $0xd68] sm:$0xff] }
 0x1c7   :  { %2380 = vmatprep.subr.mxu1 %v587_v58  ;;  %2451 = vmatprep.subr.mxu0 %v589_v59  ;;  %v661_v58 = vld [vmem:[#allocation12 + $0xd78] sm:$0xff]  ;;  %v658_v59 = vld [vmem:[#allocation12 + $0xd60] sm:$0xff]  ;;  %vm6821_vm3 = vcmp.lt.s32.totalorder %v9367_v54, 256 }
 0x1c8   :  { %2381 = vmatpush1.msra.mxu1 %v586_v60  ;;  %2452 = vmatpush1.msra.mxu0 %v588_v61  ;;  %v660_v60 = vld [vmem:[#allocation12 + $0xd70] sm:$0xff]  ;;  %v595_v61 = vld [vmem:[#allocation12 + $0xb68] sm:$0xff] }
 0x1c9   :  { %2382 = vmatprep.subr.mxu1 %v523_v62  ;;  %2453 = vmatprep.subr.mxu0 %v525_v63  ;;  %v597_v62 = vld [vmem:[#allocation12 + $0xb78] sm:$0xff]  ;;  %v6785_v63 = vshrl.u32 %v9367_v54, 7 }
 0x1ca   :  { %2383 = vmatpush1.msra.mxu1 %v522_v0  ;;  %2454 = vmatpush1.msra.mxu0 %v524_v2  ;;  %v594_v0 = vld [vmem:[#allocation12 + $0xb60] sm:$0xff]  ;;  %v596_v2 = vld [vmem:[#allocation12 + $0xb70] sm:$0xff] }
 0x1cb   :  { %2384 = vmatprep.subr.mxu1 %v459_v3  ;;  %2455 = vmatprep.subr.mxu0 %v461_v4  ;;  %v531_v3 = vld [vmem:[#allocation12 + $0x968] sm:$0xff]  ;;  %v533_v4 = vld [vmem:[#allocation12 + $0x978] sm:$0xff] }
 0x1cc   :  { %2385 = vmatpush1.msra.mxu1 %v458_v5  ;;  %2456 = vmatpush1.msra.mxu0 %v460_v6  ;;  %v530_v5 = vld [vmem:[#allocation12 + $0x960] sm:$0xff]  ;;  %v532_v6 = vld [vmem:[#allocation12 + $0x970] sm:$0xff] }
 0x1cd   :  { %2386 = vmatprep.subr.mxu1 %v395_v7  ;;  %2457 = vmatprep.subr.mxu0 %v397_v8  ;;  %v467_v7 = vld [vmem:[#allocation12 + $0x768] sm:$0xff]  ;;  %v469_v8 = vld [vmem:[#allocation12 + $0x778] sm:$0xff] }
 0x1ce   :  { %2387 = vmatpush1.msra.mxu1 %v394_v9  ;;  %2458 = vmatpush1.msra.mxu0 %v396_v10  ;;  %v6788_v9 = vsub.s32 0, %v6785_v63  ;;  %v6791_v10 = vsub.s32 2, %v6785_v63 }
 0x1cf   :  { %2388 = vmatprep.subr.mxu1 %v331_v11  ;;  %2459 = vmatprep.subr.mxu0 %v333_v12  ;;  %v466_v11 = vld [vmem:[#allocation12 + $0x760] sm:$0xff]  ;;  %v468_v12 = vld [vmem:[#allocation12 + $0x770] sm:$0xff] }
 0x1d0   :  { %2389 = vmatpush1.msra.mxu1 %v330_v13  ;;  %2460 = vmatpush1.msra.mxu0 %v332_v14  ;;  %9514 = vst [vmem:[#allocation25_spill] sm:$0xff] %v6788_v9  ;;  %v6793_v13 = vld [vmem:[#allocation13] sm:$0xff]  ;;  %v403_v14 = vld [vmem:[#allocation12 + $0x568] sm:$0xff] }
 0x1d1   :  { %2390 = vmatprep.subr.mxu1 %v267_v15  ;;  %2461 = vmatprep.subr.mxu0 %v269_v16  ;;  %v405_v15 = vld [vmem:[#allocation12 + $0x578] sm:$0xff]  ;;  %v6796_v16 = vsub.s32 1, %v6785_v63 }
 0x1d2   :  { %2391 = vmatpush1.msra.mxu1 %v266_v17  ;;  %2424 = vmatprep.mubr.f32.mxu1 %v9365_v1  ;;  %v6799_v17 = vsub.s32 3, %v6785_v63 }
 0x1d3   :  { %2462 = vmatpush1.msra.mxu0 %v268_v18  ;;  %2495 = vmatprep.mubr.f32.mxu0 %v9365_v1  ;;  %v402_v18 = vld [vmem:[#allocation12 + $0x560] sm:$0xff] }
 0x1d4   :  { %6295 = vmatmul.mubr.msk.f32.vlgmr.msra.gmra.mxu1 %vm1078_vm2, %v6718_v43  ;;  %6296 = vmatmul.mubr.msk.f32.vlgmr.msra.gmra.mxu0 %vm1078_vm2, %v6718_v43 }
 0x1d5   :  { %2518 = vmatprep.subr.mxu1 %v719_v19  ;;  %2589 = vmatprep.subr.mxu0 %v721_v20  ;;  %v404_v19 = vld [vmem:[#allocation12 + $0x570] sm:$0xff]  ;;  %v6606_v20 = vmov 1966171168  }
 0x1d6   :  { %2519 = vmatpush1.msra.mxu1 %v718_v21  ;;  %2590 = vmatpush1.msra.mxu0 %v720_v22  ;;  %v3422_v21 = vunpack.c.l.s4 %v6606_v20  ;;  %v339_v22 = vld [vmem:[#allocation12 + $0x368] sm:$0xff] }
 0x1d7   :  { %2520 = vmatprep.subr.mxu1 %v655_v23  ;;  %2591 = vmatprep.subr.mxu0 %v657_v24  ;;  %v341_v23 = vld [vmem:[#allocation12 + $0x378] sm:$0xff]  ;;  %v761_v24 = vrot.slane %v6793_v13, %v6788_v9 }
 0x1d8   :  { %2521 = vmatpush1.msra.mxu1 %v654_v25  ;;  %2592 = vmatpush1.msra.mxu0 %v656_v26  ;;  %v769_v25 = vrot.slane %v6793_v13, %v6791_v10  ;;  %v338_v26 = vld [vmem:[#allocation12 + $0x360] sm:$0xff] }
 0x1d9   :  { %2522 = vmatprep.subr.mxu1 %v591_v27  ;;  %2593 = vmatprep.subr.mxu0 %v593_v28  ;;  %v340_v27 = vld [vmem:[#allocation12 + $0x370] sm:$0xff]  ;;  %v275_v28 = vld [vmem:[#allocation12 + $0x168] sm:$0xff] }
 0x1da   :  { %2523 = vmatpush1.msra.mxu1 %v590_v29  ;;  %2594 = vmatpush1.msra.mxu0 %v592_v30  ;;  %v277_v29 = vld [vmem:[#allocation12 + $0x178] sm:$0xff]  ;;  %v765_v30 = vrot.slane %v6793_v13, %v6796_v16 }
 0x1db   :  { %2524 = vmatprep.subr.mxu1 %v527_v31  ;;  %2595 = vmatprep.subr.mxu0 %v529_v32  ;;  %v773_v31 = vrot.slane %v6793_v13, %v6799_v17  ;;  %v274_v32 = vld [vmem:[#allocation12 + $0x160] sm:$0xff] }
 0x1dc   :  { %2525 = vmatpush1.msra.mxu1 %v526_v33  ;;  %2596 = vmatpush1.msra.mxu0 %v528_v34  ;;  %v3423_v34 = vunpack.c.0.s8 %v3422_v21  ;;  %v470_v21 = vld [vmem:[#allocation12 + $0x780] sm:$0xff] }
 0x1dd   :  { %2526 = vmatprep.subr.mxu1 %v463_v35  ;;  %2597 = vmatprep.subr.mxu0 %v465_v36  ;;  %v276_v36 = vld [vmem:[#allocation12 + $0x170] sm:$0xff] }
 0x1de   :  { %2527 = vmatpush1.msra.mxu1 %v462_v37  ;;  %2598 = vmatpush1.msra.mxu0 %v464_v38 }
 0x1df   :  { %2528 = vmatprep.subr.mxu1 %v399_v39  ;;  %2599 = vmatprep.subr.mxu0 %v401_v40 }
 0x1e0   :  { %2529 = vmatpush1.msra.mxu1 %v398_v41  ;;  %2600 = vmatpush1.msra.mxu0 %v400_v42  ;;  %v727_v41 = vld [vmem:[#allocation12 + $0xf88] sm:$0xff]  ;;  %v729_v42 = vld [vmem:[#allocation12 + $0xf98] sm:$0xff] }
 0x1e1   :  { %2530 = vmatprep.subr.mxu1 %v335_v44  ;;  %2601 = vmatprep.subr.mxu0 %v337_v45 }
 0x1e2   :  { %2531 = vmatpush1.msra.mxu1 %v334_v46  ;;  %2602 = vmatpush1.msra.mxu0 %v336_v47  ;;  %v726_v46 = vld [vmem:[#allocation12 + $0xf80] sm:$0xff]  ;;  %v728_v47 = vld [vmem:[#allocation12 + $0xf90] sm:$0xff] }
 0x1e3   :  { %2532 = vmatprep.subr.mxu1 %v271_v48  ;;  %2603 = vmatprep.subr.mxu0 %v273_v49  ;;  %v6812_v48 = vsub.s32 %v3423_v34, %v6785_v63  ;;  %v663_v49 = vld [vmem:[#allocation12 + $0xd88] sm:$0xff]  ;;  %v345_v34 = vld [vmem:[#allocation12 + $0x398] sm:$0xff] }
 0x1e4   :  { %2533 = vmatpush1.msra.mxu1 %v270_v50  ;;  %2566 = vmatprep.mubr.f32.mxu1 %v9365_v1  ;;  %v665_v50 = vld [vmem:[#allocation12 + $0xd98] sm:$0xff] }
 0x1e5   :  { %2604 = vmatpush1.msra.mxu0 %v272_v51  ;;  %2637 = vmatprep.mubr.f32.mxu0 %v9365_v1  ;;  %9515 = vst [vmem:[#allocation26_spill] sm:$0xff] %v6812_v48 }
 0x1e6   :  { %6297 = vmatmul.mubr.msk.f32.vlgmr.msra.gmra.mxu1 %vm1078_vm2, %v6718_v43  ;;  %6298 = vmatmul.mubr.msk.f32.vlgmr.msra.gmra.mxu0 %vm1078_vm2, %v6718_v43 }
 0x1e7   :  { %2660 = vmatprep.subr.mxu1 %v723_v52  ;;  %2731 = vmatprep.subr.mxu0 %v725_v53 }
 0x1e8   :  { %2661 = vmatpush1.msra.mxu1 %v722_v55  ;;  %2732 = vmatpush1.msra.mxu0 %v724_v56  ;;  %v662_v56 = vld [vmem:[#allocation12 + $0xd80] sm:$0xff] }
 0x1e9   :  { %2662 = vmatprep.subr.mxu1 %v659_v57  ;;  %2733 = vmatprep.subr.mxu0 %v661_v58  ;;  %v664_v57 = vld [vmem:[#allocation12 + $0xd90] sm:$0xff]  ;;  %v599_v58 = vld [vmem:[#allocation12 + $0xb88] sm:$0xff] }
 0x1ea   :  { %2663 = vmatpush1.msra.mxu1 %v658_v59  ;;  %2734 = vmatpush1.msra.mxu0 %v660_v60  ;;  %v601_v59 = vld [vmem:[#allocation12 + $0xb98] sm:$0xff] }
 0x1eb   :  { %2664 = vmatprep.subr.mxu1 %v595_v61  ;;  %2735 = vmatprep.subr.mxu0 %v597_v62  ;;  %v598_v62 = vld [vmem:[#allocation12 + $0xb80] sm:$0xff] }
 0x1ec   :  { %2665 = vmatpush1.msra.mxu1 %v594_v0  ;;  %2736 = vmatpush1.msra.mxu0 %v596_v2  ;;  %v600_v0 = vld [vmem:[#allocation12 + $0xb90] sm:$0xff]  ;;  %v535_v2 = vld [vmem:[#allocation12 + $0x988] sm:$0xff] }
 0x1ed   :  { %2666 = vmatprep.subr.mxu1 %v531_v3  ;;  %2737 = vmatprep.subr.mxu0 %v533_v4  ;;  %v537_v3 = vld [vmem:[#allocation12 + $0x998] sm:$0xff] }
 0x1ee   :  { %2667 = vmatpush1.msra.mxu1 %v530_v5  ;;  %2738 = vmatpush1.msra.mxu0 %v532_v6  ;;  %v534_v6 = vld [vmem:[#allocation12 + $0x980] sm:$0xff] }
 0x1ef   :  { %2668 = vmatprep.subr.mxu1 %v467_v7  ;;  %2739 = vmatprep.subr.mxu0 %v469_v8  ;;  %v536_v7 = vld [vmem:[#allocation12 + $0x990] sm:$0xff]  ;;  %v9516_v8 = vmov 0 }
 0x1f0   :  { %2669 = vmatpush1.msra.mxu1 %v466_v11  ;;  %2740 = vmatpush1.msra.mxu0 %v468_v12  ;;  %v9517_v8 = vsel %vm6821_vm3, 4294967295, %v9516_v8  ;;  %v6826_v11 = vsub.s32 4, %v6785_v63  ;;  %v6829_v12 = vsub.s32 6, %v6785_v63 }
 0x1f1   :  { %2670 = vmatprep.subr.mxu1 %v403_v14  ;;  %2741 = vmatprep.subr.mxu0 %v405_v15  ;;  %9518 = vst [vmem:[#allocation27_spill] sm:$0xff] %v9517_v8  ;;  %v471_v14 = vld [vmem:[#allocation12 + $0x788] sm:$0xff]  ;;  %v473_v15 = vld [vmem:[#allocation12 + $0x798] sm:$0xff] }
 0x1f2   :  { %2671 = vmatpush1.msra.mxu1 %v402_v18  ;;  %2742 = vmatpush1.msra.mxu0 %v404_v19  ;;  %9519 = vst [vmem:[#allocation28_spill] sm:$0xff] %v6829_v12 }
 0x1f3   :  { %2672 = vmatprep.subr.mxu1 %v339_v22  ;;  %2743 = vmatprep.subr.mxu0 %v341_v23  ;;  %v1148_v33 = vpop.f32.mrf.mxu1  ;;  %v1219_v35 = vpop.f32.mrf.mxu0  ;;  %v472_v22 = vld [vmem:[#allocation12 + $0x790] sm:$0xff] }
 0x1f4   :  { %2673 = vmatpush1.msra.mxu1 %v338_v26  ;;  %2744 = vmatpush1.msra.mxu0 %v340_v27  ;;  %v1149_v37 = vadd.f32 %v1148_v33, %v761_v24  ;;  %v1220_v38 = vadd.f32 %v1219_v35, %v769_v25  ;;  %v6834_v24 = vsub.s32 5, %v6785_v63  ;;  %v6837_v25 = vsub.s32 7, %v6785_v63  ;;  %v407_v26 = vld [vmem:[#allocation12 + $0x588] sm:$0xff]  ;;  %v409_v27 = vld [vmem:[#allocation12 + $0x598] sm:$0xff]  ;;  %v342_v35 = vld [vmem:[#allocation12 + $0x380] sm:$0xff] }
 0x1f5   :  { %2674 = vmatprep.subr.mxu1 %v275_v28  ;;  %2745 = vmatprep.subr.mxu0 %v277_v29  ;;  %v1150_v39 = vpop.f32.mrf.mxu1  ;;  %v1221_v40 = vpop.f32.mrf.mxu0  ;;  %v406_v29 = vld [vmem:[#allocation12 + $0x580] sm:$0xff]  ;;  %v777_v63 = vrot.slane %v6793_v13, %v6826_v11  ;;  %v343_v33 = vld [vmem:[#allocation12 + $0x388] sm:$0xff] }
 0x1f6   :  { %2675 = vmatpush1.msra.mxu1 %v274_v32  ;;  %2708 = vmatprep.mubr.f32.mxu1 %v9365_v1  ;;  %v1151_v44 = vadd.f32 %v1150_v39, %v765_v30  ;;  %v1222_v45 = vadd.f32 %v1221_v40, %v773_v31  ;;  %v3354_v51 = vmax.f32 %v1149_v37, 0.0  ;;  %v3356_v52 = vmax.f32 %v1220_v38, 0.0  ;;  %9520 = vst [vmem:[#allocation29_spill] sm:$0xff] %v6834_v24  ;;  %v408_v30 = vld [vmem:[#allocation12 + $0x590] sm:$0xff]  ;;  %v279_v39 = vld [vmem:[#allocation12 + $0x188] sm:$0xff]  ;;  %v281_v40 = vld [vmem:[#allocation12 + $0x198] sm:$0xff] }
 0x1f7   :  { %2746 = vmatpush1.msra.mxu0 %v276_v36  ;;  %2779 = vmatprep.mubr.f32.mxu0 %v9365_v1  ;;  %v785_v32 = vrot.slane %v6793_v13, %v6829_v12  ;;  %v344_v36 = vld [vmem:[#allocation12 + $0x390] sm:$0xff]  ;;  %v781_v37 = vrot.slane %v6793_v13, %v6834_v24  ;;  %v789_v38 = vrot.slane %v6793_v13, %v6837_v25 }
 0x1f8   :  { %6299 = vmatmul.mubr.msk.f32.vlgmr.msra.gmra.mxu1 %vm1078_vm2, %v6718_v43  ;;  %6300 = vmatmul.mubr.msk.f32.vlgmr.msra.gmra.mxu0 %vm1078_vm2, %v6718_v43  ;;  %v3355_v53 = vmax.f32 %v1151_v44, 0.0  ;;  %v3357_v55 = vmax.f32 %v1222_v45, 0.0  ;;  %v278_v44 = vld [vmem:[#allocation12 + $0x180] sm:$0xff] }
 0x1f9   :  { %2802 = vmatprep.subr.mxu1 %v727_v41  ;;  %2873 = vmatprep.subr.mxu0 %v729_v42 }
 0x1fa   :  { %2803 = vmatpush1.msra.mxu1 %v726_v46  ;;  %2874 = vmatpush1.msra.mxu0 %v728_v47  ;;  %v3420_v60 = vcombine.low %v3354_v51, %v3355_v53  ;;  %v3444_v61 = vcombine.low %v3356_v52, %v3357_v55  ;;  %v280_v47 = vld [vmem:[#allocation12 + $0x190] sm:$0xff]  ;;  %v731_v52 = vld [vmem:[#allocation12 + $0xfa8] sm:$0xff]  ;;  %v733_v53 = vld [vmem:[#allocation12 + $0xfb8] sm:$0xff] }
 0x1fb   :  { %2804 = vmatprep.subr.mxu1 %v663_v49  ;;  %2875 = vmatprep.subr.mxu0 %v665_v50  ;;  %v730_v55 = vld [vmem:[#allocation12 + $0xfa0] sm:$0xff] }
 0x1fc   :  { %2805 = vmatpush1.msra.mxu1 %v662_v56  ;;  %2876 = vmatpush1.msra.mxu0 %v664_v57  ;;  %v3427_v4 = vrot.slane %v3420_v60, %v6812_v48  ;;  %v3451_v5 = vrot.slane %v3444_v61, %v6812_v48  ;;  %v732_v56 = vld [vmem:[#allocation12 + $0xfb0] sm:$0xff]  ;;  %v667_v61 = vld [vmem:[#allocation12 + $0xda8] sm:$0xff] }
 0x1fd   :  { %2806 = vmatprep.subr.mxu1 %v599_v58  ;;  %2877 = vmatprep.subr.mxu0 %v601_v59 }
 0x1fe   :  { %2807 = vmatpush1.msra.mxu1 %v598_v62  ;;  %2878 = vmatpush1.msra.mxu0 %v600_v0  ;;  %v3434_v18 = vrot.slane %v3427_v4, %v6812_v48  ;;  %v4093_v19 = vcombine.high %v3427_v4, %v3427_v4  ;;  %v3458_v20 = vrot.slane %v3451_v5, %v6812_v48  ;;  %v669_v62 = vld [vmem:[#allocation12 + $0xdb8] sm:$0xff]  ;;  %v666_v0 = vld [vmem:[#allocation12 + $0xda0] sm:$0xff] }
 0x1ff   :  { %2808 = vmatprep.subr.mxu1 %v535_v2  ;;  %2879 = vmatprep.subr.mxu0 %v537_v3  ;;  %v4105_v23 = vcombine.high %v3451_v5, %v3451_v5  ;;  %v668_v2 = vld [vmem:[#allocation12 + $0xdb0] sm:$0xff]  ;;  %v603_v5 = vld [vmem:[#allocation12 + $0xba8] sm:$0xff] }
 0x200   :  { %2809 = vmatpush1.msra.mxu1 %v534_v6  ;;  %2880 = vmatpush1.msra.mxu0 %v536_v7  ;;  %3440 = vst.msk [vmem:[#allocation2] ss:$8 sm:$0x3] %vm6821_vm3, %v3434_v18  ;;  %v4100_v28 = vrot.slane %v4093_v19, %v6812_v48  ;;  %3461 = vst.msk [vmem:[#allocation2 + $0x1] ss:$8 sm:$0x3] %vm6821_vm3, %v3458_v20 }
 0x201   :  { %2810 = vmatprep.subr.mxu1 %v471_v14  ;;  %2881 = vmatprep.subr.mxu0 %v473_v15  ;;  %v4112_v31 = vrot.slane %v4105_v23, %v6812_v48  ;;  %v605_v6 = vld [vmem:[#allocation12 + $0xbb8] sm:$0xff]  ;;  %v602_v7 = vld [vmem:[#allocation12 + $0xba0] sm:$0xff]  ;;  %v604_v14 = vld [vmem:[#allocation12 + $0xbb0] sm:$0xff] }
 0x202   :  { %2811 = vmatpush1.msra.mxu1 %v470_v21  ;;  %2882 = vmatpush1.msra.mxu0 %v472_v22  ;;  %4103 = vst.msk [vmem:[#allocation2 + $0x10] ss:$8 sm:$0x3] %vm6821_vm3, %v4100_v28  ;;  %v539_v19 = vld [vmem:[#allocation12 + $0x9a8] sm:$0xff]  ;;  %v541_v20 = vld [vmem:[#allocation12 + $0x9b8] sm:$0xff]  ;;  %v538_v21 = vld [vmem:[#allocation12 + $0x9a0] sm:$0xff] }
 0x203   :  { %2812 = vmatprep.subr.mxu1 %v407_v26  ;;  %2883 = vmatprep.subr.mxu0 %v409_v27  ;;  %4115 = vst.msk [vmem:[#allocation2 + $0x11] ss:$8 sm:$0x3] %vm6821_vm3, %v4112_v31  ;;  %v540_v22 = vld [vmem:[#allocation12 + $0x9b0] sm:$0xff]  ;;  %v475_v28 = vld [vmem:[#allocation12 + $0x7a8] sm:$0xff] }
 0x204   :  { %2813 = vmatpush1.msra.mxu1 %v406_v29  ;;  %2884 = vmatpush1.msra.mxu0 %v408_v30  ;;  %v1290_v41 = vpop.f32.mrf.mxu1  ;;  %v1361_v42 = vpop.f32.mrf.mxu0  ;;  %v477_v29 = vld [vmem:[#allocation12 + $0x7b8] sm:$0xff]  ;;  %v6867_v31 = vld [vmem:[#allocation13 + $0x8] sm:$0xff] }
 0x205   :  { %2814 = vmatprep.subr.mxu1 %v343_v33  ;;  %2885 = vmatprep.subr.mxu0 %v345_v34  ;;  %v1291_v45 = vadd.f32 %v1290_v41, %v777_v63  ;;  %v1362_v46 = vadd.f32 %v1361_v42, %v785_v32  ;;  %v474_v63 = vld [vmem:[#allocation12 + $0x7a0] sm:$0xff]  ;;  %v476_v32 = vld [vmem:[#allocation12 + $0x7b0] sm:$0xff]  ;;  %v411_v34 = vld [vmem:[#allocation12 + $0x5a8] sm:$0xff] }
 0x206   :  { %2815 = vmatpush1.msra.mxu1 %v342_v35  ;;  %2886 = vmatpush1.msra.mxu0 %v344_v36  ;;  %v1292_v49 = vpop.f32.mrf.mxu1  ;;  %v1363_v50 = vpop.f32.mrf.mxu0  ;;  %v413_v35 = vld [vmem:[#allocation12 + $0x5b8] sm:$0xff]  ;;  %v347_v41 = vld [vmem:[#allocation12 + $0x3a8] sm:$0xff] }
 0x207   :  { %2816 = vmatprep.subr.mxu1 %v279_v39  ;;  %2887 = vmatprep.subr.mxu0 %v281_v40  ;;  %v1293_v51 = vadd.f32 %v1292_v49, %v781_v37  ;;  %v1364_v13 = vadd.f32 %v1363_v50, %v789_v38  ;;  %v3358_v57 = vmax.f32 %v1291_v45, 0.0  ;;  %v3360_v58 = vmax.f32 %v1362_v46, 0.0  ;;  %v410_v37 = vld [vmem:[#allocation12 + $0x5a0] sm:$0xff]  ;;  %v412_v38 = vld [vmem:[#allocation12 + $0x5b0] sm:$0xff]  ;;  %v349_v42 = vld [vmem:[#allocation12 + $0x3b8] sm:$0xff] }
 0x208   :  { %2817 = vmatpush1.msra.mxu1 %v278_v44  ;;  %2850 = vmatprep.mubr.f32.mxu1 %v9365_v1  ;;  %v793_v39 = vrot.slane %v6867_v31, %v6788_v9  ;;  %v801_v40 = vrot.slane %v6867_v31, %v6791_v10  ;;  %v346_v44 = vld [vmem:[#allocation12 + $0x3a0] sm:$0xff]  ;;  %v348_v45 = vld [vmem:[#allocation12 + $0x3b0] sm:$0xff]  ;;  %v797_v46 = vrot.slane %v6867_v31, %v6796_v16  ;;  %v283_v49 = vld [vmem:[#allocation12 + $0x1a8] sm:$0xff] }
 0x209   :  { %2888 = vmatpush1.msra.mxu0 %v280_v47  ;;  %2921 = vmatprep.mubr.f32.mxu0 %v9365_v1  ;;  %v3359_v59 = vmax.f32 %v1293_v51, 0.0  ;;  %v3361_v60 = vmax.f32 %v1364_v13, 0.0  ;;  %v805_v47 = vrot.slane %v6867_v31, %v6799_v17  ;;  %v285_v50 = vld [vmem:[#allocation12 + $0x1b8] sm:$0xff] }
 0x20a   :  { %6301 = vmatmul.mubr.msk.f32.vlgmr.msra.gmra.mxu1 %vm1078_vm2, %v6718_v43  ;;  %6302 = vmatmul.mubr.msk.f32.vlgmr.msra.gmra.mxu0 %vm1078_vm2, %v6718_v43 }
 0x20b   :  { %2944 = vmatprep.subr.mxu1 %v731_v52  ;;  %3015 = vmatprep.subr.mxu0 %v733_v53  ;;  %v3465_v3 = vcombine.low %v3358_v57, %v3359_v59  ;;  %v3486_v4 = vcombine.low %v3360_v58, %v3361_v60  ;;  %v282_v52 = vld [vmem:[#allocation12 + $0x1a0] sm:$0xff] }
 0x20c   :  { %2945 = vmatpush1.msra.mxu1 %v730_v55  ;;  %3016 = vmatpush1.msra.mxu0 %v732_v56  ;;  %v284_v56 = vld [vmem:[#allocation12 + $0x1b0] sm:$0xff] }
 0x20d   :  { %2946 = vmatprep.subr.mxu1 %v667_v61  ;;  %3017 = vmatprep.subr.mxu0 %v669_v62  ;;  %v3472_v15 = vrot.slane %v3465_v3, %v6812_v48  ;;  %v3493_v18 = vrot.slane %v3486_v4, %v6812_v48  ;;  %v735_v61 = vld [vmem:[#allocation12 + $0xfc8] sm:$0xff]  ;;  %v737_v62 = vld [vmem:[#allocation12 + $0xfd8] sm:$0xff] }
 0x20e   :  { %2947 = vmatpush1.msra.mxu1 %v666_v0  ;;  %3018 = vmatpush1.msra.mxu0 %v668_v2  ;;  %v734_v0 = vld [vmem:[#allocation12 + $0xfc0] sm:$0xff]  ;;  %v736_v2 = vld [vmem:[#allocation12 + $0xfd0] sm:$0xff] }
 0x20f   :  { %2948 = vmatprep.subr.mxu1 %v603_v5  ;;  %3019 = vmatprep.subr.mxu0 %v605_v6  ;;  %v3479_v23 = vrot.slane %v3472_v15, %v6812_v48  ;;  %v4117_v26 = vcombine.high %v3472_v15, %v3472_v15  ;;  %v3500_v27 = vrot.slane %v3493_v18, %v6812_v48  ;;  %v670_v15 = vld [vmem:[#allocation12 + $0xdc0] sm:$0xff] }
 0x210   :  { %2949 = vmatpush1.msra.mxu1 %v602_v7  ;;  %3020 = vmatpush1.msra.mxu0 %v604_v14  ;;  %v4129_v30 = vcombine.high %v3493_v18, %v3493_v18  ;;  %v671_v7 = vld [vmem:[#allocation12 + $0xdc8] sm:$0xff]  ;;  %v673_v14 = vld [vmem:[#allocation12 + $0xdd8] sm:$0xff]  ;;  %v672_v18 = vld [vmem:[#allocation12 + $0xdd0] sm:$0xff] }
 0x211   :  { %2950 = vmatprep.subr.mxu1 %v539_v19  ;;  %3021 = vmatprep.subr.mxu0 %v541_v20  ;;  %3482 = vst.msk [vmem:[#allocation2 + $0x2] ss:$8 sm:$0x3] %vm6821_vm3, %v3479_v23  ;;  %v4124_v33 = vrot.slane %v4117_v26, %v6812_v48  ;;  %3503 = vst.msk [vmem:[#allocation2 + $0x3] ss:$8 sm:$0x3] %vm6821_vm3, %v3500_v27 }
 0x212   :  { %2951 = vmatpush1.msra.mxu1 %v538_v21  ;;  %3022 = vmatpush1.msra.mxu0 %v540_v22  ;;  %v4136_v36 = vrot.slane %v4129_v30, %v6812_v48  ;;  %v607_v21 = vld [vmem:[#allocation12 + $0xbc8] sm:$0xff]  ;;  %v609_v22 = vld [vmem:[#allocation12 + $0xbd8] sm:$0xff]  ;;  %v606_v23 = vld [vmem:[#allocation12 + $0xbc0] sm:$0xff] }
 0x213   :  { %2952 = vmatprep.subr.mxu1 %v475_v28  ;;  %3023 = vmatprep.subr.mxu0 %v477_v29  ;;  %4127 = vst.msk [vmem:[#allocation2 + $0x12] ss:$8 sm:$0x3] %vm6821_vm3, %v4124_v33  ;;  %v608_v26 = vld [vmem:[#allocation12 + $0xbd0] sm:$0xff]  ;;  %v543_v29 = vld [vmem:[#allocation12 + $0x9c8] sm:$0xff]  ;;  %v545_v30 = vld [vmem:[#allocation12 + $0x9d8] sm:$0xff] }
 0x214   :  { %2953 = vmatpush1.msra.mxu1 %v474_v63  ;;  %3024 = vmatpush1.msra.mxu0 %v476_v32  ;;  %4139 = vst.msk [vmem:[#allocation2 + $0x13] ss:$8 sm:$0x3] %vm6821_vm3, %v4136_v36  ;;  %v542_v63 = vld [vmem:[#allocation12 + $0x9c0] sm:$0xff]  ;;  %v544_v32 = vld [vmem:[#allocation12 + $0x9d0] sm:$0xff]  ;;  %v479_v36 = vld [vmem:[#allocation12 + $0x7c8] sm:$0xff] }
 0x215   :  { %2954 = vmatprep.subr.mxu1 %v411_v34  ;;  %3025 = vmatprep.subr.mxu0 %v413_v35 }
 0x216   :  { %2955 = vmatpush1.msra.mxu1 %v410_v37  ;;  %3026 = vmatpush1.msra.mxu0 %v412_v38  ;;  %v1432_v51 = vpop.f32.mrf.mxu1  ;;  %v1503_v13 = vpop.f32.mrf.mxu0  ;;  %v481_v37 = vld [vmem:[#allocation12 + $0x7d8] sm:$0xff] }
 0x217   :  { %2956 = vmatprep.subr.mxu1 %v347_v41  ;;  %3027 = vmatprep.subr.mxu0 %v349_v42  ;;  %v1433_v53 = vadd.f32 %v1432_v51, %v793_v39  ;;  %v1504_v55 = vadd.f32 %v1503_v13, %v801_v40  ;;  %v478_v39 = vld [vmem:[#allocation12 + $0x7c0] sm:$0xff]  ;;  %v480_v40 = vld [vmem:[#allocation12 + $0x7d0] sm:$0xff]  ;;  %v415_v42 = vld [vmem:[#allocation12 + $0x5c8] sm:$0xff] }
 0x218   :  { %2957 = vmatpush1.msra.mxu1 %v346_v44  ;;  %3028 = vmatpush1.msra.mxu0 %v348_v45  ;;  %v1434_v57 = vpop.f32.mrf.mxu1  ;;  %v1505_v58 = vpop.f32.mrf.mxu0  ;;  %v417_v44 = vld [vmem:[#allocation12 + $0x5d8] sm:$0xff]  ;;  %v351_v51 = vld [vmem:[#allocation12 + $0x3c8] sm:$0xff] }
 0x219   :  { %2958 = vmatprep.subr.mxu1 %v283_v49  ;;  %3029 = vmatprep.subr.mxu0 %v285_v50  ;;  %v1435_v59 = vadd.f32 %v1434_v57, %v797_v46  ;;  %v1506_v60 = vadd.f32 %v1505_v58, %v805_v47  ;;  %v3362_v3 = vmax.f32 %v1433_v53, 0.0  ;;  %v3364_v4 = vmax.f32 %v1504_v55, 0.0  ;;  %v414_v46 = vld [vmem:[#allocation12 + $0x5c0] sm:$0xff]  ;;  %v416_v47 = vld [vmem:[#allocation12 + $0x5d0] sm:$0xff]  ;;  %v353_v13 = vld [vmem:[#allocation12 + $0x3d8] sm:$0xff] }
 0x21a   :  { %2959 = vmatpush1.msra.mxu1 %v282_v52  ;;  %2992 = vmatprep.mubr.f32.mxu1 %v9365_v1  ;;  %v809_v49 = vrot.slane %v6867_v31, %v6826_v11  ;;  %v817_v50 = vrot.slane %v6867_v31, %v6829_v12  ;;  %v350_v52 = vld [vmem:[#allocation12 + $0x3c0] sm:$0xff]  ;;  %v352_v53 = vld [vmem:[#allocation12 + $0x3d0] sm:$0xff]  ;;  %v813_v55 = vrot.slane %v6867_v31, %v6834_v24  ;;  %v287_v57 = vld [vmem:[#allocation12 + $0x1c8] sm:$0xff] }
 0x21b   :  { %3030 = vmatpush1.msra.mxu0 %v284_v56  ;;  %3063 = vmatprep.mubr.f32.mxu0 %v9365_v1  ;;  %v3363_v5 = vmax.f32 %v1435_v59, 0.0  ;;  %v3365_v6 = vmax.f32 %v1506_v60, 0.0  ;;  %v821_v56 = vrot.slane %v6867_v31, %v6837_v25  ;;  %v289_v58 = vld [vmem:[#allocation12 + $0x1d8] sm:$0xff] }
 0x21c   :  { %6303 = vmatmul.mubr.msk.f32.vlgmr.msra.gmra.mxu1 %vm1078_vm2, %v6718_v43  ;;  %6304 = vmatmul.mubr.msk.f32.vlgmr.msra.gmra.mxu0 %vm1078_vm2, %v6718_v43 }
 0x21d   :  { %3086 = vmatprep.subr.mxu1 %v735_v61  ;;  %3157 = vmatprep.subr.mxu0 %v737_v62  ;;  %v3507_v19 = vcombine.low %v3362_v3, %v3363_v5  ;;  %v3528_v20 = vcombine.low %v3364_v4, %v3365_v6  ;;  %v286_v61 = vld [vmem:[#allocation12 + $0x1c0] sm:$0xff]  ;;  %v739_v6 = vld [vmem:[#allocation12 + $0xfe8] sm:$0xff] }
 0x21e   :  { %3087 = vmatpush1.msra.mxu1 %v734_v0  ;;  %3158 = vmatpush1.msra.mxu0 %v736_v2  ;;  %v288_v2 = vld [vmem:[#allocation12 + $0x1d0] sm:$0xff] }
 0x21f   :  { %3088 = vmatprep.subr.mxu1 %v671_v7  ;;  %3159 = vmatprep.subr.mxu0 %v673_v14  ;;  %v3514_v27 = vrot.slane %v3507_v19, %v6812_v48  ;;  %v3535_v28 = vrot.slane %v3528_v20, %v6812_v48  ;;  %v741_v7 = vld [vmem:[#allocation12 + $0xff8] sm:$0xff]  ;;  %v738_v14 = vld [vmem:[#allocation12 + $0xfe0] sm:$0xff] }
 0x220   :  { %3089 = vmatpush1.msra.mxu1 %v670_v15  ;;  %3160 = vmatpush1.msra.mxu0 %v672_v18  ;;  %v740_v15 = vld [vmem:[#allocation12 + $0xff0] sm:$0xff] }
 0x221   :  { %3090 = vmatprep.subr.mxu1 %v607_v21  ;;  %3161 = vmatprep.subr.mxu0 %v609_v22  ;;  %v3521_v33 = vrot.slane %v3514_v27, %v6812_v48  ;;  %v4141_v34 = vcombine.high %v3514_v27, %v3514_v27  ;;  %v3542_v35 = vrot.slane %v3535_v28, %v6812_v48  ;;  %v675_v22 = vld [vmem:[#allocation12 + $0xde8] sm:$0xff]  ;;  %v676_v27 = vld [vmem:[#allocation12 + $0xdf0] sm:$0xff] }
 0x222   :  { %3091 = vmatpush1.msra.mxu1 %v606_v23  ;;  %3162 = vmatpush1.msra.mxu0 %v608_v26  ;;  %v4153_v38 = vcombine.high %v3535_v28, %v3535_v28  ;;  %v677_v23 = vld [vmem:[#allocation12 + $0xdf8] sm:$0xff]  ;;  %v674_v26 = vld [vmem:[#allocation12 + $0xde0] sm:$0xff] }
 0x223   :  { %3092 = vmatprep.subr.mxu1 %v543_v29  ;;  %3163 = vmatprep.subr.mxu0 %v545_v30  ;;  %3524 = vst.msk [vmem:[#allocation2 + $0x4] ss:$8 sm:$0x3] %vm6821_vm3, %v3521_v33  ;;  %v4148_v41 = vrot.slane %v4141_v34, %v6812_v48  ;;  %3545 = vst.msk [vmem:[#allocation2 + $0x5] ss:$8 sm:$0x3] %vm6821_vm3, %v3542_v35 }
 0x224   :  { %3093 = vmatpush1.msra.mxu1 %v542_v63  ;;  %3164 = vmatpush1.msra.mxu0 %v544_v32  ;;  %v4160_v45 = vrot.slane %v4153_v38, %v6812_v48  ;;  %v611_v30 = vld [vmem:[#allocation12 + $0xbe8] sm:$0xff]  ;;  %v613_v63 = vld [vmem:[#allocation12 + $0xbf8] sm:$0xff]  ;;  %v610_v32 = vld [vmem:[#allocation12 + $0xbe0] sm:$0xff] }
 0x225   :  { %3094 = vmatprep.subr.mxu1 %v479_v36  ;;  %3165 = vmatprep.subr.mxu0 %v481_v37  ;;  %4151 = vst.msk [vmem:[#allocation2 + $0x14] ss:$8 sm:$0x3] %vm6821_vm3, %v4148_v41  ;;  %v612_v33 = vld [vmem:[#allocation12 + $0xbf0] sm:$0xff]  ;;  %v547_v36 = vld [vmem:[#allocation12 + $0x9e8] sm:$0xff]  ;;  %v549_v37 = vld [vmem:[#allocation12 + $0x9f8] sm:$0xff] }
 0x226   :  { %3095 = vmatpush1.msra.mxu1 %v478_v39  ;;  %3166 = vmatpush1.msra.mxu0 %v480_v40  ;;  %4163 = vst.msk [vmem:[#allocation2 + $0x15] ss:$8 sm:$0x3] %vm6821_vm3, %v4160_v45  ;;  %v546_v38 = vld [vmem:[#allocation12 + $0x9e0] sm:$0xff]  ;;  %v548_v39 = vld [vmem:[#allocation12 + $0x9f0] sm:$0xff]  ;;  %v485_v45 = vld [vmem:[#allocation12 + $0x7f8] sm:$0xff] }
 0x227   :  { %3096 = vmatprep.subr.mxu1 %v415_v42  ;;  %3167 = vmatprep.subr.mxu0 %v417_v44  ;;  %v483_v44 = vld [vmem:[#allocation12 + $0x7e8] sm:$0xff] }
 0x228   :  { %3097 = vmatpush1.msra.mxu1 %v414_v46  ;;  %3168 = vmatpush1.msra.mxu0 %v416_v47  ;;  %v1574_v59 = vpop.f32.mrf.mxu1  ;;  %v1645_v60 = vpop.f32.mrf.mxu0  ;;  %v6925_v47 = vld [vmem:[#allocation13 + $0x10] sm:$0xff] }
 0x229   :  { %3098 = vmatprep.subr.mxu1 %v351_v51  ;;  %3169 = vmatprep.subr.mxu0 %v353_v13  ;;  %v1575_v62 = vadd.f32 %v1574_v59, %v809_v49  ;;  %v1646_v0 = vadd.f32 %v1645_v60, %v817_v50  ;;  %v482_v49 = vld [vmem:[#allocation12 + $0x7e0] sm:$0xff]  ;;  %v484_v50 = vld [vmem:[#allocation12 + $0x7f0] sm:$0xff]  ;;  %v419_v13 = vld [vmem:[#allocation12 + $0x5e8] sm:$0xff] }
 0x22a   :  { %3099 = vmatpush1.msra.mxu1 %v350_v52  ;;  %3170 = vmatpush1.msra.mxu0 %v352_v53  ;;  %v1576_v3 = vpop.f32.mrf.mxu1  ;;  %v1647_v4 = vpop.f32.mrf.mxu0  ;;  %v421_v52 = vld [vmem:[#allocation12 + $0x5f8] sm:$0xff]  ;;  %v355_v59 = vld [vmem:[#allocation12 + $0x3e8] sm:$0xff] }
 0x22b   :  { %3100 = vmatprep.subr.mxu1 %v287_v57  ;;  %3171 = vmatprep.subr.mxu0 %v289_v58  ;;  %v1577_v5 = vadd.f32 %v1576_v3, %v813_v55  ;;  %v1648_v31 = vadd.f32 %v1647_v4, %v821_v56  ;;  %v3366_v18 = vmax.f32 %v1575_v62, 0.0  ;;  %v3368_v19 = vmax.f32 %v1646_v0, 0.0  ;;  %v418_v55 = vld [vmem:[#allocation12 + $0x5e0] sm:$0xff]  ;;  %v420_v56 = vld [vmem:[#allocation12 + $0x5f0] sm:$0xff]  ;;  %v357_v60 = vld [vmem:[#allocation12 + $0x3f8] sm:$0xff] }
 0x22c   :  { %3101 = vmatpush1.msra.mxu1 %v286_v61  ;;  %3134 = vmatprep.mubr.f32.mxu1 %v9365_v1  ;;  %v825_v57 = vrot.slane %v6925_v47, %v6788_v9  ;;  %v833_v58 = vrot.slane %v6925_v47, %v6791_v10  ;;  %v354_v61 = vld [vmem:[#allocation12 + $0x3e0] sm:$0xff]  ;;  %v356_v62 = vld [vmem:[#allocation12 + $0x3f0] sm:$0xff]  ;;  %v829_v0 = vrot.slane %v6925_v47, %v6796_v16  ;;  %v291_v3 = vld [vmem:[#allocation12 + $0x1e8] sm:$0xff] }
 0x22d   :  { %3172 = vmatpush1.msra.mxu0 %v288_v2  ;;  %3205 = vmatprep.mubr.f32.mxu0 %v9365_v1  ;;  %v3367_v20 = vmax.f32 %v1577_v5, 0.0  ;;  %v3369_v21 = vmax.f32 %v1648_v31, 0.0  ;;  %v837_v2 = vrot.slane %v6925_v47, %v6799_v17  ;;  %v293_v4 = vld [vmem:[#allocation12 + $0x1f8] sm:$0xff] }
 0x22e   :  { %6305 = vmatmul.mubr.msk.f32.vlgmr.msra.gmra.mxu1 %vm1078_vm2, %v6718_v43  ;;  %6306 = vmatmul.mubr.msk.f32.vlgmr.msra.gmra.mxu0 %vm1078_vm2, %v6718_v43 }
 0x22f   :  { %3228 = vmatprep.subr.mxu1 %v739_v6  ;;  %3299 = vmatprep.subr.mxu0 %v741_v7  ;;  %v3549_v28 = vcombine.low %v3366_v18, %v3367_v20  ;;  %v3570_v29 = vcombine.low %v3368_v19, %v3369_v21  ;;  %v290_v6 = vld [vmem:[#allocation12 + $0x1e0] sm:$0xff] }
 0x230   :  { %3229 = vmatpush1.msra.mxu1 %v738_v14  ;;  %3300 = vmatpush1.msra.mxu0 %v740_v15  ;;  %v292_v15 = vld [vmem:[#allocation12 + $0x1f0] sm:$0xff] }
 0x231   :  { %3230 = vmatprep.subr.mxu1 %v675_v22  ;;  %3301 = vmatprep.subr.mxu0 %v677_v23  ;;  %v3556_v34 = vrot.slane %v3549_v28, %v6812_v48  ;;  %v3577_v35 = vrot.slane %v3570_v29, %v6812_v48 }
 0x232   :  { %3231 = vmatpush1.msra.mxu1 %v674_v26  ;;  %3302 = vmatpush1.msra.mxu0 %v676_v27 }
 0x233   :  { %3232 = vmatprep.subr.mxu1 %v611_v30  ;;  %3303 = vmatprep.subr.mxu0 %v613_v63  ;;  %v3563_v40 = vrot.slane %v3556_v34, %v6812_v48  ;;  %v4165_v41 = vcombine.high %v3556_v34, %v3556_v34  ;;  %v3584_v42 = vrot.slane %v3577_v35, %v6812_v48 }
 0x234   :  { %3233 = vmatpush1.msra.mxu1 %v610_v32  ;;  %3304 = vmatpush1.msra.mxu0 %v612_v33  ;;  %v4177_v46 = vcombine.high %v3577_v35, %v3577_v35 }
 0x235   :  { %3234 = vmatprep.subr.mxu1 %v547_v36  ;;  %3305 = vmatprep.subr.mxu0 %v549_v37  ;;  %3566 = vst.msk [vmem:[#allocation2 + $0x6] ss:$8 sm:$0x3] %vm6821_vm3, %v3563_v40  ;;  %v4172_v51 = vrot.slane %v4165_v41, %v6812_v48  ;;  %3587 = vst.msk [vmem:[#allocation2 + $0x7] ss:$8 sm:$0x3] %vm6821_vm3, %v3584_v42  ;;  %v849_v40 = vrot.slane %v6925_v47, %v6829_v12 }
 0x236   :  { %3235 = vmatpush1.msra.mxu1 %v546_v38  ;;  %3306 = vmatpush1.msra.mxu0 %v548_v39  ;;  %v4184_v53 = vrot.slane %v4177_v46, %v6812_v48  ;;  %v841_v39 = vrot.slane %v6925_v47, %v6826_v11  ;;  %v845_v41 = vrot.slane %v6925_v47, %v6834_v24 }
 0x237   :  { %3236 = vmatprep.subr.mxu1 %v483_v44  ;;  %3307 = vmatprep.subr.mxu0 %v485_v45  ;;  %4175 = vst.msk [vmem:[#allocation2 + $0x16] ss:$8 sm:$0x3] %vm6821_vm3, %v4172_v51  ;;  %v853_v42 = vrot.slane %v6925_v47, %v6837_v25 }
 0x238   :  { %3237 = vmatpush1.msra.mxu1 %v482_v49  ;;  %3308 = vmatpush1.msra.mxu0 %v484_v50  ;;  %4187 = vst.msk [vmem:[#allocation2 + $0x17] ss:$8 sm:$0x3] %vm6821_vm3, %v4184_v53 }
 0x239   :  { %3238 = vmatprep.subr.mxu1 %v419_v13  ;;  %3309 = vmatprep.subr.mxu0 %v421_v52 }
 0x23a   :  { %3239 = vmatpush1.msra.mxu1 %v418_v55  ;;  %3310 = vmatpush1.msra.mxu0 %v420_v56  ;;  %v1716_v5 = vpop.f32.mrf.mxu1  ;;  %v1787_v31 = vpop.f32.mrf.mxu0 }
 0x23b   :  { %3240 = vmatprep.subr.mxu1 %v355_v59  ;;  %3311 = vmatprep.subr.mxu0 %v357_v60  ;;  %v1717_v7 = vadd.f32 %v1716_v5, %v825_v57  ;;  %v1788_v14 = vadd.f32 %v1787_v31, %v833_v58 }
 0x23c   :  { %3241 = vmatpush1.msra.mxu1 %v354_v61  ;;  %3312 = vmatpush1.msra.mxu0 %v356_v62  ;;  %v1718_v18 = vpop.f32.mrf.mxu1  ;;  %v1789_v19 = vpop.f32.mrf.mxu0  ;;  %v6946_v22 = vld [vmem:[#allocation2 + $0x8] sm:$0xff]  ;;  %v4477_v23 = vld [vmem:[#allocation2] sm:$0xff] }
 0x23d   :  { %3242 = vmatprep.subr.mxu1 %v291_v3  ;;  %3313 = vmatprep.subr.mxu0 %v293_v4  ;;  %v1719_v20 = vadd.f32 %v1718_v18, %v829_v0  ;;  %v1790_v21 = vadd.f32 %v1789_v19, %v837_v2  ;;  %v3370_v26 = vmax.f32 %v1717_v7, 0.0  ;;  %v3372_v27 = vmax.f32 %v1788_v14, 0.0  ;;  %v6998_v3 = vld [vmem:[#allocation13 + $0x18] sm:$0xff] }
 0x23e   :  { %3243 = vmatpush1.msra.mxu1 %v290_v6  ;;  %3276 = vmatprep.mubr.f32.mxu1 %v9365_v1  ;;  %v857_v6 = vrot.slane %v6998_v3, %v6788_v9  ;;  %v865_v7 = vrot.slane %v6998_v3, %v6791_v10  ;;  %v869_v18 = vrot.slane %v6998_v3, %v6799_v17 }
 0x23f   :  { %3314 = vmatpush1.msra.mxu0 %v292_v15  ;;  %3347 = vmatprep.mubr.f32.mxu0 %v9365_v1  ;;  %v3371_v28 = vmax.f32 %v1719_v20, 0.0  ;;  %v3373_v29 = vmax.f32 %v1790_v21, 0.0  ;;  %v7008_v31 = vld [vmem:[#allocation2 + $0x10] sm:$0xff]  ;;  %v7022_v14 = vld [vmem:[#allocation2 + $0x18] sm:$0xff]  ;;  %v861_v15 = vrot.slane %v6998_v3, %v6796_v16 }
 0x240   :  { %6307 = vmatmul.mubr.msk.f32.vlgmr.msra.gmra.mxu1 %vm1078_vm2, %v6718_v43  ;;  %6308 = vmatmul.mubr.msk.f32.vlgmr.msra.gmra.mxu0 %vm1078_vm2, %v6718_v43 }
 0x241   :  { %v3591_v30 = vcombine.low %v3370_v26, %v3371_v28  ;;  %v3612_v63 = vcombine.low %v3372_v27, %v3373_v29  ;;  %5100 = vrot.lane.b32.xlu1 %v6946_v22, %s6607_s6  ;;  %5092 = vrot.lane.b32.xlu0 %v4477_v23, %s6607_s6 }
 0x242   :  { %5317 = vmatprep.mubr.f32.mxu0 %v9365_v1 }
 0x243   :  { %v3598_v32 = vrot.slane %v3591_v30, %v6812_v48  ;;  %v3619_v33 = vrot.slane %v3612_v63, %v6812_v48 }
 0x245   :  { %v3605_v34 = vrot.slane %v3598_v32, %v6812_v48  ;;  %v4189_v35 = vcombine.high %v3598_v32, %v3598_v32  ;;  %v3626_v36 = vrot.slane %v3619_v33, %v6812_v48  ;;  %v4201_v43 = vcombine.high %v3619_v33, %v3619_v33  ;;  %4832 = vrot.lane.b32.xlu1 %v4477_v23, %s6608_s8 }
 0x246   :  { %4840 = vrot.lane.b32.xlu0 %v6946_v22, %s6608_s8 }
 0x247   :  { %3608 = vst.msk [vmem:[#allocation2 + $0x20] ss:$8 sm:$0x3] %vm6821_vm3, %v3605_v34  ;;  %v4196_v37 = vrot.slane %v4189_v35, %v6812_v48  ;;  %3629 = vst.msk [vmem:[#allocation2 + $0x21] ss:$8 sm:$0x3] %vm6821_vm3, %v3626_v36  ;;  %v4208_v38 = vrot.slane %v4201_v43, %v6812_v48 }
 0x249   :  { %4199 = vst.msk [vmem:[#allocation2 + $0x30] ss:$8 sm:$0x3] %vm6821_vm3, %v4196_v37  ;;  %4211 = vst.msk [vmem:[#allocation2 + $0x31] ss:$8 sm:$0x3] %vm6821_vm3, %v4208_v38  ;;  %4767 = vrot.lane.b32.xlu1 %v4477_v23, %s6609_s3 }
 0x24a   :  { %4775 = vrot.lane.b32.xlu0 %v6946_v22, %s6609_s3 }
 0x24c   :  { %v1858_v44 = vpop.f32.mrf.mxu1  ;;  %v1929_v45 = vpop.f32.mrf.mxu0 }
 0x24d   :  { %v1859_v46 = vadd.f32 %v1858_v44, %v841_v39  ;;  %v1930_v49 = vadd.f32 %v1929_v45, %v849_v40  ;;  %4702 = vrot.lane.b32.xlu1 %v4477_v23, %s6610_s27  ;;  %v881_v44 = vrot.slane %v6998_v3, %v6829_v12  ;;  %v877_v45 = vrot.slane %v6998_v3, %v6834_v24 }
 0x24e   :  { %4710 = vrot.lane.b32.xlu0 %v6946_v22, %s6610_s27  ;;  %v1860_v50 = vpop.f32.mrf.mxu1  ;;  %v1931_v51 = vpop.f32.mrf.mxu0 }
 0x24f   :  { %v1861_v13 = vadd.f32 %v1860_v50, %v845_v41  ;;  %v1932_v52 = vadd.f32 %v1931_v51, %v853_v42  ;;  %v3374_v53 = vmax.f32 %v1859_v46, 0.0  ;;  %v3376_v55 = vmax.f32 %v1930_v49, 0.0 }
 0x250   :  { %v873_v42 = vrot.slane %v6998_v3, %v6826_v11  ;;  %v885_v46 = vrot.slane %v6998_v3, %v6837_v25 }
 0x251   :  { %v3375_v56 = vmax.f32 %v1861_v13, 0.0  ;;  %v3377_v57 = vmax.f32 %v1932_v52, 0.0  ;;  %4635 = vrot.lane.b32.xlu1 %v4477_v23, %s6611_s11 }
 0x252   :  { %4643 = vrot.lane.b32.xlu0 %v6946_v22, %s6611_s11 }
 0x253   :  { %v3633_v47 = vcombine.low %v3374_v53, %v3375_v56  ;;  %v3654_v58 = vcombine.low %v3376_v55, %v3377_v57 }
 0x255   :  { %v3640_v59 = vrot.slane %v3633_v47, %v6812_v48  ;;  %v3661_v60 = vrot.slane %v3654_v58, %v6812_v48  ;;  %5035 = vrot.lane.b32.xlu1 %v6946_v22, %s6612_s5 }
 0x256   :  { %5027 = vrot.lane.b32.xlu0 %v4477_v23, %s6612_s5 }
 0x257   :  { %v3647_v61 = vrot.slane %v3640_v59, %v6812_v48  ;;  %v4213_v62 = vcombine.high %v3640_v59, %v3640_v59  ;;  %v3668_v0 = vrot.slane %v3661_v60, %v6812_v48  ;;  %v4225_v2 = vcombine.high %v3661_v60, %v3661_v60 }
 0x259   :  { %3650 = vst.msk [vmem:[#allocation2 + $0x22] ss:$8 sm:$0x3] %vm6821_vm3, %v3647_v61  ;;  %v4220_v4 = vrot.slane %v4213_v62, %v6812_v48  ;;  %3671 = vst.msk [vmem:[#allocation2 + $0x23] ss:$8 sm:$0x3] %vm6821_vm3, %v3668_v0  ;;  %v4232_v5 = vrot.slane %v4225_v2, %v6812_v48  ;;  %4970 = vrot.lane.b32.xlu1 %v6946_v22, %s6613_s28 }
 0x25a   :  { %5108 = vrot.lane.b32.xlu0 %v7008_v31, %s6607_s6 }
 0x25b   :  { %4223 = vst.msk [vmem:[#allocation2 + $0x32] ss:$8 sm:$0x3] %vm6821_vm3, %v4220_v4  ;;  %4235 = vst.msk [vmem:[#allocation2 + $0x33] ss:$8 sm:$0x3] %vm6821_vm3, %v4232_v5 }
 0x25d   :  { %4848 = vrot.lane.b32.xlu1 %v7008_v31, %s6608_s8 }
 0x25e   :  { %v2000_v19 = vpop.f32.mrf.mxu1  ;;  %v2071_v20 = vpop.f32.mrf.mxu0  ;;  %4856 = vrot.lane.b32.xlu0 %v7022_v14, %s6608_s8 }
 0x25f   :  { %v2001_v21 = vadd.f32 %v2000_v19, %v857_v6  ;;  %v2072_v22 = vadd.f32 %v2071_v20, %v865_v7  ;;  %v746_v6 = vld [vmem:[#allocation13 + $0x20] sm:$0xff] }
 0x260   :  { %v2002_v23 = vpop.f32.mrf.mxu1  ;;  %v2073_v26 = vpop.f32.mrf.mxu0  ;;  %v897_v19 = vrot.slane %v746_v6, %v6791_v10  ;;  %v893_v20 = vrot.slane %v746_v6, %v6796_v16 }
 0x261   :  { %v2003_v27 = vadd.f32 %v2002_v23, %v861_v15  ;;  %v2074_v28 = vadd.f32 %v2073_v26, %v869_v18  ;;  %4783 = vrot.lane.b32.xlu1 %v7008_v31, %s6609_s3  ;;  %v3378_v29 = vmax.f32 %v2001_v21, 0.0  ;;  %v3380_v30 = vmax.f32 %v2072_v22, 0.0 }
 0x262   :  { %4791 = vrot.lane.b32.xlu0 %v7022_v14, %s6609_s3  ;;  %v889_v18 = vrot.slane %v746_v6, %v6788_v9  ;;  %v901_v21 = vrot.slane %v746_v6, %v6799_v17 }
 0x263   :  { %v3379_v63 = vmax.f32 %v2003_v27, 0.0  ;;  %v3381_v32 = vmax.f32 %v2074_v28, 0.0 }
 0x265   :  { %v3675_v33 = vcombine.low %v3378_v29, %v3379_v63  ;;  %v3696_v34 = vcombine.low %v3380_v30, %v3381_v32  ;;  %4718 = vrot.lane.b32.xlu1 %v7008_v31, %s6610_s27 }
 0x266   :  { %4726 = vrot.lane.b32.xlu0 %v7022_v14, %s6610_s27 }
 0x267   :  { %v3682_v35 = vrot.slane %v3675_v33, %v6812_v48  ;;  %v3703_v36 = vrot.slane %v3696_v34, %v6812_v48 }
 0x269   :  { %v3689_v43 = vrot.slane %v3682_v35, %v6812_v48  ;;  %v4237_v37 = vcombine.high %v3682_v35, %v3682_v35  ;;  %v3710_v38 = vrot.slane %v3703_v36, %v6812_v48  ;;  %v4249_v39 = vcombine.high %v3703_v36, %v3703_v36  ;;  %4651 = vrot.lane.b32.xlu1 %v7008_v31, %s6611_s11 }
 0x26a   :  { %4659 = vrot.lane.b32.xlu0 %v7022_v14, %s6611_s11 }
 0x26b   :  { %3692 = vst.msk [vmem:[#allocation2 + $0x24] ss:$8 sm:$0x3] %vm6821_vm3, %v3689_v43  ;;  %v4244_v40 = vrot.slane %v4237_v37, %v6812_v48  ;;  %3713 = vst.msk [vmem:[#allocation2 + $0x25] ss:$8 sm:$0x3] %vm6821_vm3, %v3710_v38  ;;  %v4256_v41 = vrot.slane %v4249_v39, %v6812_v48 }
 0x26d   :  { %4247 = vst.msk [vmem:[#allocation2 + $0x34] ss:$8 sm:$0x3] %vm6821_vm3, %v4244_v40  ;;  %4259 = vst.msk [vmem:[#allocation2 + $0x35] ss:$8 sm:$0x3] %vm6821_vm3, %v4256_v41  ;;  %5051 = vrot.lane.b32.xlu1 %v7022_v14, %s6612_s5 }
 0x26e   :  { %5043 = vrot.lane.b32.xlu0 %v7008_v31, %s6612_s5 }
 0x270   :  { %v2142_v49 = vpop.f32.mrf.mxu1  ;;  %v2213_v50 = vpop.f32.mrf.mxu0 }
 0x271   :  { %v2143_v51 = vadd.f32 %v2142_v49, %v873_v42  ;;  %v2214_v13 = vadd.f32 %v2213_v50, %v881_v44  ;;  %v905_v50 = vrot.slane %v746_v6, %v6826_v11 }
 0x272   :  { %v2144_v52 = vpop.f32.mrf.mxu1  ;;  %v2215_v53 = vpop.f32.mrf.mxu0 }
 0x273   :  { %v2145_v55 = vadd.f32 %v2144_v52, %v877_v45  ;;  %v2216_v56 = vadd.f32 %v2215_v53, %v885_v46  ;;  %v3382_v57 = vmax.f32 %v2143_v51, 0.0  ;;  %v3384_v47 = vmax.f32 %v2214_v13, 0.0 }
 0x274   :  { %v913_v51 = vrot.slane %v746_v6, %v6829_v12  ;;  %v909_v13 = vrot.slane %v746_v6, %v6834_v24  ;;  %v917_v52 = vrot.slane %v746_v6, %v6837_v25 }
 0x275   :  { %v3383_v58 = vmax.f32 %v2145_v55, 0.0  ;;  %v3385_v59 = vmax.f32 %v2216_v56, 0.0 }
 0x277   :  { %v3717_v60 = vcombine.low %v3382_v57, %v3383_v58  ;;  %v3738_v61 = vcombine.low %v3384_v47, %v3385_v59 }
 0x279   :  { %v3724_v62 = vrot.slane %v3717_v60, %v6812_v48  ;;  %v3745_v0 = vrot.slane %v3738_v61, %v6812_v48 }
 0x27b   :  { %v3731_v2 = vrot.slane %v3724_v62, %v6812_v48  ;;  %v4261_v3 = vcombine.high %v3724_v62, %v3724_v62  ;;  %v3752_v4 = vrot.slane %v3745_v0, %v6812_v48  ;;  %v4273_v5 = vcombine.high %v3745_v0, %v3745_v0 }
 0x27d   :  { %3734 = vst.msk [vmem:[#allocation2 + $0x26] ss:$8 sm:$0x3] %vm6821_vm3, %v3731_v2  ;;  %v4268_v7 = vrot.slane %v4261_v3, %v6812_v48  ;;  %3755 = vst.msk [vmem:[#allocation2 + $0x27] ss:$8 sm:$0x3] %vm6821_vm3, %v3752_v4  ;;  %v4280_v15 = vrot.slane %v4273_v5, %v6812_v48 }
 0x27f   :  { %4271 = vst.msk [vmem:[#allocation2 + $0x36] ss:$8 sm:$0x3] %vm6821_vm3, %v4268_v7  ;;  %4283 = vst.msk [vmem:[#allocation2 + $0x37] ss:$8 sm:$0x3] %vm6821_vm3, %v4280_v15 }
 0x282   :  { %v2284_v22 = vpop.f32.mrf.mxu1  ;;  %v2355_v23 = vpop.f32.mrf.mxu0 }
 0x283   :  { %v2285_v26 = vadd.f32 %v2284_v22, %v889_v18  ;;  %v2356_v27 = vadd.f32 %v2355_v23, %v897_v19 }
 0x284   :  { %v2286_v28 = vpop.f32.mrf.mxu1  ;;  %v2357_v29 = vpop.f32.mrf.mxu0  ;;  %v7086_v30 = vld [vmem:[#allocation2 + $0x28] sm:$0xff]  ;;  %v7088_v63 = vld [vmem:[#allocation2 + $0x20] sm:$0xff] }
 0x285   :  { %v2287_v32 = vadd.f32 %v2286_v28, %v893_v20  ;;  %v2358_v33 = vadd.f32 %v2357_v29, %v901_v21  ;;  %5102 = vrot.lane.b32.xlu1 %v7086_v30, %s6607_s6  ;;  %5094 = vrot.lane.b32.xlu0 %v7088_v63, %s6607_s6  ;;  %v3386_v34 = vmax.f32 %v2285_v26, 0.0  ;;  %v3388_v35 = vmax.f32 %v2356_v27, 0.0  ;;  %v7142_v21 = vld [vmem:[#allocation13 + $0x28] sm:$0xff] }
 0x286   :  { %v7132_v5 = vld [vmem:[#allocation2 + $0x38] sm:$0xff]  ;;  %v7144_v22 = vld [vmem:[#allocation2 + $0x30] sm:$0xff]  ;;  %v921_v27 = vrot.slane %v7142_v21, %v6788_v9  ;;  %v929_v28 = vrot.slane %v7142_v21, %v6791_v10  ;;  %v925_v29 = vrot.slane %v7142_v21, %v6796_v16 }
 0x287   :  { %v3387_v36 = vmax.f32 %v2287_v32, 0.0  ;;  %v3389_v43 = vmax.f32 %v2358_v33, 0.0  ;;  %v933_v32 = vrot.slane %v7142_v21, %v6799_v17 }
 0x289   :  { %v3759_v37 = vcombine.low %v3386_v34, %v3387_v36  ;;  %v3780_v38 = vcombine.low %v3388_v35, %v3389_v43  ;;  %4834 = vrot.lane.b32.xlu1 %v7088_v63, %s6608_s8  ;;  %4842 = vrot.lane.b32.xlu0 %v7086_v30, %s6608_s8 }
 0x28b   :  { %v3766_v39 = vrot.slane %v3759_v37, %v6812_v48  ;;  %v3787_v40 = vrot.slane %v3780_v38, %v6812_v48 }
 0x28d   :  { %v3773_v41 = vrot.slane %v3766_v39, %v6812_v48  ;;  %v4285_v42 = vcombine.high %v3766_v39, %v3766_v39  ;;  %v3794_v44 = vrot.slane %v3787_v40, %v6812_v48  ;;  %v4297_v45 = vcombine.high %v3787_v40, %v3787_v40  ;;  %4769 = vrot.lane.b32.xlu1 %v7088_v63, %s6609_s3 }
 0x28e   :  { %4777 = vrot.lane.b32.xlu0 %v7086_v30, %s6609_s3 }
 0x28f   :  { %3776 = vst.msk [vmem:[#allocation2 + $0x40] ss:$8 sm:$0x3] %vm6821_vm3, %v3773_v41  ;;  %v4292_v46 = vrot.slane %v4285_v42, %v6812_v48  ;;  %3797 = vst.msk [vmem:[#allocation2 + $0x41] ss:$8 sm:$0x3] %vm6821_vm3, %v3794_v44  ;;  %v4304_v49 = vrot.slane %v4297_v45, %v6812_v48 }
 0x291   :  { %4295 = vst.msk [vmem:[#allocation2 + $0x50] ss:$8 sm:$0x3] %vm6821_vm3, %v4292_v46  ;;  %4307 = vst.msk [vmem:[#allocation2 + $0x51] ss:$8 sm:$0x3] %vm6821_vm3, %v4304_v49  ;;  %4704 = vrot.lane.b32.xlu1 %v7088_v63, %s6610_s27 }
 0x292   :  { %4712 = vrot.lane.b32.xlu0 %v7086_v30, %s6610_s27 }
 0x294   :  { %v2426_v53 = vpop.f32.mrf.mxu1  ;;  %v2497_v55 = vpop.f32.mrf.mxu0 }
 0x295   :  { %v2427_v56 = vadd.f32 %v2426_v53, %v905_v50  ;;  %v2498_v57 = vadd.f32 %v2497_v55, %v913_v51  ;;  %4637 = vrot.lane.b32.xlu1 %v7088_v63, %s6611_s11 }
 0x296   :  { %v2428_v47 = vpop.f32.mrf.mxu1  ;;  %v2499_v58 = vpop.f32.mrf.mxu0  ;;  %4645 = vrot.lane.b32.xlu0 %v7086_v30, %s6611_s11 }
 0x297   :  { %v2429_v59 = vadd.f32 %v2428_v47, %v909_v13  ;;  %v2500_v60 = vadd.f32 %v2499_v58, %v917_v52  ;;  %v3390_v61 = vmax.f32 %v2427_v56, 0.0  ;;  %v3392_v62 = vmax.f32 %v2498_v57, 0.0 }
 0x298   :  { %v937_v58 = vrot.slane %v7142_v21, %v6826_v11 }
 0x299   :  { %v3391_v0 = vmax.f32 %v2429_v59, 0.0  ;;  %v3393_v2 = vmax.f32 %v2500_v60, 0.0  ;;  %4972 = vrot.lane.b32.xlu1 %v7086_v30, %s6613_s28  ;;  %v945_v59 = vrot.slane %v7142_v21, %v6829_v12  ;;  %v941_v60 = vrot.slane %v7142_v21, %v6834_v24 }
 0x29a   :  { %5037 = vrot.lane.b32.xlu0 %v7086_v30, %s6612_s5 }
 0x29b   :  { %v3801_v3 = vcombine.low %v3390_v61, %v3391_v0  ;;  %v3822_v4 = vcombine.low %v3392_v62, %v3393_v2  ;;  %v949_v61 = vrot.slane %v7142_v21, %v6837_v25 }
 0x29d   :  { %v3808_v6 = vrot.slane %v3801_v3, %v6812_v48  ;;  %v3829_v7 = vrot.slane %v3822_v4, %v6812_v48  ;;  %4858 = vrot.lane.b32.xlu1 %v7132_v5, %s6608_s8 }
 0x29e   :  { %5029 = vrot.lane.b32.xlu0 %v7088_v63, %s6612_s5 }
 0x29f   :  { %v3815_v15 = vrot.slane %v3808_v6, %v6812_v48  ;;  %v4309_v18 = vcombine.high %v3808_v6, %v3808_v6  ;;  %v3836_v19 = vrot.slane %v3829_v7, %v6812_v48  ;;  %v4321_v20 = vcombine.high %v3829_v7, %v3829_v7 }
 0x2a1   :  { %3818 = vst.msk [vmem:[#allocation2 + $0x42] ss:$8 sm:$0x3] %vm6821_vm3, %v3815_v15  ;;  %v4316_v23 = vrot.slane %v4309_v18, %v6812_v48  ;;  %3839 = vst.msk [vmem:[#allocation2 + $0x43] ss:$8 sm:$0x3] %vm6821_vm3, %v3836_v19  ;;  %v4328_v26 = vrot.slane %v4321_v20, %v6812_v48  ;;  %4850 = vrot.lane.b32.xlu1 %v7144_v22, %s6608_s8 }
 0x2a2   :  { %4964 = vrot.lane.b32.xlu0 %v7088_v63, %s6613_s28 }
 0x2a3   :  { %4319 = vst.msk [vmem:[#allocation2 + $0x52] ss:$8 sm:$0x3] %vm6821_vm3, %v4316_v23  ;;  %4331 = vst.msk [vmem:[#allocation2 + $0x53] ss:$8 sm:$0x3] %vm6821_vm3, %v4328_v26 }
 0x2a5   :  { %4785 = vrot.lane.b32.xlu1 %v7144_v22, %s6609_s3 }
 0x2a6   :  { %v2568_v33 = vpop.f32.mrf.mxu1  ;;  %v2639_v34 = vpop.f32.mrf.mxu0  ;;  %5110 = vrot.lane.b32.xlu0 %v7144_v22, %s6607_s6 }
 0x2a7   :  { %v2569_v35 = vadd.f32 %v2568_v33, %v921_v27  ;;  %v2640_v36 = vadd.f32 %v2639_v34, %v929_v28 }
 0x2a8   :  { %v2570_v43 = vpop.f32.mrf.mxu1  ;;  %v2641_v37 = vpop.f32.mrf.mxu0 }
 0x2a9   :  { %v2571_v38 = vadd.f32 %v2570_v43, %v925_v29  ;;  %v2642_v39 = vadd.f32 %v2641_v37, %v933_v32  ;;  %4720 = vrot.lane.b32.xlu1 %v7144_v22, %s6610_s27  ;;  %v3394_v40 = vmax.f32 %v2569_v35, 0.0  ;;  %v3396_v41 = vmax.f32 %v2640_v36, 0.0 }
 0x2aa   :  { %4793 = vrot.lane.b32.xlu0 %v7132_v5, %s6609_s3 }
 0x2ab   :  { %v3395_v42 = vmax.f32 %v2571_v38, 0.0  ;;  %v3397_v44 = vmax.f32 %v2642_v39, 0.0 }
 0x2ad   :  { %v3843_v45 = vcombine.low %v3394_v40, %v3395_v42  ;;  %v3864_v46 = vcombine.low %v3396_v41, %v3397_v44  ;;  %4653 = vrot.lane.b32.xlu1 %v7144_v22, %s6611_s11  ;;  %v7230_v40 = vld [vmem:[#allocation13 + $0x30] sm:$0xff] }
 0x2ae   :  { %4728 = vrot.lane.b32.xlu0 %v7132_v5, %s6610_s27  ;;  %v953_v44 = vrot.slane %v7230_v40, %v6788_v9 }
 0x2af   :  { %v3850_v49 = vrot.slane %v3843_v45, %v6812_v48  ;;  %v3871_v50 = vrot.slane %v3864_v46, %v6812_v48  ;;  %v961_v45 = vrot.slane %v7230_v40, %v6791_v10  ;;  %v957_v46 = vrot.slane %v7230_v40, %v6796_v16 }
 0x2b1   :  { %v3857_v51 = vrot.slane %v3850_v49, %v6812_v48  ;;  %v4333_v13 = vcombine.high %v3850_v49, %v3850_v49  ;;  %v3878_v52 = vrot.slane %v3871_v50, %v6812_v48  ;;  %v4345_v53 = vcombine.high %v3871_v50, %v3871_v50  ;;  %5045 = vrot.lane.b32.xlu1 %v7144_v22, %s6612_s5 }
 0x2b2   :  { %4661 = vrot.lane.b32.xlu0 %v7132_v5, %s6611_s11  ;;  %v965_v49 = vrot.slane %v7230_v40, %v6799_v17 }
 0x2b3   :  { %3860 = vst.msk [vmem:[#allocation2 + $0x44] ss:$8 sm:$0x3] %vm6821_vm3, %v3857_v51  ;;  %v4340_v55 = vrot.slane %v4333_v13, %v6812_v48  ;;  %3881 = vst.msk [vmem:[#allocation2 + $0x45] ss:$8 sm:$0x3] %vm6821_vm3, %v3878_v52  ;;  %v4352_v56 = vrot.slane %v4345_v53, %v6812_v48  ;;  %v7194_v57 = vpop.permute.xlu1 %5100  ;;  %v7196_v47 = vpop.permute.xlu0 %5092 }
 0x2b4   :  { %9521 = vst [vmem:[#allocation30_spill] sm:$0xff] %v7196_v47 }
 0x2b5   :  { %4343 = vst.msk [vmem:[#allocation2 + $0x54] ss:$8 sm:$0x3] %vm6821_vm3, %v4340_v55  ;;  %4355 = vst.msk [vmem:[#allocation2 + $0x55] ss:$8 sm:$0x3] %vm6821_vm3, %v4352_v56  ;;  %5053 = vrot.lane.b32.xlu1 %v7132_v5, %s6612_s5 }
 0x2b6   :  { %4980 = vrot.lane.b32.xlu0 %v7144_v22, %s6613_s28 }
 0x2b7   :  { %v7214_v62 = vpop.permute.xlu1 %4832 }
 0x2b8   :  { %v2710_v0 = vpop.f32.mrf.mxu1  ;;  %v2781_v2 = vpop.f32.mrf.mxu0 }
 0x2b9   :  { %v2711_v3 = vadd.f32 %v2710_v0, %v937_v58  ;;  %v2782_v4 = vadd.f32 %v2781_v2, %v945_v59  ;;  %v7216_v6 = vpop.permute.xlu0 %4840 }
 0x2ba   :  { %v2712_v7 = vpop.f32.mrf.mxu1  ;;  %v2783_v15 = vpop.f32.mrf.mxu0 }
 0x2bb   :  { %v2713_v18 = vadd.f32 %v2712_v7, %v941_v60  ;;  %v2784_v19 = vadd.f32 %v2783_v15, %v949_v61  ;;  %v3398_v20 = vmax.f32 %v2711_v3, 0.0  ;;  %v3400_v23 = vmax.f32 %v2782_v4, 0.0  ;;  %v7218_v28 = vpop.permute.xlu1 %4767 }
 0x2bd   :  { %v3399_v26 = vmax.f32 %v2713_v18, 0.0  ;;  %v3401_v27 = vmax.f32 %v2784_v19, 0.0  ;;  %v7220_v29 = vpop.permute.xlu0 %4775 }
 0x2bf   :  { %v3885_v21 = vcombine.low %v3398_v20, %v3399_v26  ;;  %v3906_v32 = vcombine.low %v3400_v23, %v3401_v27  ;;  %v7226_v38 = vpop.permute.xlu1 %4702 }
 0x2c1   :  { %v3892_v33 = vrot.slane %v3885_v21, %v6812_v48  ;;  %v3913_v34 = vrot.slane %v3906_v32, %v6812_v48  ;;  %v7228_v39 = vpop.permute.xlu0 %4710 }
 0x2c3   :  { %v3899_v35 = vrot.slane %v3892_v33, %v6812_v48  ;;  %v4357_v36 = vcombine.high %v3892_v33, %v3892_v33  ;;  %v3920_v43 = vrot.slane %v3913_v34, %v6812_v48  ;;  %v4369_v37 = vcombine.high %v3913_v34, %v3913_v34  ;;  %v7250_v50 = vpop.permute.xlu1 %4635 }
 0x2c5   :  { %3902 = vst.msk [vmem:[#allocation2 + $0x46] ss:$8 sm:$0x3] %vm6821_vm3, %v3899_v35  ;;  %v4364_v41 = vrot.slane %v4357_v36, %v6812_v48  ;;  %3923 = vst.msk [vmem:[#allocation2 + $0x47] ss:$8 sm:$0x3] %vm6821_vm3, %v3920_v43  ;;  %v4376_v42 = vrot.slane %v4369_v37, %v6812_v48  ;;  %v7252_v51 = vpop.permute.xlu0 %4643  ;;  %v969_v37 = vrot.slane %v7230_v40, %v6826_v11 }
 0x2c7   :  { %4367 = vst.msk [vmem:[#allocation2 + $0x56] ss:$8 sm:$0x3] %vm6821_vm3, %v4364_v41  ;;  %4379 = vst.msk [vmem:[#allocation2 + $0x57] ss:$8 sm:$0x3] %vm6821_vm3, %v4376_v42  ;;  %v7262_v15 = vpop.permute.xlu1 %5035  ;;  %v977_v41 = vrot.slane %v7230_v40, %v6829_v12  ;;  %v973_v42 = vrot.slane %v7230_v40, %v6834_v24 }
 0x2c8   :  { %9522 = vst [vmem:[#allocation31_spill] sm:$0xff] %v7262_v15 }
 0x2c9   :  { %v7264_v18 = vpop.permute.xlu0 %5027 }
 0x2ca   :  { %v2852_v13 = vpop.f32.mrf.mxu1  ;;  %v2923_v52 = vpop.f32.mrf.mxu0  ;;  %9523 = vst [vmem:[#allocation32_spill] sm:$0xff] %v7264_v18 }
 0x2cb   :  { %v2853_v53 = vadd.f32 %v2852_v13, %v953_v44  ;;  %v2924_v55 = vadd.f32 %v2923_v52, %v961_v45  ;;  %v7276_v34 = vpop.permute.xlu1 %4970  ;;  %v981_v44 = vrot.slane %v7230_v40, %v6837_v25 }
 0x2cc   :  { %v2854_v56 = vpop.f32.mrf.mxu1  ;;  %v2925_v58 = vpop.f32.mrf.mxu0  ;;  %v7254_v59 = vld [vmem:[#allocation2 + $0x48] sm:$0xff]  ;;  %v7256_v60 = vld [vmem:[#allocation2 + $0x40] sm:$0xff]  ;;  %9524 = vst [vmem:[#allocation33_spill] sm:$0xff] %v7276_v34 }
 0x2cd   :  { %v2855_v61 = vadd.f32 %v2854_v56, %v957_v46  ;;  %v2926_v0 = vadd.f32 %v2925_v58, %v965_v49  ;;  %5104 = vrot.lane.b32.xlu1 %v7254_v59, %s6607_s6  ;;  %5096 = vrot.lane.b32.xlu0 %v7256_v60, %s6607_s6  ;;  %v3402_v2 = vmax.f32 %v2853_v53, 0.0  ;;  %v3404_v3 = vmax.f32 %v2924_v55, 0.0  ;;  %v7278_v35 = vpop.permute.xlu0 %5108 }
 0x2ce   :  { %9525 = vst [vmem:[#allocation34_spill] sm:$0xff] %v7278_v35 }
 0x2cf   :  { %v3403_v4 = vmax.f32 %v2855_v61, 0.0  ;;  %v3405_v7 = vmax.f32 %v2926_v0, 0.0  ;;  %v7304_v45 = vpop.permute.xlu1 %4848 }
 0x2d1   :  { %v3927_v19 = vcombine.low %v3402_v2, %v3403_v4  ;;  %v3948_v20 = vcombine.low %v3404_v3, %v3405_v7  ;;  %4836 = vrot.lane.b32.xlu1 %v7256_v60, %s6608_s8  ;;  %4844 = vrot.lane.b32.xlu0 %v7254_v59, %s6608_s8  ;;  %v7306_v46 = vpop.permute.xlu0 %4856 }
 0x2d3   :  { %v3934_v23 = vrot.slane %v3927_v19, %v6812_v48  ;;  %v3955_v26 = vrot.slane %v3948_v20, %v6812_v48  ;;  %v7312_v4 = vpop.permute.xlu1 %4783 }
 0x2d5   :  { %v3941_v27 = vrot.slane %v3934_v23, %v6812_v48  ;;  %v4381_v21 = vcombine.high %v3934_v23, %v3934_v23  ;;  %v3962_v32 = vrot.slane %v3955_v26, %v6812_v48  ;;  %v4393_v33 = vcombine.high %v3955_v26, %v3955_v26  ;;  %4771 = vrot.lane.b32.xlu1 %v7256_v60, %s6609_s3  ;;  %v7314_v7 = vpop.permute.xlu0 %4791  ;;  %v7320_v23 = vld [vmem:[#allocation2 + $0x58] sm:$0xff] }
 0x2d6   :  { %4779 = vrot.lane.b32.xlu0 %v7254_v59, %s6609_s3 }
 0x2d7   :  { %3944 = vst.msk [vmem:[#allocation2 + $0x60] ss:$8 sm:$0x3] %vm6821_vm3, %v3941_v27  ;;  %v4388_v36 = vrot.slane %v4381_v21, %v6812_v48  ;;  %3965 = vst.msk [vmem:[#allocation2 + $0x61] ss:$8 sm:$0x3] %vm6821_vm3, %v3962_v32  ;;  %v4400_v43 = vrot.slane %v4393_v33, %v6812_v48 }
 0x2d9   :  { %4391 = vst.msk [vmem:[#allocation2 + $0x70] ss:$8 sm:$0x3] %vm6821_vm3, %v4388_v36  ;;  %4403 = vst.msk [vmem:[#allocation2 + $0x71] ss:$8 sm:$0x3] %vm6821_vm3, %v4400_v43  ;;  %4706 = vrot.lane.b32.xlu1 %v7256_v60, %s6610_s27  ;;  %v7330_v43 = vpop.permute.xlu1 %4718 }
 0x2da   :  { %4714 = vrot.lane.b32.xlu0 %v7254_v59, %s6610_s27 }
 0x2dc   :  { %v2994_v49 = vpop.f32.mrf.mxu1  ;;  %v3065_v13 = vpop.f32.mrf.mxu0 }
 0x2dd   :  { %v2995_v52 = vadd.f32 %v2994_v49, %v969_v37  ;;  %v3066_v53 = vadd.f32 %v3065_v13, %v977_v41  ;;  %4639 = vrot.lane.b32.xlu1 %v7256_v60, %s6611_s11  ;;  %v7332_v37 = vpop.permute.xlu0 %4726  ;;  %v7334_v41 = vld [vmem:[#allocation13 + $0x38] sm:$0xff] }
 0x2de   :  { %v2996_v55 = vpop.f32.mrf.mxu1  ;;  %v3067_v56 = vpop.f32.mrf.mxu0  ;;  %4647 = vrot.lane.b32.xlu0 %v7254_v59, %s6611_s11  ;;  %v985_v13 = vrot.slane %v7334_v41, %v6788_v9 }
 0x2df   :  { %v2997_v58 = vadd.f32 %v2996_v55, %v973_v42  ;;  %v3068_v61 = vadd.f32 %v3067_v56, %v981_v44  ;;  %v3406_v0 = vmax.f32 %v2995_v52, 0.0  ;;  %v3408_v40 = vmax.f32 %v3066_v53, 0.0  ;;  %v7336_v42 = vld [vmem:[#allocation2 + $0x50] sm:$0xff]  ;;  %v7356_v53 = vpop.permute.xlu1 %4651 }
 0x2e0   :  { %v993_v52 = vrot.slane %v7334_v41, %v6791_v10  ;;  %v989_v56 = vrot.slane %v7334_v41, %v6796_v16 }
 0x2e1   :  { %v3407_v2 = vmax.f32 %v2997_v58, 0.0  ;;  %v3409_v3 = vmax.f32 %v3068_v61, 0.0  ;;  %4974 = vrot.lane.b32.xlu1 %v7254_v59, %s6613_s28  ;;  %v7358_v55 = vpop.permute.xlu0 %4659  ;;  %v997_v58 = vrot.slane %v7334_v41, %v6799_v17 }
 0x2e2   :  { %5039 = vrot.lane.b32.xlu0 %v7254_v59, %s6612_s5 }
 0x2e3   :  { %v3969_v19 = vcombine.low %v3406_v0, %v3407_v2  ;;  %v3990_v20 = vcombine.low %v3408_v40, %v3409_v3 }
 0x2e5   :  { %v3976_v26 = vrot.slane %v3969_v19, %v6812_v48  ;;  %v3997_v27 = vrot.slane %v3990_v20, %v6812_v48  ;;  %4860 = vrot.lane.b32.xlu1 %v7320_v23, %s6608_s8 }
 0x2e6   :  { %5031 = vrot.lane.b32.xlu0 %v7256_v60, %s6612_s5 }
 0x2e7   :  { %v3983_v21 = vrot.slane %v3976_v26, %v6812_v48  ;;  %v4405_v32 = vcombine.high %v3976_v26, %v3976_v26  ;;  %v4004_v33 = vrot.slane %v3997_v27, %v6812_v48  ;;  %v4417_v36 = vcombine.high %v3997_v27, %v3997_v27 }
 0x2e9   :  { %3986 = vst.msk [vmem:[#allocation2 + $0x62] ss:$8 sm:$0x3] %vm6821_vm3, %v3983_v21  ;;  %v4412_v44 = vrot.slane %v4405_v32, %v6812_v48  ;;  %4007 = vst.msk [vmem:[#allocation2 + $0x63] ss:$8 sm:$0x3] %vm6821_vm3, %v4004_v33  ;;  %v4424_v49 = vrot.slane %v4417_v36, %v6812_v48  ;;  %4852 = vrot.lane.b32.xlu1 %v7336_v42, %s6608_s8  ;;  %v7372_v36 = vpop.permute.xlu1 %5051 }
 0x2ea   :  { %4966 = vrot.lane.b32.xlu0 %v7256_v60, %s6613_s28  ;;  %9526 = vst [vmem:[#allocation35_spill] sm:$0xff] %v7372_v36 }
 0x2eb   :  { %4415 = vst.msk [vmem:[#allocation2 + $0x72] ss:$8 sm:$0x3] %vm6821_vm3, %v4412_v44  ;;  %4427 = vst.msk [vmem:[#allocation2 + $0x73] ss:$8 sm:$0x3] %vm6821_vm3, %v4424_v49  ;;  %v7374_v44 = vpop.permute.xlu0 %5043 }
 0x2ec   :  { %9527 = vst [vmem:[#allocation36_spill] sm:$0xff] %v7374_v44 }
 0x2ed   :  { %4787 = vrot.lane.b32.xlu1 %v7336_v42, %s6609_s3 }
 0x2ee   :  { %v3136_v61 = vpop.f32.mrf.mxu1  ;;  %v3207_v0 = vpop.f32.mrf.mxu0  ;;  %5112 = vrot.lane.b32.xlu0 %v7336_v42, %s6607_s6 }
 0x2ef   :  { %v3137_v40 = vadd.f32 %v3136_v61, %v985_v13  ;;  %v3208_v2 = vadd.f32 %v3207_v0, %v993_v52 }
 0x2f0   :  { %v3138_v3 = vpop.f32.mrf.mxu1  ;;  %v3209_v19 = vpop.f32.mrf.mxu0 }
 0x2f1   :  { %v3139_v20 = vadd.f32 %v3138_v3, %v989_v56  ;;  %v3210_v26 = vadd.f32 %v3209_v19, %v997_v58  ;;  %4722 = vrot.lane.b32.xlu1 %v7336_v42, %s6610_s27  ;;  %v3410_v27 = vmax.f32 %v3137_v40, 0.0  ;;  %v3412_v21 = vmax.f32 %v3208_v2, 0.0 }
 0x2f2   :  { %4795 = vrot.lane.b32.xlu0 %v7320_v23, %s6609_s3 }
 0x2f3   :  { %v3411_v32 = vmax.f32 %v3139_v20, 0.0  ;;  %v3413_v33 = vmax.f32 %v3210_v26, 0.0 }
 0x2f5   :  { %v4011_v49 = vcombine.low %v3410_v27, %v3411_v32  ;;  %v4032_v13 = vcombine.low %v3412_v21, %v3413_v33  ;;  %4655 = vrot.lane.b32.xlu1 %v7336_v42, %s6611_s11  ;;  %v1001_v21 = vrot.slane %v7334_v41, %v6826_v11  ;;  %v1009_v32 = vrot.slane %v7334_v41, %v6829_v12 }
 0x2f6   :  { %4730 = vrot.lane.b32.xlu0 %v7320_v23, %s6610_s27  ;;  %v1005_v33 = vrot.slane %v7334_v41, %v6834_v24 }
 0x2f7   :  { %v4018_v52 = vrot.slane %v4011_v49, %v6812_v48  ;;  %v4039_v56 = vrot.slane %v4032_v13, %v6812_v48  ;;  %v7382_v58 = vpop.permute.xlu1 %5102  ;;  %v7384_v61 = vpop.permute.xlu0 %5094  ;;  %v1013_v49 = vrot.slane %v7334_v41, %v6837_v25 }
 0x2f8   :  { %9528 = vst [vmem:[#allocation37_spill] sm:$0xff] %v7382_v58  ;;  %9529 = vst [vmem:[#allocation38_spill] sm:$0xff] %v7384_v61 }
 0x2f9   :  { %v4025_v0 = vrot.slane %v4018_v52, %v6812_v48  ;;  %v4429_v40 = vcombine.high %v4018_v52, %v4018_v52  ;;  %v4046_v2 = vrot.slane %v4039_v56, %v6812_v48  ;;  %v4441_v3 = vcombine.high %v4039_v56, %v4039_v56  ;;  %5047 = vrot.lane.b32.xlu1 %v7336_v42, %s6612_s5 }
 0x2fa   :  { %4663 = vrot.lane.b32.xlu0 %v7320_v23, %s6611_s11 }
 0x2fb   :  { %4028 = vst.msk [vmem:[#allocation2 + $0x64] ss:$8 sm:$0x3] %vm6821_vm3, %v4025_v0  ;;  %v4436_v19 = vrot.slane %v4429_v40, %v6812_v48  ;;  %4049 = vst.msk [vmem:[#allocation2 + $0x65] ss:$8 sm:$0x3] %vm6821_vm3, %v4046_v2  ;;  %v4448_v20 = vrot.slane %v4441_v3, %v6812_v48  ;;  %v7398_v26 = vpop.permute.xlu1 %4834  ;;  %v7400_v27 = vpop.permute.xlu0 %4842 }
 0x2fd   :  { %4439 = vst.msk [vmem:[#allocation2 + $0x74] ss:$8 sm:$0x3] %vm6821_vm3, %v4436_v19  ;;  %4451 = vst.msk [vmem:[#allocation2 + $0x75] ss:$8 sm:$0x3] %vm6821_vm3, %v4448_v20  ;;  %5055 = vrot.lane.b32.xlu1 %v7320_v23, %s6612_s5 }
 0x2fe   :  { %4982 = vrot.lane.b32.xlu0 %v7336_v42, %s6613_s28 }
 0x2ff   :  { %v7418_v13 = vpop.permute.xlu1 %4769 }
 0x300   :  { %9530 = vst [vmem:[#allocation39_spill] sm:$0xff] %v7418_v13  ;;  %v3278_v52 = vpop.f32.mrf.mxu1  ;;  %v3349_v56 = vpop.f32.mrf.mxu0 }
 0x301   :  { %v3279_v11 = vadd.f32 %v3278_v52, %v1001_v21  ;;  %v3350_v0 = vadd.f32 %v3349_v56, %v1009_v32  ;;  %v7420_v40 = vpop.permute.xlu0 %4777 }
 0x302   :  { %9531 = vst [vmem:[#allocation40_spill] sm:$0xff] %v7420_v40  ;;  %v3280_v2 = vpop.f32.mrf.mxu1  ;;  %v3351_v3 = vpop.f32.mrf.mxu0 }
 0x303   :  { %v3281_v19 = vadd.f32 %v3280_v2, %v1005_v33  ;;  %v3352_v20 = vadd.f32 %v3351_v3, %v1013_v49  ;;  %v3414_v1 = vmax.f32 %v3279_v11, 0.0  ;;  %v3416_v54 = vmax.f32 %v3350_v0, 0.0  ;;  %v7422_v24 = vpop.permute.xlu1 %4704 }
 0x304   :  { %9532 = vst [vmem:[#allocation41_spill] sm:$0xff] %v7422_v24 }
 0x305   :  { %v3415_v34 = vmax.f32 %v3281_v19, 0.0  ;;  %v3417_v61 = vmax.f32 %v3352_v20, 0.0  ;;  %v7424_v58 = vpop.permute.xlu0 %4712 }
 0x306   :  { %9533 = vst [vmem:[#allocation42_spill] sm:$0xff] %v7424_v58  ;;  %v7714_v58 = vld [vmem:[#allocation7 + $0x20] ss:$0 sm:$0xff] }
 0x307   :  { %v4053_v41 = vcombine.low %v3414_v1, %v3415_v34  ;;  %v4074_v13 = vcombine.low %v3416_v54, %v3417_v61  ;;  %v7430_v56 = vpop.permute.xlu1 %4637 }
 0x308   :  { %9534 = vst [vmem:[#allocation43_spill] sm:$0xff] %v7430_v56 }
 0x309   :  { %v4060_v44 = vrot.slane %v4053_v41, %v6812_v48  ;;  %v4081_v21 = vrot.slane %v4074_v13, %v6812_v48  ;;  %v7432_v11 = vpop.permute.xlu0 %4645 }
 0x30a   :  { %9535 = vst [vmem:[#allocation44_spill] sm:$0xff] %v7432_v11 }
 0x30b   :  { %v4067_v32 = vrot.slane %v4060_v44, %v6812_v48  ;;  %v4453_v52 = vcombine.high %v4060_v44, %v4060_v44  ;;  %v4088_v33 = vrot.slane %v4081_v21, %v6812_v48  ;;  %v4465_v49 = vcombine.high %v4081_v21, %v4081_v21  ;;  %v7444_v34 = vpop.permute.xlu1 %4972 }
 0x30c   :  { %9536 = vst [vmem:[#allocation45_spill] sm:$0xff] %v7444_v34 }
 0x30d   :  { %4070 = vst.msk [vmem:[#allocation2 + $0x66] ss:$8 sm:$0x3] %vm6821_vm3, %v4067_v32  ;;  %v4460_v1 = vrot.slane %v4453_v52, %v6812_v48  ;;  %4091 = vst.msk [vmem:[#allocation2 + $0x67] ss:$8 sm:$0x3] %vm6821_vm3, %v4088_v33  ;;  %v4472_v54 = vrot.slane %v4465_v49, %v6812_v48  ;;  %v7446_v44 = vpop.permute.xlu0 %5037 }
 0x30e   :  { %9537 = vst [vmem:[#allocation46_spill] sm:$0xff] %v7446_v44 }
 0x30f   :  { %4463 = vst.msk [vmem:[#allocation2 + $0x76] ss:$8 sm:$0x3] %vm6821_vm3, %v4460_v1  ;;  %4475 = vst.msk [vmem:[#allocation2 + $0x77] ss:$8 sm:$0x3] %vm6821_vm3, %v4472_v54  ;;  %v7450_v0 = vpop.permute.xlu1 %4858 }
 0x311   :  { %v7452_v2 = vpop.permute.xlu0 %5029 }
 0x312   :  { %9538 = vst [vmem:[#allocation47_spill] sm:$0xff] %v7452_v2 }
 0x313   :  { %v7458_v3 = vpop.permute.xlu1 %4850 }
 0x314   :  { %v4489_v61 = vld [vmem:[#allocation2 + $0x60] sm:$0xff]  ;;  %v4490_v13 = vld [vmem:[#allocation2 + $0x68] sm:$0xff]  ;;  %9539 = vst [vmem:[#allocation48_spill] sm:$0xff] %v7458_v3 }
 0x315   :  { %5098 = vrot.lane.b32.xlu1 %v4489_v61, %s6607_s6  ;;  %5106 = vrot.lane.b32.xlu0 %v4490_v13, %s6607_s6  ;;  %v7460_v19 = vpop.permute.xlu0 %4964 }
 0x316   :  { %9540 = vst [vmem:[#allocation49_spill] sm:$0xff] %v7460_v19  ;;  %v7476_v52 = vld [vmem:[#allocation2 + $0x78] sm:$0xff]  ;;  %v4491_v1 = vld [vmem:[#allocation2 + $0x70] sm:$0xff] }
 0x317   :  { %v7464_v20 = vpop.permute.xlu1 %4785 }
 0x318   :  { %9541 = vst [vmem:[#allocation50_spill] sm:$0xff] %v7464_v20 }
 0x319   :  { %4838 = vrot.lane.b32.xlu1 %v4489_v61, %s6608_s8  ;;  %4846 = vrot.lane.b32.xlu0 %v4490_v13, %s6608_s8  ;;  %v7466_v41 = vpop.permute.xlu0 %5110 }
 0x31a   :  { %9542 = vst [vmem:[#allocation51_spill] sm:$0xff] %v7466_v41 }
 0x31b   :  { %v7472_v21 = vpop.permute.xlu1 %4720 }
 0x31c   :  { %9543 = vst [vmem:[#allocation52_spill] sm:$0xff] %v7472_v21 }
 0x31d   :  { %4773 = vrot.lane.b32.xlu1 %v4489_v61, %s6609_s3  ;;  %4781 = vrot.lane.b32.xlu0 %v4490_v13, %s6609_s3  ;;  %v7474_v32 = vpop.permute.xlu0 %4793 }
 0x31e   :  { %9544 = vst [vmem:[#allocation53_spill] sm:$0xff] %v7474_v32 }
 0x31f   :  { %v7481_v33 = vpop.permute.xlu1 %4653 }
 0x320   :  { %9545 = vst [vmem:[#allocation54_spill] sm:$0xff] %v7481_v33 }
 0x321   :  { %4708 = vrot.lane.b32.xlu1 %v4489_v61, %s6610_s27  ;;  %4716 = vrot.lane.b32.xlu0 %v4490_v13, %s6610_s27  ;;  %v7483_v49 = vpop.permute.xlu0 %4728 }
 0x322   :  { %9546 = vst [vmem:[#allocation55_spill] sm:$0xff] %v7483_v49 }
 0x323   :  { %v7487_v54 = vpop.permute.xlu1 %5045 }
 0x324   :  { %9547 = vst [vmem:[#allocation56_spill] sm:$0xff] %v7487_v54  ;;  %v6375_v54 = vld [vmem:[#allocation2] sm:$0xff] }
 0x325   :  { %4641 = vrot.lane.b32.xlu1 %v4489_v61, %s6611_s11  ;;  %4649 = vrot.lane.b32.xlu0 %v4490_v13, %s6611_s11  ;;  %v7489_v8 = vpop.permute.xlu0 %4661 }
 0x326   :  { %9548 = vst [vmem:[#allocation57_spill] sm:$0xff] %v7489_v8 }
 0x327   :  { %v7497_v48 = vpop.permute.xlu1 %5053 }
 0x328   :  { %9549 = vst [vmem:[#allocation58_spill] sm:$0xff] %v7497_v48 }
 0x329   :  { %4976 = vrot.lane.b32.xlu1 %v4490_v13, %s6613_s28  ;;  %5041 = vrot.lane.b32.xlu0 %v4490_v13, %s6612_s5  ;;  %v7499_v33 = vpop.permute.xlu0 %4980 }
 0x32a   :  { %9550 = vst [vmem:[#allocation59_spill] sm:$0xff] %v7499_v33 }
 0x32d   :  { %4862 = vrot.lane.b32.xlu1 %v7476_v52, %s6608_s8  ;;  %5033 = vrot.lane.b32.xlu0 %v4489_v61, %s6612_s5 }
 0x331   :  { %4854 = vrot.lane.b32.xlu1 %v4491_v1, %s6608_s8  ;;  %4968 = vrot.lane.b32.xlu0 %v4489_v61, %s6613_s28 }
 0x335   :  { %4911 = vrot.lane.b32.xlu1 %v4490_v13, %s6614_s29  ;;  %5114 = vrot.lane.b32.xlu0 %v4491_v1, %s6607_s6 }
 0x339   :  { %4990 = vrot.lane.b32.xlu1 %v7320_v23, %s6613_s28  ;;  %4978 = vrot.lane.b32.xlu0 %v7008_v31, %s6613_s28 }
 0x33d   :  { %4789 = vrot.lane.b32.xlu1 %v4491_v1, %s6609_s3  ;;  %4797 = vrot.lane.b32.xlu0 %v7476_v52, %s6609_s3 }
 0x33f   :  { %v7504_v8 = vpop.permute.xlu1 %5104  ;;  %v7506_v13 = vpop.permute.xlu0 %5096 }
 0x340   :  { %9551 = vst [vmem:[#allocation60_spill] sm:$0xff] %v7504_v8  ;;  %9552 = vst [vmem:[#allocation61_spill] sm:$0xff] %v7506_v13 }
 0x341   :  { %4909 = vrot.lane.b32.xlu1 %v7254_v59, %s6614_s29  ;;  %4962 = vrot.lane.b32.xlu0 %v6375_v54, %s6613_s28 }
 0x343   :  { %v7511_v49 = vpop.permute.xlu1 %4836  ;;  %v7513_v48 = vpop.permute.xlu0 %4844 }
 0x345   :  { %4724 = vrot.lane.b32.xlu1 %v4491_v1, %s6610_s27  ;;  %4732 = vrot.lane.b32.xlu0 %v7476_v52, %s6610_s27 }
 0x347   :  { %v7518_v33 = vpop.permute.xlu1 %4771 }
 0x348   :  { %9553 = vst [vmem:[#allocation62_spill] sm:$0xff] %v7518_v33  ;;  %v7520_v21 = vpop.permute.xlu0 %4779 }
 0x349   :  { %9554 = vst [vmem:[#allocation63_spill] sm:$0xff] %v7520_v21  ;;  %4988 = vrot.lane.b32.xlu1 %v7132_v5, %s6613_s28  ;;  %4903 = vrot.lane.b32.xlu0 %v4489_v61, %s6614_s29 }
 0x34b   :  { %v7529_v59 = vpop.permute.xlu1 %4706 }
 0x34c   :  { %9555 = vst [vmem:[#allocation64_spill] sm:$0xff] %v7529_v59  ;;  %v7531_v20 = vpop.permute.xlu0 %4714 }
 0x34d   :  { %4907 = vrot.lane.b32.xlu1 %v7086_v30, %s6614_s29  ;;  %4665 = vrot.lane.b32.xlu0 %v7476_v52, %s6611_s11  ;;  %9556 = vst [vmem:[#allocation65_spill] sm:$0xff] %v7531_v20 }
 0x34f   :  { %v7536_v32 = vpop.permute.xlu1 %4639 }
 0x350   :  { %9557 = vst [vmem:[#allocation66_spill] sm:$0xff] %v7536_v32  ;;  %v7538_v19 = vpop.permute.xlu0 %4647 }
 0x351   :  { %4657 = vrot.lane.b32.xlu1 %v4491_v1, %s6611_s11  ;;  %4917 = vrot.lane.b32.xlu0 %v7336_v42, %s6614_s29  ;;  %9558 = vst [vmem:[#allocation67_spill] sm:$0xff] %v7538_v19 }
 0x353   :  { %v7547_v30 = vpop.permute.xlu1 %4974 }
 0x354   :  { %9559 = vst [vmem:[#allocation68_spill] sm:$0xff] %v7547_v30  ;;  %v7549_v61 = vpop.permute.xlu0 %5039  ;;  %v7566_v30 = vld [vmem:[#allocation2 + $0x8] sm:$0xff] }
 0x355   :  { %5049 = vrot.lane.b32.xlu1 %v4491_v1, %s6612_s5  ;;  %4901 = vrot.lane.b32.xlu0 %v7256_v60, %s6614_s29  ;;  %9560 = vst [vmem:[#allocation69_spill] sm:$0xff] %v7549_v61  ;;  %9564 = vst [vmem:[#allocation73_spill] sm:$0xff] %v7566_v30  ;;  %v4630_v61 = vld [vmem:[#allocation15 + $0x8] sm:$0xff] }
 0x356   :  { %5240 = vmatprep.mubr.f32.mxu1 %v4630_v61 }
 0x357   :  { %v7554_v42 = vpop.permute.xlu1 %4860 }
 0x358   :  { %v7556_v32 = vpop.permute.xlu0 %5031 }
 0x359   :  { %5057 = vrot.lane.b32.xlu1 %v7476_v52, %s6612_s5  ;;  %4915 = vrot.lane.b32.xlu0 %v7144_v22, %s6614_s29  ;;  %9561 = vst [vmem:[#allocation70_spill] sm:$0xff] %v7556_v32 }
 0x35b   :  { %v7562_v22 = vpop.permute.xlu1 %4852 }
 0x35c   :  { %9562 = vst [vmem:[#allocation71_spill] sm:$0xff] %v7562_v22  ;;  %v7564_v60 = vpop.permute.xlu0 %4966  ;;  %v7647_v22 = vld [vmem:[#allocation7] sm:$0xff] }
 0x35d   :  { %4986 = vrot.lane.b32.xlu1 %v7022_v14, %s6613_s28  ;;  %4984 = vrot.lane.b32.xlu0 %v4491_v1, %s6613_s28  ;;  %9563 = vst [vmem:[#allocation72_spill] sm:$0xff] %v7564_v60  ;;  %9582 = vst [vmem:[#allocation90_spill] sm:$0xff] %v7647_v22  ;;  %v7684_v3 = vrot.slane %v7647_v22, %v6799_v17  ;;  %v7704_v56 = vrot.slane %v7647_v22, %v6796_v16 }
 0x35e   :  { %v7722_v40 = vrot.slane %v7647_v22, %v6788_v9 }
 0x35f   :  { %v7575_v32 = vpop.permute.xlu1 %4787  ;;  %9588 = vst [vmem:[#allocation96_spill] sm:$0xff] %v7684_v3  ;;  %9593 = vst [vmem:[#allocation101_spill] sm:$0xff] %v7704_v56 }
 0x360   :  { %9565 = vst [vmem:[#allocation74_spill] sm:$0xff] %v7575_v32  ;;  %v7620_v32 = vld [vmem:[#allocation7 + $0x8] sm:$0xff]  ;;  %9596 = vst [vmem:[#allocation104_spill] sm:$0xff] %v7722_v40 }
 0x361   :  { %4992 = vrot.lane.b32.xlu1 %v7476_v52, %s6613_s28  ;;  %4899 = vrot.lane.b32.xlu0 %v7088_v63, %s6614_s29  ;;  %v7577_v63 = vpop.permute.xlu0 %5112  ;;  %9576 = vst [vmem:[#allocation85_spill] sm:$0xff] %v7620_v32  ;;  %v7676_v33 = vrot.slane %v7620_v32, %v6796_v16  ;;  %v7680_v21 = vrot.slane %v7620_v32, %v6788_v9 }
 0x362   :  { %9566 = vst [vmem:[#allocation75_spill] sm:$0xff] %v7577_v63 }
 0x365   :  { %4905 = vrot.lane.b32.xlu1 %v7566_v30, %s6614_s29  ;;  %4919 = vrot.lane.b32.xlu0 %v4491_v1, %s6614_s29  ;;  %v7582_v30 = vpop.permute.xlu1 %4722  ;;  %v7584_v1 = vpop.permute.xlu0 %4795 }
 0x366   :  { %9567 = vst [vmem:[#allocation76_spill] sm:$0xff] %v7582_v30  ;;  %9568 = vst [vmem:[#allocation77_spill] sm:$0xff] %v7584_v1  ;;  %v7649_v1 = vld [vmem:[#allocation7 + $0x10] sm:$0xff] }
 0x367   :  { %9583 = vst [vmem:[#allocation91_spill] sm:$0xff] %v7649_v1  ;;  %v7688_v2 = vrot.slane %v7649_v1, %v6791_v10  ;;  %v7700_v44 = vrot.slane %v7649_v1, %v6796_v16  ;;  %v7708_v11 = vrot.slane %v7649_v1, %v6788_v9  ;;  %v7742_v36 = vrot.slane %v7649_v1, %v6837_v25 }
 0x369   :  { %4927 = vrot.lane.b32.xlu1 %v7476_v52, %s6614_s29  ;;  %4913 = vrot.lane.b32.xlu0 %v7008_v31, %s6614_s29  ;;  %v7594_v31 = vpop.permute.xlu1 %4655  ;;  %v7596_v61 = vpop.permute.xlu0 %4730  ;;  %9589 = vst [vmem:[#allocation97_spill] sm:$0xff] %v7688_v2  ;;  %9592 = vst [vmem:[#allocation100_spill] sm:$0xff] %v7700_v44 }
 0x36a   :  { %9569 = vst [vmem:[#allocation78_spill] sm:$0xff] %v7594_v31  ;;  %9570 = vst [vmem:[#allocation79_spill] sm:$0xff] %v7596_v61  ;;  %v6615_v31 = vmov 0   ;;  %v9577_v61 = vlaneseq }
 0x36b   :  { %6358 = vset.pattern.permute.xlu1 %v6615_v31  ;;  %6357 = vset.pattern.permute.xlu0 %v6615_v31  ;;  %9594 = vst [vmem:[#allocation102_spill] sm:$0xff] %v7708_v11  ;;  %9599 = vst [vmem:[#allocation107_spill] sm:$0xff] %v7742_v36 }
 0x36c   :  { %v7623_v59 = vand.u32 127, %v9577_v61 }
 0x36d   :  { %4925 = vrot.lane.b32.xlu1 %v7320_v23, %s6614_s29  ;;  %4897 = vrot.lane.b32.xlu0 %v6375_v54, %s6614_s29  ;;  %v5157_v54 = vld [vmem:[%s9359_s7] sm:$0xff]  ;;  %v7608_v60 = vpop.permute.xlu1 %5047 }
 0x36e   :  { %9571 = vst [vmem:[#allocation80_spill] sm:$0xff] %v7608_v60  ;;  %vm4864_vm4 = vcmp.lt.s32.totalorder %v7623_v59, 1  ;;  %vm4669_vm5 = vcmp.lt.s32.totalorder %v7623_v59, 17  ;;  %vm4734_vm6 = vcmp.lt.s32.totalorder %v7623_v59, 16  ;;  %vm4799_vm7 = vcmp.lt.s32.totalorder %v7623_v59, 15 }
 0x36f   :  { %vm5059_vm8 = vcmp.lt.s32.totalorder %v7623_v59, 112  ;;  %vm5124_vm9 = vcmp.lt.s32.totalorder %v7623_v59, 111  ;;  %v4678_v63 = vsel %vm4669_vm5, %v7250_v50, %v7252_v51  ;;  %v4869_v36 = vsel %vm4864_vm4, %v7216_v6, %v7304_v45 }
 0x370   :  { %vm4994_vm10 = vcmp.lt.s32.totalorder %v7623_v59, 113  ;;  %vm4929_vm12 = vcmp.lt.s32.totalorder %v7623_v59, 127 }
 0x371   :  { %4921 = vrot.lane.b32.xlu1 %v7022_v14, %s6614_s29  ;;  %4923 = vrot.lane.b32.xlu0 %v7132_v5, %s6614_s29 }
 0x375   :  { %5120 = vrot.lane.b32.xlu1 %v7320_v23, %s6607_s6  ;;  %5122 = vrot.lane.b32.xlu0 %v7476_v52, %s6607_s6  ;;  %v5158_v23 = vld [vmem:[%s9359_s7 + $0x8] sm:$0xff]  ;;  %v7610_v52 = vpop.permute.xlu0 %4663 }
 0x376   :  { %9572 = vst [vmem:[#allocation81_spill] sm:$0xff] %v7610_v52 }
 0x379   :  { %5116 = vrot.lane.b32.xlu1 %v7022_v14, %s6607_s6  ;;  %5118 = vrot.lane.b32.xlu0 %v7132_v5, %s6607_s6  ;;  %v7612_v14 = vpop.permute.xlu1 %5055  ;;  %v7614_v5 = vpop.permute.xlu0 %4982 }
 0x37a   :  { %9573 = vst [vmem:[#allocation82_spill] sm:$0xff] %v7612_v14  ;;  %9574 = vst [vmem:[#allocation83_spill] sm:$0xff] %v7614_v5 }
 0x37d   :  { %5161 = vperm.xlu1 %6358, %v5157_v54   ;;  %5166 = vperm.xlu0 %6357, %v5158_v23   ;;  %v7632_v54 = vrot.slane %v7620_v32, %v6799_v17 }
 0x37f   :  { %9579 = vst [vmem:[#allocation87_spill] sm:$0xff] %v7632_v54 }
 0x387   :  { %v7616_v30 = vpop.permute.xlu1 %5098  ;;  %v7618_v19 = vpop.permute.xlu0 %5106 }
 0x388   :  { %9575 = vst [vmem:[#allocation84_spill] sm:$0xff] %v7616_v30 }
 0x38b   :  { %v7626_v60 = vpop.permute.xlu1 %4838  ;;  %v7628_v31 = vpop.permute.xlu0 %4846 }
 0x38c   :  { %9578 = vst [vmem:[#allocation86_spill] sm:$0xff] %v7628_v31  ;;  %v4876_v23 = vsel %vm4864_vm4, %v7626_v60, %v7628_v31  ;;  %v7653_v31 = vld [vmem:[#allocation7 + $0x18] sm:$0xff] }
 0x38d   :  { %v4894_v14 = vmul.f32 %v4876_v23, %v7632_v54  ;;  %9584 = vst [vmem:[#allocation92_spill] sm:$0xff] %v7653_v31  ;;  %v7664_v23 = vrot.slane %v7647_v22, %v6837_v25  ;;  %v7712_v24 = vrot.slane %v7653_v31, %v6791_v10  ;;  %v7726_v41 = vrot.slane %v7653_v31, %v6796_v16 }
 0x38e   :  { %v7730_v13 = vrot.slane %v7653_v31, %v6788_v9  ;;  %v7750_v9 = vrot.slane %v7620_v32, %v6837_v25 }
 0x38f   :  { %v7639_v5 = vpop.permute.xlu1 %4773  ;;  %5176 = vmatprep.subr.mxu1 %v4894_v14  ;;  %v7641_v61 = vpop.permute.xlu0 %4781  ;;  %v7660_v14 = vrot.slane %v7620_v32, %v6791_v10  ;;  %9595 = vst [vmem:[#allocation103_spill] sm:$0xff] %v7712_v24  ;;  %9597 = vst [vmem:[#allocation105_spill] sm:$0xff] %v7726_v41 }
 0x390   :  { %9598 = vst [vmem:[#allocation106_spill] sm:$0xff] %v7730_v13  ;;  %9602 = vst [vmem:[#allocation110_spill] sm:$0xff] %v7750_v9  ;;  %v4743_v13 = vsel %vm4734_vm6, %v7226_v38, %v7228_v39  ;;  %v5129_v9 = vsel %vm5124_vm9, %v7194_v57, %v7278_v35  ;;  %v7795_v35 = vrot.slane %v7620_v32, %v6829_v12 }
 0x392   :  { %9604 = vst [vmem:[#allocation112_spill] sm:$0xff] %v7795_v35 }
 0x393   :  { %v7643_v52 = vpop.permute.xlu1 %4708  ;;  %v7645_v20 = vpop.permute.xlu0 %4716 }
 0x394   :  { %9580 = vst [vmem:[#allocation88_spill] sm:$0xff] %v7643_v52  ;;  %9581 = vst [vmem:[#allocation89_spill] sm:$0xff] %v7645_v20  ;;  %v7668_v52 = vrot.slane %v7649_v1, %v6799_v17  ;;  %v7766_v1 = vrot.slane %v7653_v31, %v6837_v25  ;;  %v4877_v25 = vsel %vm4864_vm4, %v7306_v46, %v7214_v62 }
 0x396   :  { %9585 = vst [vmem:[#allocation93_spill] sm:$0xff] %v7668_v52  ;;  %9603 = vst [vmem:[#allocation111_spill] sm:$0xff] %v7766_v1  ;;  %v7815_v32 = vmul.f32 %v4869_v36, %v7668_v52  ;;  %v4881_v36 = vmul.f32 %v4877_v25, %v7684_v3  ;;  %v4812_v25 = vsel %vm4799_vm7, %v7314_v7, %v7218_v28 }
 0x397   :  { %v7670_v20 = vpop.permute.xlu1 %4641  ;;  %v7672_v34 = vpop.permute.xlu0 %4649 }
 0x398   :  { %9586 = vst [vmem:[#allocation94_spill] sm:$0xff] %v7670_v20  ;;  %9587 = vst [vmem:[#allocation95_spill] sm:$0xff] %v7672_v34  ;;  %v7692_v20 = vrot.slane %v7647_v22, %v6791_v10  ;;  %v7696_v34 = vrot.slane %v7653_v31, %v6799_v17  ;;  %v5133_v17 = vsel %vm5124_vm9, %v7196_v47, %v7194_v57 }
 0x399   :  { %v4873_v10 = vsel %vm4864_vm4, %v7214_v62, %v7216_v6  ;;  %v4808_v47 = vsel %vm4799_vm7, %v7218_v28, %v7220_v29  ;;  %v4735_v28 = vsel %vm4734_vm6, %v7330_v43, %v7332_v37 }
 0x39a   :  { %9590 = vst [vmem:[#allocation98_spill] sm:$0xff] %v7692_v20  ;;  %9591 = vst [vmem:[#allocation99_spill] sm:$0xff] %v7696_v34  ;;  %v7791_v57 = vmul.f32 %v4808_v47, %v7660_v14  ;;  %v7812_v47 = vmul.f32 %v4678_v63, %v7680_v21 }
 0x39b   :  { %v7744_v16 = vpop.permute.xlu1 %4976  ;;  %v7746_v8 = vpop.permute.xlu0 %5041 }
 0x39c   :  { %9600 = vst [vmem:[#allocation108_spill] sm:$0xff] %v7744_v16  ;;  %9601 = vst [vmem:[#allocation109_spill] sm:$0xff] %v7746_v8  ;;  %v5068_v16 = vsel %vm5059_vm8, %v7264_v18, %v7262_v15  ;;  %v7769_v8 = vmul.f32 %v7714_v58, %v5133_v17  ;;  %v7781_v15 = vrot.slane %v7647_v22, %v6829_v12  ;;  %v7783_v18 = vld [vmem:[#allocation7 + $0x28] ss:$0 sm:$0xff]  ;;  %v9631_v12 = vld [vmem:[#allocation44_spill] sm:$0xff] }
 0x39d   :  { %v4882_v17 = vmul.f32 %v4873_v10, %v7632_v54  ;;  %v7798_v6 = vmul.f32 %v5068_v16, %v7664_v23  ;;  %v4875_v22 = vsel %vm4864_vm4, %v7511_v49, %v7513_v48  ;;  %v7809_v10 = vmul.f32 %v4743_v13, %v7676_v33  ;;  %9607 = vst [vmem:[#allocation115_spill] sm:$0xff] %v7812_v47 }
 0x39e   :  { %v4879_v16 = vsel %vm4864_vm4, %v7554_v42, %v7511_v49  ;;  %v7826_v35 = vmul.f32 %v7783_v18, %v5129_v9  ;;  %v4865_v13 = vsel %vm4864_vm4, %v7304_v45, %v7306_v46  ;;  %v4874_v49 = vsel %vm4864_vm4, %v7398_v26, %v7400_v27 }
 0x39f   :  { %9605 = vst [vmem:[#allocation113_spill] sm:$0xff] %v7798_v6  ;;  %v7804_v31 = vpop.permute.xlu1 %4862  ;;  %v7806_v62 = vpop.permute.xlu0 %5033  ;;  %v4804_v9 = vsel %vm4799_vm7, %v7220_v29, %v7312_v4  ;;  %v4878_v45 = vsel %vm4864_vm4, %v7450_v0, %v7398_v26  ;;  %v4890_v46 = vmul.f32 %v4875_v22, %v7632_v54  ;;  %v4739_v29 = vsel %vm4734_vm6, %v7228_v39, %v7330_v43 }
 0x3a0   :  { %9606 = vst [vmem:[#allocation114_spill] sm:$0xff] %v7806_v62  ;;  %v4880_v6 = vsel %vm4864_vm4, %v7804_v31, %v7626_v60  ;;  %v4800_v60 = vsel %vm4799_vm7, %v7312_v4, %v7314_v7  ;;  %v4747_v4 = vsel %vm4734_vm6, %v7332_v37, %v7226_v38  ;;  %v4674_v39 = vsel %vm4669_vm5, %v7252_v51, %v7356_v53  ;;  %v9637_v62 = vld [vmem:[#allocation106_spill] sm:$0xff] }
 0x3a1   :  { %v4893_v63 = vmul.f32 %v4880_v6, %v7684_v3  ;;  %v4889_v6 = vmul.f32 %v4879_v16, %v7684_v3  ;;  %v4886_v38 = vmul.f32 %v4874_v49, %v7632_v54  ;;  %v7878_v7 = vmul.f32 %v4865_v13, %v7696_v34 }
 0x3a2   :  { %v7882_v16 = vmul.f32 %v4804_v9, %v7688_v2  ;;  %v4682_v43 = vsel %vm4669_vm5, %v7358_v55, %v7250_v50  ;;  %v4885_v37 = vmul.f32 %v4878_v45, %v7684_v3  ;;  %v4811_v51 = vsel %vm4799_vm7, %v7639_v5, %v7641_v61  ;;  %v9620_v3 = vld [vmem:[#allocation35_spill] sm:$0xff] }
 0x3a3   :  { %v7864_v26 = vpop.permute.xlu1 %4854  ;;  %5177 = vmatpush1.msra.mxu1 %v4893_v63  ;;  %v7866_v22 = vpop.permute.xlu0 %4968  ;;  %v7894_v13 = vmul.f32 %v4812_v25, %v7692_v20  ;;  %v7897_v49 = vmul.f32 %v4739_v29, %v7700_v44  ;;  %v7900_v63 = vmul.f32 %v4747_v4, %v7704_v56  ;;  %v7903_v50 = vmul.f32 %v4800_v60, %v7712_v24 }
 0x3a4   :  { %9608 = vst [vmem:[#allocation116_spill] sm:$0xff] %v7866_v22  ;;  %5178 = vmatprep.subr.mxu1 %v4890_v46  ;;  %9609 = vst [vmem:[#allocation117_spill] sm:$0xff] %v7882_v16  ;;  %v7906_v9 = vmul.f32 %v4674_v39, %v7708_v11  ;;  %v4670_v45 = vsel %vm4669_vm5, %v7356_v53, %v7358_v55  ;;  %v5136_v46 = vsel %vm5124_vm9, %v7616_v30, %v7618_v19  ;;  %v9618_v39 = vld [vmem:[#allocation60_spill] sm:$0xff]  ;;  %v9629_v22 = vld [vmem:[#allocation42_spill] sm:$0xff] }
 0x3a5   :  { %5179 = vmatpush1.msra.mxu1 %v4889_v6  ;;  %9610 = vst [vmem:[#allocation118_spill] sm:$0xff] %v7897_v49  ;;  %9611 = vst [vmem:[#allocation119_spill] sm:$0xff] %v7903_v50  ;;  %v7921_v60 = vmul.f32 %v4735_v28, %v7726_v41  ;;  %v7924_v4 = vmul.f32 %v4682_v43, %v7722_v40  ;;  %v9617_v6 = vld [vmem:[#allocation75_spill] sm:$0xff]  ;;  %v9621_v43 = vld [vmem:[#allocation36_spill] sm:$0xff]  ;;  %v7984_v11 = vmul.f32 %v4670_v45, %v9637_v62 }
 0x3a6   :  { %5180 = vmatprep.subr.mxu1 %v4886_v38  ;;  %9612 = vst [vmem:[#allocation120_spill] sm:$0xff] %v7906_v9  ;;  %v5131_v53 = vsel %vm5124_vm9, %v9618_v39, %v9617_v6  ;;  %v4829_v38 = vmul.f32 %v4811_v51, %v7660_v14  ;;  %v5060_v54 = vsel %vm5059_vm8, %v9621_v43, %v9620_v3  ;;  %v9622_v6 = vld [vmem:[#allocation61_spill] sm:$0xff]  ;;  %v9626_v9 = vld [vmem:[#allocation51_spill] sm:$0xff]  ;;  %v9642_v41 = vld [vmem:[#allocation110_spill] sm:$0xff] }
 0x3a7   :  { %v7916_v25 = vpop.permute.xlu1 %4911  ;;  %5181 = vmatpush1.msra.mxu1 %v4885_v37  ;;  %v7918_v29 = vpop.permute.xlu0 %5114  ;;  %9615 = vst [vmem:[#allocation123_spill] sm:$0xff] %v7921_v60  ;;  %9616 = vst [vmem:[#allocation124_spill] sm:$0xff] %v7924_v4  ;;  %v9619_v37 = vld [vmem:[#allocation32_spill] sm:$0xff]  ;;  %v5135_v30 = vsel %vm5124_vm9, %v9622_v6, %v9618_v39  ;;  %v5153_v39 = vmul.f32 %v7714_v58, %v5136_v46 }
 0x3a8   :  { %9613 = vst [vmem:[#allocation121_spill] sm:$0xff] %v7916_v25  ;;  %9614 = vst [vmem:[#allocation122_spill] sm:$0xff] %v7918_v29  ;;  %v5132_v55 = vsel %vm5124_vm9, %v7618_v19, %v7918_v29  ;;  %5182 = vmatprep.subr.mxu1 %v4882_v17  ;;  %v5072_v28 = vsel %vm5059_vm8, %v9620_v3, %v9619_v37  ;;  %v9623_v17 = vld [vmem:[#allocation31_spill] sm:$0xff]  ;;  %v9624_v29 = vld [vmem:[#allocation37_spill] sm:$0xff]  ;;  %v5149_v47 = vmul.f32 %v7714_v58, %v5135_v30 }
 0x3a9   :  { %5183 = vmatpush1.msra.mxu1 %v4881_v36  ;;  %v5154_v19 = vmul.f32 %v7783_v18, %v5132_v55  ;;  %v5064_v51 = vsel %vm5059_vm8, %v9623_v17, %v9621_v43  ;;  %v9625_v37 = vld [vmem:[#allocation38_spill] sm:$0xff]  ;;  %v5130_v3 = vsel %vm5124_vm9, %v9624_v29, %v9626_v9  ;;  %v9627_v36 = vld [vmem:[#allocation40_spill] sm:$0xff]  ;;  %v9628_v55 = vld [vmem:[#allocation39_spill] sm:$0xff]  ;;  %9638 = vst [vmem:[#allocation35_spill] sm:$0xff] %v7984_v11 }
 0x3aa   :  { %v5134_v25 = vsel %vm5124_vm9, %v9625_v37, %v9624_v29  ;;  %5184 = vmatprep.subr.mxu1 %v4829_v38  ;;  %v4809_v6 = vsel %vm4799_vm7, %v9628_v55, %v9627_v36  ;;  %v9630_v43 = vld [vmem:[#allocation41_spill] sm:$0xff]  ;;  %v9632_v37 = vld [vmem:[#allocation43_spill] sm:$0xff]  ;;  %v5150_v29 = vmul.f32 %v7783_v18, %v5131_v53  ;;  %v9635_v38 = vld [vmem:[#allocation46_spill] sm:$0xff]  ;;  %v7987_v16 = vmul.f32 %v5072_v28, %v7766_v1 }
 0x3ab   :  { %v4744_v17 = vsel %vm4734_vm6, %v9630_v43, %v9629_v22  ;;  %v4679_v49 = vsel %vm4669_vm5, %v9632_v37, %v9631_v12  ;;  %v7973_v60 = vpop.permute.xlu1 %4990  ;;  %5277 = vmatprep.subr.mxu0 %v5154_v19  ;;  %v7975_v46 = vpop.permute.xlu0 %4978  ;;  %v9636_v9 = vld [vmem:[#allocation47_spill] sm:$0xff]  ;;  %v5146_v53 = vmul.f32 %v7783_v18, %v5130_v3  ;;  %v7995_v50 = vmul.f32 %v5064_v51, %v9642_v41  ;;  %v9644_v18 = vld [vmem:[#allocation48_spill] sm:$0xff] }
 0x3ac   :  { %9633 = vst [vmem:[#allocation60_spill] sm:$0xff] %v7973_v60  ;;  %9634 = vst [vmem:[#allocation32_spill] sm:$0xff] %v7975_v46  ;;  %v5069_v4 = vsel %vm5059_vm8, %v9636_v9, %v9635_v38  ;;  %5278 = vmatpush1.msra.mxu0 %v5153_v39  ;;  %v9640_v60 = vld [vmem:[#allocation107_spill] sm:$0xff]  ;;  %v5145_v46 = vmul.f32 %v7714_v58, %v5134_v25  ;;  %v4868_v30 = vsel %vm4864_vm4, %v7864_v26, %v7804_v31  ;;  %v9648_v39 = vld [vmem:[#allocation49_spill] sm:$0xff] }
 0x3ad   :  { %9639 = vst [vmem:[#allocation36_spill] sm:$0xff] %v7987_v16  ;;  %v7990_v19 = vmul.f32 %v5060_v54, %v9640_v60  ;;  %5279 = vmatprep.subr.mxu0 %v5150_v29  ;;  %9643 = vst [vmem:[#allocation37_spill] sm:$0xff] %v7995_v50  ;;  %v4821_v45 = vmul.f32 %v4809_v6, %v7660_v14  ;;  %v8003_v28 = vmul.f32 %v4744_v17, %v7676_v33  ;;  %v9646_v6 = vld [vmem:[#allocation62_spill] sm:$0xff] }
 0x3ae   :  { %5280 = vmatpush1.msra.mxu0 %v5149_v47  ;;  %v8006_v54 = vmul.f32 %v4679_v49, %v7680_v21  ;;  %v8009_v58 = vmul.f32 %v5069_v4, %v7664_v23  ;;  %v4866_v25 = vsel %vm4864_vm4, %v9644_v18, %v7450_v0  ;;  %v4870_v31 = vsel %vm4864_vm4, %v7400_v27, %v9644_v18  ;;  %v9645_v47 = vld [vmem:[#allocation63_spill] sm:$0xff]  ;;  %v9647_v4 = vld [vmem:[#allocation45_spill] sm:$0xff]  ;;  %v9650_v27 = vld [vmem:[#allocation86_spill] sm:$0xff] }
 0x3af   :  { %9641 = vst [vmem:[#allocation31_spill] sm:$0xff] %v7990_v19  ;;  %v4810_v51 = vsel %vm4799_vm7, %v9646_v6, %v9645_v47  ;;  %v4790_v49 = vpop.permute.xlu1 %4789  ;;  %5281 = vmatprep.subr.mxu0 %v5146_v53  ;;  %v4798_v3 = vpop.permute.xlu0 %4797  ;;  %v5004_v17 = vsel %vm4994_vm10, %v9648_v39, %v9647_v4  ;;  %v9649_v0 = vld [vmem:[#allocation77_spill] sm:$0xff]  ;;  %v4872_v18 = vsel %vm4864_vm4, %v9650_v27, %v7864_v26  ;;  %v9651_v19 = vld [vmem:[#allocation71_spill] sm:$0xff] }
 0x3b0   :  { %v4814_v29 = vsel %vm4799_vm7, %v9649_v0, %v9646_v6  ;;  %v4815_v53 = vsel %vm4799_vm7, %v4798_v3, %v7639_v5  ;;  %5282 = vmatpush1.msra.mxu0 %v5145_v46  ;;  %v4867_v16 = vsel %vm4864_vm4, %v9651_v19, %v7554_v42  ;;  %v4896_v6 = vmul.f32 %v4868_v30, %v7696_v34  ;;  %v8045_v11 = vld [vmem:[#allocation15 + $0x10] sm:$0xff]  ;;  %v9652_v27 = vld [vmem:[#allocation53_spill] sm:$0xff] }
 0x3b1   :  { %v4828_v39 = vmul.f32 %v4815_v53, %v7692_v20  ;;  %5283 = vmatprep.subr.mxu0 %v7826_v35  ;;  %v4887_v26 = vmul.f32 %v4870_v31, %v7668_v52  ;;  %v4813_v5 = vsel %vm4799_vm7, %v9652_v27, %v9628_v55  ;;  %v4871_v42 = vsel %vm4864_vm4, %v7513_v48, %v9651_v19  ;;  %v9653_v46 = vld [vmem:[#allocation50_spill] sm:$0xff] }
 0x3b2   :  { %5284 = vmatpush1.msra.mxu0 %v7769_v8  ;;  %v4825_v35 = vmul.f32 %v4810_v51, %v7660_v14  ;;  %v4805_v30 = vsel %vm4799_vm7, %v9627_v36, %v9653_v46  ;;  %v4824_v31 = vmul.f32 %v4814_v29, %v7692_v20  ;;  %v4895_v53 = vmul.f32 %v4872_v18, %v7668_v52  ;;  %v9654_v29 = vld [vmem:[#allocation89_spill] sm:$0xff] }
 0x3b3   :  { %v8064_v50 = vpop.permute.xlu1 %4909  ;;  %5185 = vmatpush1.msra.mxu1 %v4828_v39  ;;  %5330 = vmatprep.subr.mxu0 %v4896_v6  ;;  %v8066_v55 = vpop.permute.xlu0 %4962  ;;  %v8069_v48 = vmul.f32 %v5004_v17, %v7781_v15  ;;  %v4892_v8 = vmul.f32 %v4867_v16, %v7696_v34  ;;  %v4888_v36 = vmul.f32 %v4866_v25, %v7696_v34  ;;  %v9655_v39 = vld [vmem:[#allocation88_spill] sm:$0xff] }
 0x3b4   :  { %5186 = vmatprep.subr.mxu1 %v4825_v35  ;;  %6313 = vmatmul.mubr.msk.f32.vlgmr.msra.gmra.mxu0 %vm5169_vm11, %v8045_v11  ;;  %v4820_v19 = vmul.f32 %v4813_v5, %v7692_v20  ;;  %v4891_v51 = vmul.f32 %v4871_v42, %v7668_v52  ;;  %v4746_v18 = vsel %vm4734_vm6, %v9655_v39, %v9654_v29  ;;  %v9656_v6 = vld [vmem:[#allocation52_spill] sm:$0xff]  ;;  %v9657_v5 = vld [vmem:[#allocation65_spill] sm:$0xff] }
 0x3b5   :  { %5331 = vmatpush1.msra.mxu0 %v4895_v53  ;;  %5187 = vmatpush1.msra.mxu1 %v4824_v31  ;;  %v8082_v17 = vmul.f32 %v4805_v30, %v7688_v2  ;;  %v4740_v16 = vsel %vm4734_vm6, %v9629_v22, %v9656_v6  ;;  %v4801_v25 = vsel %vm4799_vm7, %v9653_v46, %v9652_v27  ;;  %v9658_v42 = vld [vmem:[#allocation64_spill] sm:$0xff]  ;;  %v9659_v30 = vld [vmem:[#allocation79_spill] sm:$0xff] }
 0x3b6   :  { %5332 = vmatprep.subr.mxu0 %v4892_v8  ;;  %5188 = vmatprep.subr.mxu1 %v4821_v45  ;;  %v4745_v35 = vsel %vm4734_vm6, %v9658_v42, %v9657_v5  ;;  %v4749_v31 = vsel %vm4734_vm6, %v9659_v30, %v9658_v42  ;;  %v4803_v22 = vsel %vm4799_vm7, %v4790_v49, %v4798_v3  ;;  %v9660_v8 = vld [vmem:[#allocation55_spill] sm:$0xff] }
 0x3b7   :  { %5333 = vmatpush1.msra.mxu0 %v4891_v51  ;;  %v4725_v53 = vpop.permute.xlu1 %4724  ;;  %5189 = vmatpush1.msra.mxu1 %v4820_v19  ;;  %v4733_v20 = vpop.permute.xlu0 %4732  ;;  %v4807_v45 = vsel %vm4799_vm7, %v7641_v61, %v4790_v49  ;;  %v4764_v46 = vmul.f32 %v4746_v18, %v7676_v33  ;;  %v4748_v3 = vsel %vm4734_vm6, %v9660_v8, %v9630_v43  ;;  %v9661_v19 = vld [vmem:[#allocation74_spill] sm:$0xff] }
 0x3b8   :  { %5334 = vmatprep.subr.mxu0 %v4888_v36  ;;  %v4750_v27 = vsel %vm4734_vm6, %v4733_v20, %v9655_v39  ;;  %5190 = vmatprep.subr.mxu1 %v7791_v57  ;;  %v4802_v51 = vsel %vm4799_vm7, %v9661_v19, %v9649_v0  ;;  %v4806_v57 = vsel %vm4799_vm7, %v9645_v47, %v9661_v19  ;;  %v9668_v19 = vld [vmem:[#allocation66_spill] sm:$0xff] }
 0x3b9   :  { %v4763_v61 = vmul.f32 %v4750_v27, %v7704_v56  ;;  %5335 = vmatpush1.msra.mxu0 %v4887_v26  ;;  %5191 = vmatpush1.msra.mxu1 %v7894_v13  ;;  %v4831_v43 = vmul.f32 %v4803_v22, %v7712_v24  ;;  %v4760_v49 = vmul.f32 %v4745_v35, %v7676_v33  ;;  %v9663_v35 = vld [vmem:[#allocation95_spill] sm:$0xff]  ;;  %v9666_v27 = vld [vmem:[#allocation57_spill] sm:$0xff] }
 0x3ba   :  { %5336 = vmatprep.subr.mxu0 %v7878_v7  ;;  %5192 = vmatprep.subr.mxu1 %v4764_v46  ;;  %v8128_v36 = vmul.f32 %v4740_v16, %v7700_v44  ;;  %v4759_v0 = vmul.f32 %v4749_v31, %v7704_v56  ;;  %v4830_v26 = vmul.f32 %v4807_v45, %v7688_v2  ;;  %v9662_v7 = vld [vmem:[#allocation54_spill] sm:$0xff]  ;;  %v9665_v45 = vld [vmem:[#allocation56_spill] sm:$0xff] }
 0x3bb   :  { %5337 = vmatpush1.msra.mxu0 %v7815_v32  ;;  %v8133_v13 = vpop.permute.xlu1 %4988  ;;  %5193 = vmatpush1.msra.mxu1 %v4763_v61  ;;  %v8135_v47 = vpop.permute.xlu0 %4903  ;;  %v4675_v39 = vsel %vm4669_vm5, %v9631_v12, %v9662_v7  ;;  %v4827_v18 = vmul.f32 %v4802_v51, %v7712_v24  ;;  %v4823_v16 = vmul.f32 %v4801_v25, %v7712_v24  ;;  %v9664_v31 = vld [vmem:[#allocation94_spill] sm:$0xff] }
 0x3bc   :  { %5338 = vmatprep.subr.mxu0 %v4831_v43  ;;  %5194 = vmatprep.subr.mxu1 %v4760_v49  ;;  %v4755_v42 = vmul.f32 %v4748_v3, %v7704_v56  ;;  %v4826_v32 = vmul.f32 %v4806_v57, %v7688_v2  ;;  %v4681_v22 = vsel %vm4669_vm5, %v9664_v31, %v9663_v35  ;;  %v9667_v3 = vld [vmem:[#allocation67_spill] sm:$0xff] }
 0x3bd   :  { %5339 = vmatpush1.msra.mxu0 %v4830_v26  ;;  %5195 = vmatpush1.msra.mxu1 %v4759_v0  ;;  %v4736_v12 = vsel %vm4734_vm6, %v9656_v6, %v9660_v8  ;;  %v5065_v25 = vsel %vm5059_vm8, %v9635_v38, %v9665_v45  ;;  %v4671_v46 = vsel %vm4669_vm5, %v9662_v7, %v9666_v27  ;;  %v9669_v6 = vld [vmem:[#allocation81_spill] sm:$0xff]  ;;  %v9670_v0 = vld [vmem:[#allocation76_spill] sm:$0xff] }
 0x3be   :  { %5340 = vmatprep.subr.mxu0 %v4827_v18  ;;  %5196 = vmatprep.subr.mxu1 %v8003_v28  ;;  %v4680_v51 = vsel %vm4669_vm5, %v9668_v19, %v9667_v3  ;;  %v4684_v8 = vsel %vm4669_vm5, %v9669_v6, %v9668_v19  ;;  %v4738_v38 = vsel %vm4734_vm6, %v4725_v53, %v4733_v20 }
 0x3bf   :  { %5341 = vmatpush1.msra.mxu0 %v4826_v32  ;;  %v8172_v61 = vpop.permute.xlu1 %4907  ;;  %5197 = vmatpush1.msra.mxu1 %v4755_v42  ;;  %v4666_v57 = vpop.permute.xlu0 %4665  ;;  %v4742_v28 = vsel %vm4734_vm6, %v9654_v29, %v4725_v53  ;;  %v4699_v49 = vmul.f32 %v4681_v22, %v7680_v21  ;;  %v4683_v20 = vsel %vm4669_vm5, %v9666_v27, %v9632_v37  ;;  %v9671_v53 = vld [vmem:[#allocation119_spill] sm:$0xff]  ;;  %v9672_v37 = vld [vmem:[#allocation105_spill] sm:$0xff] }
 0x3c0   :  { %5342 = vmatprep.subr.mxu0 %v4823_v16  ;;  %v4685_v43 = vsel %vm4669_vm5, %v4666_v57, %v9664_v31  ;;  %5198 = vmatprep.subr.mxu1 %v7809_v10  ;;  %v4737_v26 = vsel %vm4734_vm6, %v9670_v0, %v9659_v30  ;;  %v4741_v10 = vsel %vm4734_vm6, %v9657_v5, %v9670_v0  ;;  %v9673_v16 = vld [vmem:[#allocation58_spill] sm:$0xff]  ;;  %v9674_v42 = vld [vmem:[#allocation117_spill] sm:$0xff] }
 0x3c1   :  { %v4698_v29 = vmul.f32 %v4685_v43, %v7722_v40  ;;  %5343 = vmatpush1.msra.mxu0 %v8082_v17  ;;  %5199 = vmatpush1.msra.mxu1 %v7900_v63  ;;  %v4766_v7 = vmul.f32 %v4738_v38, %v9672_v37  ;;  %v4695_v18 = vmul.f32 %v4680_v51, %v7680_v21  ;;  %v9675_v31 = vld [vmem:[#allocation102_spill] sm:$0xff] }
 0x3c2   :  { %5344 = vmatprep.subr.mxu0 %v9671_v53  ;;  %5200 = vmatprep.subr.mxu1 %v4699_v49  ;;  %v5061_v30 = vsel %vm5059_vm8, %v9665_v45, %v9673_v16  ;;  %v4694_v17 = vmul.f32 %v4684_v8, %v7722_v40  ;;  %v4765_v63 = vmul.f32 %v4742_v28, %v7700_v44  ;;  %v9676_v28 = vld [vmem:[#allocation59_spill] sm:$0xff]  ;;  %v9677_v49 = vld [vmem:[#allocation109_spill] sm:$0xff]  ;;  %v9682_v53 = vld [vmem:[#allocation70_spill] sm:$0xff] }
 0x3c3   :  { %5345 = vmatpush1.msra.mxu0 %v9674_v42  ;;  %v4658_v32 = vpop.permute.xlu1 %4657  ;;  %5201 = vmatpush1.msra.mxu1 %v4698_v29  ;;  %v8207_v5 = vpop.permute.xlu0 %4917  ;;  %v8210_v22 = vmul.f32 %v4675_v39, %v9675_v31  ;;  %v4762_v27 = vmul.f32 %v4737_v26, %v9672_v37  ;;  %v4758_v19 = vmul.f32 %v4736_v12, %v9672_v37  ;;  %v9685_v42 = vld [vmem:[#allocation123_spill] sm:$0xff] }
 0x3c4   :  { %5346 = vmatprep.subr.mxu0 %v4766_v7  ;;  %5202 = vmatprep.subr.mxu1 %v4695_v18  ;;  %v4690_v45 = vmul.f32 %v4683_v20, %v7722_v40  ;;  %v4761_v51 = vmul.f32 %v4741_v10, %v7700_v44  ;;  %v5081_v8 = vmul.f32 %v5065_v25, %v9642_v41  ;;  %v9678_v25 = vld [vmem:[#allocation114_spill] sm:$0xff] }
 0x3c5   :  { %5347 = vmatpush1.msra.mxu0 %v4765_v63  ;;  %5203 = vmatpush1.msra.mxu1 %v4694_v17  ;;  %v5073_v39 = vsel %vm5059_vm8, %v9673_v16, %v9636_v9  ;;  %v8222_v38 = vmul.f32 %v5061_v30, %v9640_v60  ;;  %v4693_v12 = vmul.f32 %v4671_v46, %v9637_v62  ;;  %v9680_v46 = vld [vmem:[#allocation69_spill] sm:$0xff]  ;;  %v9683_v18 = vld [vmem:[#allocation78_spill] sm:$0xff] }
 0x3c6   :  { %5348 = vmatprep.subr.mxu0 %v4762_v27  ;;  %5204 = vmatprep.subr.mxu1 %v8006_v54  ;;  %v5000_v43 = vsel %vm4994_vm10, %v9647_v4, %v9676_v28  ;;  %v5071_v20 = vsel %vm5059_vm8, %v9678_v25, %v9677_v49  ;;  %v4673_v9 = vsel %vm4669_vm5, %v4658_v32, %v4666_v57  ;;  %v9679_v54 = vld [vmem:[#allocation80_spill] sm:$0xff]  ;;  %v9681_v57 = vld [vmem:[#allocation115_spill] sm:$0xff]  ;;  %v9686_v27 = vmov 0.0  }
 0x3c7   :  { %5349 = vmatpush1.msra.mxu0 %v4761_v51  ;;  %v5050_v0 = vpop.permute.xlu1 %5049  ;;  %5205 = vmatpush1.msra.mxu1 %v4690_v45  ;;  %v8236_v26 = vpop.permute.xlu0 %4901  ;;  %v5066_v29 = vsel %vm5059_vm8, %v9680_v46, %v9679_v54  ;;  %v4677_v4 = vsel %vm4669_vm5, %v9663_v35, %v4658_v32  ;;  %v5070_v7 = vsel %vm5059_vm8, %v9682_v53, %v9680_v46  ;;  %v9684_v35 = vld [vmem:[#allocation124_spill] sm:$0xff]  ;;  %v9689_v46 = vld [vmem:[#allocation91_spill] sm:$0xff] }
 0x3c8   :  { %v5067_v10 = vsel %vm5059_vm8, %v9677_v49, %v5050_v0  ;;  %5350 = vmatprep.subr.mxu0 %v4758_v19  ;;  %5206 = vmatprep.subr.mxu1 %v9681_v57  ;;  %v4672_v16 = vsel %vm4669_vm5, %v9683_v18, %v9669_v6  ;;  %v4676_v17 = vsel %vm4669_vm5, %v9667_v3, %v9683_v18  ;;  %v9691_v57 = vld [vmem:[#allocation112_spill] sm:$0xff] }
 0x3c9   :  { %5351 = vmatpush1.msra.mxu0 %v8128_v36  ;;  %5207 = vmatpush1.msra.mxu1 %v9684_v35  ;;  %v5089_v30 = vmul.f32 %v5067_v10, %v9642_v41  ;;  %v5088_v63 = vmul.f32 %v5071_v20, %v7664_v23  ;;  %v4701_v32 = vmul.f32 %v4673_v9, %v9637_v62  ;;  %v9687_v36 = vld [vmem:[#allocation118_spill] sm:$0xff]  ;;  %v9688_v20 = vld [vmem:[#allocation28_spill] sm:$0xff]  ;;  %v9694_v35 = vld [vmem:[#allocation83_spill] sm:$0xff] }
 0x3ca   :  { %5352 = vmatprep.subr.mxu0 %v9685_v42  ;;  %5323 = vmatprep.mubr.f32.mxu0 %v9686_v27  ;;  %v4700_v6 = vmul.f32 %v4677_v4, %v9675_v31  ;;  %v5085_v51 = vmul.f32 %v5066_v29, %v9642_v41  ;;  %v8274_v3 = vmul.f32 %v5073_v39, %v7766_v1  ;;  %v9692_v29 = vld [vmem:[#allocation92_spill] sm:$0xff]  ;;  %v9696_v42 = vld [vmem:[#allocation29_spill] sm:$0xff] }
 0x3cb   :  { %5353 = vmatpush1.msra.mxu0 %v9687_v36  ;;  %v5058_v19 = vpop.permute.xlu1 %5057  ;;  %5208 = vmatprep.subr.mxu1 %v5089_v30  ;;  %v8270_v45 = vpop.permute.xlu0 %4915  ;;  %v5084_v49 = vmul.f32 %v5070_v7, %v7664_v23  ;;  %v8279_v9 = vrot.slane %v9689_v46, %v9688_v20  ;;  %v4697_v4 = vmul.f32 %v4672_v16, %v9637_v62  ;;  %v9695_v7 = vld [vmem:[#allocation68_spill] sm:$0xff]  ;;  %v9698_v16 = vld [vmem:[#allocation85_spill] sm:$0xff] }
 0x3cc   :  { %5354 = vmatprep.subr.mxu0 %v4701_v32  ;;  %5209 = vmatpush2.msra.mxu1 %v5088_v63  ;;  %v4696_v10 = vmul.f32 %v4676_v17, %v9675_v31  ;;  %v5016_v18 = vmul.f32 %v5000_v43, %v9691_v57  ;;  %v8286_v39 = vrot.slane %v9692_v29, %v9688_v20  ;;  %v9697_v32 = vld [vmem:[#allocation90_spill] sm:$0xff]  ;;  %v9699_v43 = vld [vmem:[#allocation72_spill] sm:$0xff] }
 0x3cd   :  { %9690 = vst [vmem:[#allocation40_spill] sm:$0xff] %v8279_v9  ;;  %5355 = vmatpush1.msra.mxu0 %v4700_v6  ;;  %5210 = vmatprep.subr.mxu1 %v5085_v51  ;;  %v5001_v30 = vsel %vm4994_vm10, %v9695_v7, %v9694_v35  ;;  %v8294_v63 = vrot.slane %v9697_v32, %v9696_v42  ;;  %v9700_v36 = vld [vmem:[#allocation108_spill] sm:$0xff] }
 0x3ce   :  { %9693 = vst [vmem:[#allocation39_spill] sm:$0xff] %v8286_v39  ;;  %5356 = vmatprep.subr.mxu0 %v4697_v4  ;;  %5211 = vmatpush2.msra.mxu1 %v5084_v49  ;;  %v8298_v17 = vrot.slane %v9698_v16, %v9696_v42  ;;  %v5005_v6 = vsel %vm4994_vm10, %v9699_v43, %v9695_v7  ;;  %v9701_v51 = vld [vmem:[#allocation116_spill] sm:$0xff]  ;;  %v9702_v16 = vld [vmem:[#allocation82_spill] sm:$0xff] }
 0x3cf   :  { %v5006_v20 = vsel %vm4994_vm10, %v9701_v51, %v9700_v36  ;;  %v5075_v32 = vsel %vm5059_vm8, %v5058_v19, %v9678_v25  ;;  %5357 = vmatpush1.msra.mxu0 %v4696_v10  ;;  %v8311_v49 = vpop.permute.xlu1 %4986  ;;  %5212 = vmatprep.subr.mxu1 %v5081_v8  ;;  %v4985_v4 = vpop.permute.xlu0 %4984  ;;  %v5062_v31 = vsel %vm5059_vm8, %v9679_v54, %v9702_v16  ;;  %v9703_v25 = vld [vmem:[#allocation37_spill] sm:$0xff]  ;;  %v9705_v10 = vld [vmem:[#allocation35_spill] sm:$0xff] }
 0x3d0   :  { %v5063_v7 = vsel %vm5059_vm8, %v5050_v0, %v5058_v19  ;;  %5358 = vmatprep.subr.mxu0 %v4693_v12  ;;  %v5002_v62 = vsel %vm4994_vm10, %v9700_v36, %v4985_v4  ;;  %5213 = vmatpush2.msra.mxu1 %v8009_v58  ;;  %v5074_v8 = vsel %vm5059_vm8, %v9702_v16, %v9682_v53  ;;  %v9704_v19 = vld [vmem:[#allocation60_spill] sm:$0xff]  ;;  %v9706_v36 = vld [vmem:[#allocation113_spill] sm:$0xff] }
 0x3d1   :  { %5359 = vmatpush1.msra.mxu0 %v8210_v22  ;;  %5214 = vmatprep.subr.mxu1 %v9703_v25  ;;  %v5024_v54 = vmul.f32 %v5002_v62, %v9691_v57  ;;  %v5020_v0 = vmul.f32 %v5001_v30, %v9691_v57  ;;  %v5023_v12 = vmul.f32 %v5006_v20, %v7781_v15  ;;  %v9707_v22 = vld [vmem:[#allocation32_spill] sm:$0xff]  ;;  %v9708_v16 = vld [vmem:[#allocation33_spill] sm:$0xff] }
 0x3d2   :  { %v5009_v58 = vsel %vm4994_vm10, %v9704_v19, %v9699_v43  ;;  %5360 = vmatprep.subr.mxu0 %v9705_v10  ;;  %5215 = vmatpush2.msra.mxu1 %v9706_v36  ;;  %v5091_v53 = vmul.f32 %v5075_v32, %v7766_v1  ;;  %v4999_v62 = vsel %vm4994_vm10, %v9708_v16, %v9707_v22  ;;  %v9709_v25 = vld [vmem:[#allocation120_spill] sm:$0xff] }
 0x3d3   :  { %v5003_v30 = vsel %vm4994_vm10, %v8066_v55, %v9708_v16  ;;  %v5090_v20 = vmul.f32 %v5063_v7, %v9640_v60  ;;  %5361 = vmatpush1.msra.mxu0 %v9709_v25  ;;  %v4993_v43 = vpop.permute.xlu1 %4992  ;;  %5216 = vmatprep.subr.mxu1 %v5024_v54  ;;  %v8349_v10 = vpop.permute.xlu0 %4899  ;;  %v5019_v32 = vmul.f32 %v5005_v6, %v7781_v15 }
 0x3d4   :  { %5362 = vmatprep.subr.mxu0 %v5091_v53  ;;  %5217 = vmatpush2.msra.mxu1 %v5023_v12  ;;  %v5087_v36 = vmul.f32 %v5074_v8, %v7766_v1  ;;  %v8356_v40 = vrot.slane %v9689_v46, %v9696_v42  ;;  %v5086_v7 = vmul.f32 %v5062_v31, %v9640_v60 }
 0x3d5   :  { %v4997_v54 = vsel %vm4994_vm10, %v9694_v35, %v9704_v19  ;;  %5363 = vmatpush2.msra.mxu0 %v5090_v20  ;;  %5218 = vmatprep.subr.mxu1 %v5020_v0  ;;  %v8365_v6 = vrot.slane %v9692_v29, %v9696_v42  ;;  %v5011_v12 = vmul.f32 %v5003_v30, %v7781_v15  ;;  %v9710_v35 = vld [vmem:[#allocation121_spill] sm:$0xff] }
 0x3d6   :  { %5364 = vmatprep.subr.mxu0 %v5087_v36  ;;  %5219 = vmatpush2.msra.mxu1 %v5019_v32  ;;  %v5012_v46 = vmul.f32 %v4999_v62, %v9691_v57  ;;  %v5022_v8 = vmul.f32 %v5009_v58, %v8286_v39  ;;  %v4996_v31 = vsel %vm4994_vm10, %v9676_v28, %v8133_v13  ;;  %v9712_v62 = vld [vmem:[#allocation36_spill] sm:$0xff] }
 0x3d7   :  { %v4941_v0 = vsel %vm4929_vm12, %v8135_v47, %v9710_v35  ;;  %v5010_v29 = vsel %vm4994_vm10, %v4993_v43, %v9701_v51  ;;  %5365 = vmatpush2.msra.mxu0 %v5086_v7  ;;  %v4906_v42 = vpop.permute.xlu1 %4905  ;;  %5220 = vmatprep.subr.mxu1 %v5016_v18  ;;  %v4920_v19 = vpop.permute.xlu0 %4919  ;;  %v4936_v58 = vsel %vm4929_vm12, %v8064_v50, %v8207_v5  ;;  %v9711_v51 = vld [vmem:[#allocation49_spill] sm:$0xff] }
 0x3d8   :  { %v4998_v28 = vsel %vm4994_vm10, %v4985_v4, %v4993_v43  ;;  %5366 = vmatprep.subr.mxu0 %v8274_v3  ;;  %v4937_v53 = vsel %vm4929_vm12, %v9710_v35, %v4920_v19  ;;  %5221 = vmatpush2.msra.mxu1 %v8069_v48  ;;  %v5008_v18 = vsel %vm4994_vm10, %v8133_v13, %v9711_v51 }
 0x3d9   :  { %v4940_v16 = vsel %vm4929_vm12, %v8236_v26, %v8064_v50  ;;  %5367 = vmatpush2.msra.mxu0 %v8222_v38  ;;  %5222 = vmatprep.subr.mxu1 %v5012_v46  ;;  %v4959_v3 = vmul.f32 %v4937_v53, %v8298_v17  ;;  %v4958_v4 = vmul.f32 %v4941_v0, %v8294_v63  ;;  %v9713_v38 = vld [vmem:[#allocation31_spill] sm:$0xff] }
 0x3da   :  { %v4935_v48 = vsel %vm4929_vm12, %v8172_v61, %v8270_v45  ;;  %5368 = vmatprep.subr.mxu0 %v9712_v62  ;;  %5223 = vmatpush2.msra.mxu1 %v5011_v12  ;;  %v5026_v13 = vmul.f32 %v5010_v29, %v8286_v39  ;;  %v5025_v30 = vmul.f32 %v4998_v28, %v8279_v9  ;;  %v8437_v28 = vld [vmem:[#allocation15 + $0x28] sm:$0xff] }
 0x3db   :  { %v4939_v50 = vsel %vm4929_vm12, %v8349_v10, %v8172_v61  ;;  %5369 = vmatpush2.msra.mxu0 %v9713_v38  ;;  %v4928_v20 = vpop.permute.xlu1 %4927  ;;  %5224 = vmatprep.subr.mxu1 %v4959_v3  ;;  %v4914_v25 = vpop.permute.xlu0 %4913  ;;  %v4955_v43 = vmul.f32 %v4936_v58, %v8298_v17  ;;  %v4954_v32 = vmul.f32 %v4940_v16, %v8294_v63 }
 0x3dc   :  { %v4995_v36 = vsel %vm4994_vm10, %v9707_v22, %v8311_v49  ;;  %5370 = vmatprep.subr.mxu0 %v5026_v13  ;;  %v4934_v7 = vsel %vm4929_vm12, %v4906_v42, %v4914_v25  ;;  %5225 = vmatpush2.msra.mxu1 %v4958_v4  ;;  %v5021_v61 = vmul.f32 %v4997_v54, %v8279_v9 }
 0x3dd   :  { %v5007_v12 = vsel %vm4994_vm10, %v8311_v49, %v8066_v55  ;;  %5371 = vmatpush2.msra.mxu0 %v5025_v30  ;;  %5226 = vmatprep.subr.mxu1 %v4955_v43  ;;  %v4951_v46 = vmul.f32 %v4935_v48, %v8298_v17  ;;  %v5017_v35 = vmul.f32 %v4996_v31, %v8279_v9  ;;  %v6377_v30 = vld [vmem:[#allocation2 + $0x68] sm:$0xff] }
 0x3de   :  { %v4950_v22 = vmul.f32 %v4939_v50, %v8294_v63  ;;  %5372 = vmatprep.subr.mxu0 %v5022_v8  ;;  %5227 = vmatpush2.msra.mxu1 %v4954_v32  ;;  %v5018_v0 = vmul.f32 %v5008_v18, %v8286_v39  ;;  %v5013_v29 = vmul.f32 %v4995_v36, %v8279_v9  ;;  %v8469_v32 = vld [vmem:[#allocation7 + $0x38] ss:$0 sm:$0xff]  ;;  %v6380_v36 = vld [vmem:[#allocation2 + $0x40] sm:$0xff] }
 0x3df   :  { %v4945_v54 = vsel %vm4929_vm12, %v4928_v20, %v8135_v47  ;;  %5373 = vmatpush2.msra.mxu0 %v5021_v61  ;;  %v4926_v55 = vpop.permute.xlu1 %4925  ;;  %5228 = vmatprep.subr.mxu1 %v4951_v46  ;;  %v4898_v49 = vpop.permute.xlu0 %4897  ;;  %v4947_v58 = vmul.f32 %v4934_v7, %v8298_v17  ;;  %v4933_v8 = vsel %vm4929_vm12, %v4920_v19, %v4928_v20  ;;  %v6379_v20 = vld [vmem:[#allocation2 + $0x48] sm:$0xff] }
 0x3e0   :  { %5374 = vmatprep.subr.mxu0 %v5018_v0  ;;  %v4938_v31 = vsel %vm4929_vm12, %v4898_v49, %v4906_v42  ;;  %5229 = vmatpush2.msra.mxu1 %v4950_v22  ;;  %v5014_v53 = vmul.f32 %v5007_v12, %v8286_v39  ;;  %v4932_v47 = vsel %vm4929_vm12, %v8207_v5, %v4926_v55  ;;  %v9715_v12 = vld [vmem:[#allocation84_spill] sm:$0xff]  ;;  %v6381_v46 = vld [vmem:[#allocation2 + $0x28] sm:$0xff] }
 0x3e1   :  { %v4944_v51 = vsel %vm4929_vm12, %v4926_v55, %v8236_v26  ;;  %v4946_v18 = vmul.f32 %v4938_v31, %v8294_v63  ;;  %5375 = vmatpush2.msra.mxu0 %v5017_v35  ;;  %5230 = vmatprep.subr.mxu1 %v4947_v58  ;;  %v4961_v19 = vmul.f32 %v4945_v54, %v8365_v6  ;;  %v8476_v35 = vld [vmem:[#allocation7 + $0x30] ss:$0 sm:$0xff]  ;;  %v9717_v22 = vld [vmem:[#allocation122_spill] sm:$0xff]  ;;  %v4629_v54 = vld [vmem:[#allocation15] sm:$0xff] }
 0x3e2   :  { %5376 = vmatprep.subr.mxu0 %v5014_v53  ;;  %6314 = vmatmul.mubr.msk.f32.gmra.mxu0 %vm5169_vm11, %v8437_v28  ;;  %v4960_v42 = vmul.f32 %v4933_v8, %v8356_v40  ;;  %v4956_v3 = vmul.f32 %v4932_v47, %v8356_v40  ;;  %v4957_v48 = vmul.f32 %v4944_v51, %v8365_v6  ;;  %v9719_v8 = vld [vmem:[#allocation73_spill] sm:$0xff]  ;;  %v9720_v53 = vld [vmem:[#allocation75_spill] sm:$0xff] }
 0x3e3   :  { %5377 = vmatpush2.msra.mxu0 %v5013_v29  ;;  %v4922_v16 = vpop.permute.xlu1 %4921  ;;  %5231 = vmatpush2.msra.mxu1 %v4946_v18  ;;  %v4924_v5 = vpop.permute.xlu0 %4923  ;;  %9714 = vst [vmem:[#allocation42_spill] sm:$0xff] %v8469_v32  ;;  %9716 = vst [vmem:[#allocation41_spill] sm:$0xff] %v8476_v35  ;;  %v6382_v29 = vld [vmem:[#allocation2 + $0x20] sm:$0xff]  ;;  %v6384_v18 = vld [vmem:[#allocation2 + $0x78] sm:$0xff] }
 0x3e4   :  { %5378 = vmatprep.subr.mxu0 %v4961_v19  ;;  %v4931_v26 = vsel %vm4929_vm12, %v8270_v45, %v4924_v5  ;;  %v4943_v4 = vsel %vm4929_vm12, %v4924_v5, %v8349_v10  ;;  %v4942_v62 = vsel %vm4929_vm12, %v4922_v16, %v4898_v49  ;;  %5232 = vmatprep.subr.mxu1 %v6377_v30  ;;  %v6378_v45 = vld [vmem:[#allocation2 + $0x60] sm:$0xff]  ;;  %v9722_v30 = vld [vmem:[#allocation51_spill] sm:$0xff] }
 0x3e5   :  { %v4952_v13 = vmul.f32 %v4931_v26, %v8356_v40  ;;  %5379 = vmatpush2.msra.mxu0 %v4960_v42  ;;  %v4953_v50 = vmul.f32 %v4943_v4, %v8365_v6  ;;  %v4930_v38 = vsel %vm4929_vm12, %v4914_v25, %v4922_v16  ;;  %5233 = vmatpush2.msra.mxu1 %v6378_v45  ;;  %v9718_v49 = vld [vmem:[#allocation61_spill] sm:$0xff]  ;;  %v9721_v16 = vld [vmem:[#allocation38_spill] sm:$0xff] }
 0x3e6   :  { %5380 = vmatprep.subr.mxu0 %v4957_v48  ;;  %5234 = vmatprep.subr.mxu1 %v6379_v20  ;;  %v4949_v7 = vmul.f32 %v4942_v62, %v8365_v6  ;;  %v4948_v61 = vmul.f32 %v4930_v38, %v8356_v40  ;;  %v6383_v51 = vld [vmem:[#allocation2] sm:$0xff]  ;;  %v6386_v26 = vld [vmem:[#allocation2 + $0x58] sm:$0xff]  ;;  %v6387_v38 = vld [vmem:[#allocation2 + $0x50] sm:$0xff] }
 0x3e7   :  { %5381 = vmatpush2.msra.mxu0 %v4956_v3  ;;  %v5121_v10 = vpop.permute.xlu1 %5120  ;;  %v5123_v43 = vpop.permute.xlu0 %5122  ;;  %5235 = vmatpush2.msra.mxu1 %v6380_v36  ;;  %v6385_v3 = vld [vmem:[#allocation2 + $0x70] sm:$0xff]  ;;  %v9723_v45 = vld [vmem:[#allocation30_spill] sm:$0xff] }
 0x3e8   :  { %5382 = vmatprep.subr.mxu0 %v4953_v50  ;;  %v5140_v25 = vsel %vm5124_vm9, %v5123_v43, %v9715_v12  ;;  %5236 = vmatprep.subr.mxu1 %v6381_v46  ;;  %v5128_v0 = vsel %vm5124_vm9, %v9717_v22, %v5123_v43  ;;  %v5139_v58 = vsel %vm5124_vm9, %v5121_v10, %v9718_v49  ;;  %v4633_v48 = vld [vmem:[#allocation15 + $0x20] sm:$0xff]  ;;  %v4632_v43 = vld [vmem:[#allocation15 + $0x18] sm:$0xff]  ;;  %v9724_v36 = vld [vmem:[#allocation34_spill] sm:$0xff] }
 0x3e9   :  { %5383 = vmatpush2.msra.mxu0 %v4952_v13  ;;  %5237 = vmatpush2.msra.mxu1 %v6382_v29  ;;  %v5156_v55 = vmul.f32 %v8469_v32, %v5140_v25  ;;  %v5127_v47 = vsel %vm5124_vm9, %v9720_v53, %v5121_v10  ;;  %v5155_v19 = vmul.f32 %v8476_v35, %v5128_v0  ;;  %v6388_v10 = vld [vmem:[#allocation2 + $0x38] sm:$0xff]  ;;  %v6389_v12 = vld [vmem:[#allocation2 + $0x30] sm:$0xff] }
 0x3ea   :  { %5384 = vmatprep.subr.mxu0 %v4949_v7  ;;  %5238 = vmatprep.subr.mxu1 %v9719_v8  ;;  %v5152_v4 = vmul.f32 %v8469_v32, %v5139_v58  ;;  %v5151_v13 = vmul.f32 %v8476_v35, %v5127_v47  ;;  %v6390_v25 = vld [vmem:[#allocation2 + $0x18] sm:$0xff]  ;;  %v6391_v0 = vld [vmem:[#allocation2 + $0x10] sm:$0xff] }
 0x3eb   :  { %5385 = vmatpush2.msra.mxu0 %v4948_v61  ;;  %v5119_v31 = vpop.permute.xlu0 %5118  ;;  %5239 = vmatpush2.msra.mxu1 %v6383_v51  ;;  %v5117_v42 = vpop.permute.xlu1 %5116  ;;  %v6392_v29 = vld [vmem:[#allocation15 + $0x8] sm:$0xff] }
 0x3ec   :  { %5386 = vmatprep.subr.mxu0 %v6384_v18  ;;  %v5138_v5 = vsel %vm5124_vm9, %v5119_v31, %v9721_v16  ;;  %5241 = vmatmul.mubr.f32.vlgmr.msra.gmra.mxu1 %v4629_v54  ;;  %v5126_v50 = vsel %vm5124_vm9, %v9722_v30, %v5119_v31  ;;  %v5137_v20 = vsel %vm5124_vm9, %v5117_v42, %v9723_v45 }
 0x3ed   :  { %5387 = vmatpush2.msra.mxu0 %v6385_v3  ;;  %5431 = vmatprep.subr.mxu1 %v5156_v55  ;;  %v5148_v62 = vmul.f32 %v8469_v32, %v5138_v5  ;;  %v5125_v7 = vsel %vm5124_vm9, %v9724_v36, %v5117_v42  ;;  %v5147_v61 = vmul.f32 %v8476_v35, %v5126_v50 }
 0x3ee   :  { %5388 = vmatprep.subr.mxu0 %v6386_v26  ;;  %5432 = vmatpush1.msra.mxu1 %v5155_v19  ;;  %v5144_v46 = vmul.f32 %v8469_v32, %v5137_v20  ;;  %v5143_v22 = vmul.f32 %v8476_v35, %v5125_v7 }
 0x3ef   :  { %5389 = vmatpush2.msra.mxu0 %v6387_v38  ;;  %5433 = vmatprep.subr.mxu1 %v5152_v4 }
 0x3f0   :  { %5390 = vmatprep.subr.mxu0 %v6388_v10  ;;  %5434 = vmatpush1.msra.mxu1 %v5151_v13 }
 0x3f1   :  { %5246 = vmatprep.mubr.f32.mxu1 %v4633_v48  ;;  %5391 = vmatpush2.msra.mxu0 %v6389_v12 }
 0x3f2   :  { %5435 = vmatprep.subr.mxu1 %v5148_v62  ;;  %5247 = vmatmul.mubr.f32.gmra.mxu1 %v4632_v43 }
 0x3f3   :  { %5392 = vmatprep.subr.mxu0 %v6390_v25  ;;  %5436 = vmatpush1.msra.mxu1 %v5147_v61 }
 0x3f4   :  { %5393 = vmatpush2.msra.mxu0 %v6391_v0  ;;  %5394 = vmatprep.mubr.f32.mxu0 %v6392_v29 }
 0x3f5   :  { %5437 = vmatprep.subr.mxu1 %v5144_v46  ;;  %5395 = vmatmul.mubr.f32.vlgmr.msra.gmra.mxu0 %v4629_v54 }
 0x3f6   :  { %5438 = vmatpush1.msra.mxu1 %v5143_v22  ;;  %5471 = vmatprep.mubr.f32.mxu1 %v9686_v27 }
 0x3f7   :  { %5400 = vmatprep.mubr.f32.mxu0 %v4633_v48  ;;  %6315 = vmatmul.mubr.msk.f32.vlgmr.msra.gmra.mxu1 %vm5169_vm11, %v8045_v11 }
 0x3f8   :  { %5477 = vmatprep.mubr.f32.mxu1 %v9686_v27  ;;  %v5162_v55 = vpop.permute.xlu1 %5161  ;;  %v5167_v11 = vpop.permute.xlu0 %5166 }
 0x3f9   :  { %5401 = vmatmul.mubr.f32.gmra.mxu0 %v4632_v43 }
 0x3fb   :  { %6316 = vmatmul.mubr.msk.f32.gmra.mxu1 %vm5169_vm11, %v8437_v28 }
 0x474   :  { %v5319_v49 = vpop.f32.mrf.mxu0 }
 0x476   :  { %v5321_v47 = vpop.f32.mrf.mxu0 }
 0x4a2   :  { %v5325_v42 = vpop.f32.mrf.mxu0 }
 0x4a4   :  { %v5327_v26 = vpop.f32.mrf.mxu0 }
 0x4ac   :  { %v5242_v58 = vpop.f32.mrf.mxu1 }
 0x4ad   :  { %v5243_v8 = vadd.f32 %v5242_v58, %v5162_v55 }
 0x4ae   :  { %v5244_v31 = vpop.f32.mrf.mxu1 }
 0x4af   :  { %v5320_v53 = vadd.f32 %v5319_v49, %v5243_v8  ;;  %v5245_v54 = vadd.f32 %v5244_v31, %v5162_v55  ;;  %v5493_v31 = vld [vmem:[#allocation16 + $0x8] sm:$0xff] }
 0x4b0   :  { %6317 = vmatprep.mubr.msk.f32.mxu1 %vm155_vm1, %v5493_v31  ;;  %6318 = vmatprep.mubr.msk.f32.mxu0 %vm155_vm1, %v5493_v31 }
 0x4b1   :  { %v8514_v51 = vmax.f32 %v5320_v53, 0.0  ;;  %v5322_v18 = vadd.f32 %v5321_v47, %v5245_v54 }
 0x4b2   :  { %v5248_v27 = vpop.f32.mrf.mxu1 }
 0x4b3   :  { %9725 = vst [vmem:[#allocation44_spill] sm:$0xff] %v8514_v51  ;;  %v8516_v19 = vmax.f32 %v5322_v18, 0.0  ;;  %5686 = vrot.lane.b32.xlu1 %v8514_v51, %s6612_s5  ;;  %v5249_v28 = vadd.f32 %v5248_v27, %v5167_v11  ;;  %v5750_v27 = vld [vmem:[%s9361_s9] sm:$0xff] }
 0x4b4   :  { %v5250_v16 = vpop.f32.mrf.mxu1 }
 0x4b5   :  { %9726 = vst [vmem:[#allocation43_spill] sm:$0xff] %v8516_v19  ;;  %5690 = vrot.lane.b32.xlu0 %v8516_v19, %s6612_s5  ;;  %v5251_v5 = vadd.f32 %v5250_v16, %v5167_v11  ;;  %v5326_v3 = vadd.f32 %v5325_v42, %v5249_v28  ;;  %v5396_v13 = vpop.f32.mrf.mxu0  ;;  %v5905_v42 = vld [vmem:[%s9362_s10] sm:$0xff] }
 0x4b6   :  { %v5397_v38 = vadd.f32 %v5396_v13, %v5162_v55  ;;  %v5908_v13 = vld [vmem:[%s9362_s10 + $0x18] sm:$0xff] }
 0x4b7   :  { %5654 = vrot.lane.b32.xlu1 %v8514_v51, %s6613_s28  ;;  %v5328_v4 = vadd.f32 %v5327_v26, %v5251_v5  ;;  %v8542_v48 = vmax.f32 %v5326_v3, 0.0  ;;  %v5398_v30 = vpop.f32.mrf.mxu0  ;;  %v5473_v50 = vpop.f32.mrf.mxu1  ;;  %v5906_v5 = vld [vmem:[%s9362_s10 + $0x8] sm:$0xff]  ;;  %v5907_v26 = vld [vmem:[%s9362_s10 + $0x10] sm:$0xff] }
 0x4b8   :  { %v5399_v45 = vadd.f32 %v5398_v30, %v5162_v55  ;;  %v5474_v10 = vadd.f32 %v5473_v50, %v5397_v38  ;;  %v5909_v50 = vld [vmem:[%s9362_s10 + $0x20] sm:$0xff] }
 0x4b9   :  { %5658 = vrot.lane.b32.xlu0 %v8516_v19, %s6613_s28  ;;  %v8548_v62 = vmax.f32 %v5328_v4, 0.0  ;;  %v5475_v20 = vpop.f32.mrf.mxu1  ;;  %v5402_v61 = vpop.f32.mrf.mxu0 }
 0x4ba   :  { %v5476_v43 = vadd.f32 %v5475_v20, %v5399_v45  ;;  %v8580_v36 = vmax.f32 %v5474_v10, 0.0  ;;  %v5403_v46 = vadd.f32 %v5402_v61, %v5167_v11  ;;  %v5910_v20 = vld [vmem:[%s9362_s10 + $0x28] sm:$0xff] }
 0x4bb   :  { %5622 = vrot.lane.b32.xlu1 %v8514_v51, %s6614_s29  ;;  %v5404_v12 = vpop.f32.mrf.mxu0  ;;  %v5479_v25 = vpop.f32.mrf.mxu1 }
 0x4bc   :  { %9727 = vst [vmem:[#allocation46_spill] sm:$0xff] %v8580_v36  ;;  %v8584_v7 = vmax.f32 %v5476_v43, 0.0  ;;  %v5405_v22 = vadd.f32 %v5404_v12, %v5167_v11  ;;  %v5480_v29 = vadd.f32 %v5479_v25, %v5403_v46  ;;  %v5911_v43 = vld [vmem:[%s9362_s10 + $0x30] sm:$0xff]  ;;  %v5912_v25 = vld [vmem:[%s9362_s10 + $0x38] sm:$0xff] }
 0x4bd   :  { %5626 = vrot.lane.b32.xlu0 %v8516_v19, %s6614_s29  ;;  %v5481_v0 = vpop.f32.mrf.mxu1 }
 0x4be   :  { %9728 = vst [vmem:[#allocation47_spill] sm:$0xff] %v8584_v7  ;;  %v5482_v55 = vadd.f32 %v5481_v0, %v5405_v22  ;;  %v8612_v49 = vmax.f32 %v5480_v29, 0.0  ;;  %v5913_v22 = vld [vmem:[%s9362_s10 + $0x40] sm:$0xff]  ;;  %s6616_s10 = smov [#allocation18]  }
 0x4bf   :  { %5590 = vrot.lane.b32.xlu1 %v8514_v51, %s6608_s8 }
 0x4c0   :  { %9729 = vst [vmem:[#allocation110_spill] sm:$0xff] %v8612_v49  ;;  %v8616_v58 = vmax.f32 %v5482_v55, 0.0 }
 0x4c1   :  { %5594 = vrot.lane.b32.xlu0 %v8516_v19, %s6608_s8 }
 0x4c2   :  { %9730 = vst [vmem:[#allocation48_spill] sm:$0xff] %v8616_v58 }
 0x4c3   :  { %5558 = vrot.lane.b32.xlu1 %v8514_v51, %s6609_s3 }
 0x4c5   :  { %5562 = vrot.lane.b32.xlu0 %v8516_v19, %s6609_s3 }
 0x4c7   :  { %5526 = vrot.lane.b32.xlu1 %v8514_v51, %s6610_s27 }
 0x4c9   :  { %5530 = vrot.lane.b32.xlu0 %v8516_v19, %s6610_s27 }
 0x4cb   :  { %5494 = vrot.lane.b32.xlu1 %v8514_v51, %s6611_s11 }
 0x4cd   :  { %5498 = vrot.lane.b32.xlu0 %v8516_v19, %s6611_s11 }
 0x4cf   :  { %5688 = vrot.lane.b32.xlu1 %v8542_v48, %s6612_s5 }
 0x4d1   :  { %5692 = vrot.lane.b32.xlu0 %v8548_v62, %s6612_s5 }
 0x4d3   :  { %5656 = vrot.lane.b32.xlu1 %v8542_v48, %s6613_s28 }
 0x4d5   :  { %5660 = vrot.lane.b32.xlu0 %v8548_v62, %s6613_s28 }
 0x4d7   :  { %5624 = vrot.lane.b32.xlu1 %v8542_v48, %s6614_s29 }
 0x4d9   :  { %5628 = vrot.lane.b32.xlu0 %v8548_v62, %s6614_s29 }
 0x4db   :  { %5592 = vrot.lane.b32.xlu1 %v8542_v48, %s6608_s8 }
 0x4dd   :  { %5596 = vrot.lane.b32.xlu0 %v8548_v62, %s6608_s8 }
 0x4df   :  { %5560 = vrot.lane.b32.xlu1 %v8542_v48, %s6609_s3 }
 0x4e1   :  { %5564 = vrot.lane.b32.xlu0 %v8548_v62, %s6609_s3 }
 0x4e3   :  { %5528 = vrot.lane.b32.xlu1 %v8542_v48, %s6610_s27 }
 0x4e5   :  { %5532 = vrot.lane.b32.xlu0 %v8548_v62, %s6610_s27 }
 0x4e7   :  { %5496 = vrot.lane.b32.xlu1 %v8542_v48, %s6611_s11 }
 0x4e9   :  { %5500 = vrot.lane.b32.xlu0 %v8548_v62, %s6611_s11 }
 0x4eb   :  { %5720 = vrot.lane.b32.xlu1 %v8542_v48, %s6607_s6 }
 0x4ed   :  { %5724 = vrot.lane.b32.xlu0 %v8548_v62, %s6607_s6 }
 0x4ef   :  { %5694 = vrot.lane.b32.xlu1 %v8580_v36, %s6612_s5 }
 0x4f1   :  { %5698 = vrot.lane.b32.xlu0 %v8584_v7, %s6612_s5 }
 0x4f3   :  { %5662 = vrot.lane.b32.xlu1 %v8580_v36, %s6613_s28 }
 0x4f5   :  { %5666 = vrot.lane.b32.xlu0 %v8584_v7, %s6613_s28 }
 0x4f7   :  { %5630 = vrot.lane.b32.xlu1 %v8580_v36, %s6614_s29 }
 0x4f9   :  { %5634 = vrot.lane.b32.xlu0 %v8584_v7, %s6614_s29 }
 0x4fb   :  { %5598 = vrot.lane.b32.xlu1 %v8580_v36, %s6608_s8 }
 0x4fd   :  { %5602 = vrot.lane.b32.xlu0 %v8584_v7, %s6608_s8 }
 0x4ff   :  { %5566 = vrot.lane.b32.xlu1 %v8580_v36, %s6609_s3 }
 0x501   :  { %5570 = vrot.lane.b32.xlu0 %v8584_v7, %s6609_s3 }
 0x503   :  { %5534 = vrot.lane.b32.xlu1 %v8580_v36, %s6610_s27 }
 0x505   :  { %5538 = vrot.lane.b32.xlu0 %v8584_v7, %s6610_s27 }
 0x507   :  { %5502 = vrot.lane.b32.xlu1 %v8580_v36, %s6611_s11 }
 0x509   :  { %5506 = vrot.lane.b32.xlu0 %v8584_v7, %s6611_s11 }
 0x50b   :  { %5696 = vrot.lane.b32.xlu1 %v8612_v49, %s6612_s5 }
 0x50d   :  { %5700 = vrot.lane.b32.xlu0 %v8616_v58, %s6612_s5 }
 0x50f   :  { %5664 = vrot.lane.b32.xlu1 %v8612_v49, %s6613_s28 }
 0x511   :  { %5668 = vrot.lane.b32.xlu0 %v8616_v58, %s6613_s28 }
 0x513   :  { %5632 = vrot.lane.b32.xlu1 %v8612_v49, %s6614_s29 }
 0x515   :  { %5636 = vrot.lane.b32.xlu0 %v8616_v58, %s6614_s29 }
 0x517   :  { %5718 = vrot.lane.b32.xlu1 %v8514_v51, %s6607_s6 }
 0x519   :  { %5722 = vrot.lane.b32.xlu0 %v8516_v19, %s6607_s6 }
 0x51b   :  { %5600 = vrot.lane.b32.xlu1 %v8612_v49, %s6608_s8 }
 0x51d   :  { %5604 = vrot.lane.b32.xlu0 %v8616_v58, %s6608_s8 }
 0x51f   :  { %5568 = vrot.lane.b32.xlu1 %v8612_v49, %s6609_s3 }
 0x521   :  { %5572 = vrot.lane.b32.xlu0 %v8616_v58, %s6609_s3 }
 0x523   :  { %5536 = vrot.lane.b32.xlu1 %v8612_v49, %s6610_s27 }
 0x525   :  { %v8644_v8 = vpop.permute.xlu1 %5686  ;;  %5540 = vrot.lane.b32.xlu0 %v8616_v58, %s6610_s27 }
 0x527   :  { %5504 = vrot.lane.b32.xlu1 %v8612_v49, %s6611_s11  ;;  %v8650_v53 = vpop.permute.xlu0 %5690 }
 0x529   :  { %v8654_v54 = vpop.permute.xlu1 %5654  ;;  %5508 = vrot.lane.b32.xlu0 %v8616_v58, %s6611_s11 }
 0x52b   :  { %5728 = vrot.lane.b32.xlu1 %v8612_v49, %s6607_s6  ;;  %v8660_v47 = vpop.permute.xlu0 %5658 }
 0x52d   :  { %v8662_v18 = vpop.permute.xlu1 %5622  ;;  %5732 = vrot.lane.b32.xlu0 %v8616_v58, %s6607_s6 }
 0x52f   :  { %5726 = vrot.lane.b32.xlu1 %v8580_v36, %s6607_s6  ;;  %v8668_v11 = vpop.permute.xlu0 %5626 }
 0x530   :  { %v5642_v49 = vsel %vm4929_vm12, %v8662_v18, %v8668_v11 }
 0x531   :  { %v8673_v28 = vpop.permute.xlu1 %5590  ;;  %5730 = vrot.lane.b32.xlu0 %v8584_v7, %s6607_s6  ;;  %v5674_v7 = vsel %vm4994_vm10, %v8654_v54, %v8660_v47 }
 0x533   :  { %5753 = vperm.xlu1 %6358, %v5750_v27   ;;  %v8680_v16 = vpop.permute.xlu0 %5594 }
 0x534   :  { %9731 = vst [vmem:[#allocation63_spill] sm:$0xff] %v8680_v16  ;;  %v8810_v51 = vsel %vm4864_vm4, %v8673_v28, %v8680_v16 }
 0x535   :  { %v8685_v3 = vpop.permute.xlu1 %5558  ;;  %6044 = vperm.xlu0 %6357, %v5905_v42  }
 0x537   :  { %6049 = vperm.xlu1 %6358, %v5906_v5   ;;  %v8690_v4 = vpop.permute.xlu0 %5562 }
 0x539   :  { %v8695_v30 = vpop.permute.xlu1 %5526  ;;  %6054 = vperm.xlu0 %6357, %v5907_v26  }
 0x53a   :  { %9732 = vst [vmem:[#allocation62_spill] sm:$0xff] %v8695_v30 }
 0x53b   :  { %6059 = vperm.xlu1 %6358, %v5908_v13   ;;  %v8700_v38 = vpop.permute.xlu0 %5530 }
 0x53c   :  { %9733 = vst [vmem:[#allocation45_spill] sm:$0xff] %v8700_v38  ;;  %v8706_v45 = vsel %vm4734_vm6, %v8695_v30, %v8700_v38 }
 0x53d   :  { %v8711_v10 = vpop.permute.xlu1 %5494  ;;  %6064 = vperm.xlu0 %6357, %v5909_v50  }
 0x53e   :  { %9734 = vst [vmem:[#allocation77_spill] sm:$0xff] %v8711_v10 }
 0x53f   :  { %6069 = vperm.xlu1 %6358, %v5910_v20   ;;  %v8716_v61 = vpop.permute.xlu0 %5498 }
 0x540   :  { %9735 = vst [vmem:[#allocation86_spill] sm:$0xff] %v8716_v61  ;;  %v8722_v12 = vsel %vm4669_vm5, %v8711_v10, %v8716_v61 }
 0x541   :  { %6074 = vperm.xlu0 %6357, %v5911_v43   ;;  %v5689_v46 = vpop.permute.xlu1 %5688 }
 0x543   :  { %6079 = vperm.xlu1 %6358, %v5912_v25   ;;  %v5693_v0 = vpop.permute.xlu0 %5692 }
 0x545   :  { %6084 = vperm.xlu0 %6357, %v5913_v22   ;;  %v8730_v29 = vpop.permute.xlu1 %5656 }
 0x547   :  { %v5661_v55 = vpop.permute.xlu0 %5660 }
 0x549   :  { %v8732_v31 = vpop.permute.xlu1 %5624 }
 0x54b   :  { %v8734_v27 = vpop.permute.xlu0 %5628 }
 0x54d   :  { %v8736_v42 = vpop.permute.xlu1 %5592 }
 0x54f   :  { %v8738_v5 = vpop.permute.xlu0 %5596 }
 0x551   :  { %v8740_v26 = vpop.permute.xlu1 %5560 }
 0x553   :  { %v8742_v13 = vpop.permute.xlu0 %5564 }
 0x555   :  { %v8744_v50 = vpop.permute.xlu1 %5528 }
 0x557   :  { %v8746_v20 = vpop.permute.xlu0 %5532 }
 0x559   :  { %v8748_v43 = vpop.permute.xlu1 %5496 }
 0x55a   :  { %9736 = vst [vmem:[#allocation71_spill] sm:$0xff] %v8748_v43 }
 0x55b   :  { %v8750_v25 = vpop.permute.xlu0 %5500 }
 0x55c   :  { %9737 = vst [vmem:[#allocation53_spill] sm:$0xff] %v8750_v25 }
 0x55d   :  { %v8752_v22 = vpop.permute.xlu1 %5720 }
 0x55e   :  { %9738 = vst [vmem:[#allocation50_spill] sm:$0xff] %v8752_v22 }
 0x55f   :  { %v8754_v32 = vpop.permute.xlu0 %5724 }
 0x560   :  { %9739 = vst [vmem:[#allocation89_spill] sm:$0xff] %v8754_v32  ;;  %v8760_v35 = vsel %vm5124_vm9, %v8752_v22, %v8754_v32 }
 0x561   :  { %9740 = vst [vmem:[#allocation88_spill] sm:$0xff] %v8760_v35  ;;  %v5695_v61 = vpop.permute.xlu1 %5694  ;;  %v5706_v35 = vsel %vm5059_vm8, %v8644_v8, %v8650_v53 }
 0x563   :  { %v5699_v10 = vpop.permute.xlu0 %5698 }
 0x564   :  { %v5708_v43 = vsel %vm5059_vm8, %v5699_v10, %v8644_v8 }
 0x565   :  { %v5663_v44 = vpop.permute.xlu1 %5662 }
 0x567   :  { %v5667_v37 = vpop.permute.xlu0 %5666 }
 0x569   :  { %v8762_v56 = vpop.permute.xlu1 %5630 }
 0x56b   :  { %v8764_v30 = vpop.permute.xlu0 %5634 }
 0x56d   :  { %v8766_v38 = vpop.permute.xlu1 %5598 }
 0x56f   :  { %v8768_v24 = vpop.permute.xlu0 %5602 }
 0x571   :  { %v8770_v2 = vpop.permute.xlu1 %5566 }
 0x572   :  { %9741 = vst [vmem:[#allocation52_spill] sm:$0xff] %v8770_v2  ;;  %v5678_v2 = vmul.f32 %v5674_v7, %v7781_v15  ;;  %v5702_v7 = vsel %vm5059_vm8, %v5695_v61, %v5699_v10 }
 0x573   :  { %v8772_v36 = vpop.permute.xlu0 %5570 }
 0x574   :  { %9742 = vst [vmem:[#allocation65_spill] sm:$0xff] %v8772_v36  ;;  %v5710_v36 = vmul.f32 %v5706_v35, %v7664_v23 }
 0x575   :  { %v8774_v52 = vpop.permute.xlu1 %5534 }
 0x576   :  { %9743 = vst [vmem:[#allocation64_spill] sm:$0xff] %v8774_v52  ;;  %v5707_v52 = vsel %vm5059_vm8, %v5689_v46, %v5693_v0 }
 0x577   :  { %v8776_v22 = vpop.permute.xlu0 %5538 }
 0x578   :  { %9744 = vst [vmem:[#allocation79_spill] sm:$0xff] %v8776_v22 }
 0x579   :  { %v8778_v32 = vpop.permute.xlu1 %5502 }
 0x57a   :  { %9745 = vst [vmem:[#allocation55_spill] sm:$0xff] %v8778_v32  ;;  %v5675_v32 = vsel %vm4994_vm10, %v8730_v29, %v5661_v55 }
 0x57b   :  { %v8788_v34 = vpop.permute.xlu0 %5506 }
 0x57c   :  { %9746 = vst [vmem:[#allocation74_spill] sm:$0xff] %v8788_v34  ;;  %v5704_v34 = vsel %vm5059_vm8, %v8650_v53, %v5695_v61  ;;  %v5714_v53 = vmul.f32 %v5707_v52, %v7664_v23  ;;  %v5643_v61 = vsel %vm4929_vm12, %v8732_v31, %v8734_v27 }
 0x57d   :  { %v5697_v22 = vpop.permute.xlu1 %5696  ;;  %v5711_v8 = vmul.f32 %v5704_v34, %v9642_v41  ;;  %v5670_v34 = vsel %vm4994_vm10, %v5663_v44, %v5667_v37 }
 0x57e   :  { %v5705_v35 = vsel %vm5059_vm8, %v5693_v0, %v5697_v22  ;;  %v5682_v0 = vmul.f32 %v5675_v32, %v7781_v15  ;;  %v5712_v32 = vmul.f32 %v5702_v7, %v9640_v60 }
 0x57f   :  { %v5715_v25 = vmul.f32 %v5705_v35, %v9642_v41  ;;  %v5701_v58 = vpop.permute.xlu0 %5700 }
 0x580   :  { %v5703_v19 = vsel %vm5059_vm8, %v5697_v22, %v5701_v58  ;;  %v5709_v16 = vsel %vm5059_vm8, %v5701_v58, %v5689_v46  ;;  %v5713_v22 = vmul.f32 %v5708_v43, %v7766_v1  ;;  %v5672_v58 = vsel %vm4994_vm10, %v8660_v47, %v5663_v44 }
 0x581   :  { %v5716_v10 = vmul.f32 %v5703_v19, %v9640_v60  ;;  %v5717_v35 = vmul.f32 %v5709_v16, %v7766_v1  ;;  %v5665_v52 = vpop.permute.xlu1 %5664  ;;  %5759 = vmatprep.subr.mxu1 %v5715_v25  ;;  %v5676_v19 = vsel %vm4994_vm10, %v5667_v37, %v8654_v54  ;;  %v5640_v47 = vsel %vm4929_vm12, %v8668_v11, %v8762_v56 }
 0x582   :  { %v5673_v46 = vsel %vm4994_vm10, %v5661_v55, %v5665_v52  ;;  %5760 = vmatpush1.msra.mxu1 %v5714_v53  ;;  %v5679_v37 = vmul.f32 %v5672_v58, %v9691_v57  ;;  %v5650_v11 = vmul.f32 %v5643_v61, %v8294_v63  ;;  %v5680_v53 = vmul.f32 %v5670_v34, %v8279_v9 }
 0x583   :  { %v5683_v16 = vmul.f32 %v5673_v46, %v9691_v57  ;;  %5761 = vmatprep.subr.mxu1 %v5711_v8  ;;  %5830 = vmatprep.subr.mxu0 %v5717_v35  ;;  %v5669_v43 = vpop.permute.xlu0 %5668  ;;  %v5644_v61 = vsel %vm4929_vm12, %v8764_v30, %v8662_v18  ;;  %v5646_v18 = vmul.f32 %v5642_v49, %v8294_v63 }
 0x584   :  { %v5671_v55 = vsel %vm4994_vm10, %v5665_v52, %v5669_v43  ;;  %v5677_v44 = vsel %vm4994_vm10, %v5669_v43, %v8730_v29  ;;  %5762 = vmatpush1.msra.mxu1 %v5710_v36  ;;  %5831 = vmatpush1.msra.mxu0 %v5716_v10  ;;  %v5681_v36 = vmul.f32 %v5676_v19, %v8286_v39  ;;  %v9747_v19 = vld [vmem:[#allocation87_spill] sm:$0xff] }
 0x585   :  { %v5684_v54 = vmul.f32 %v5671_v55, %v8279_v9  ;;  %v5685_v25 = vmul.f32 %v5677_v44, %v8286_v39  ;;  %v5633_v7 = vpop.permute.xlu1 %5632  ;;  %5763 = vmatprep.subr.mxu1 %v5683_v16  ;;  %5832 = vmatprep.subr.mxu0 %v5713_v22  ;;  %v5647_v29 = vmul.f32 %v5640_v47, %v8298_v17 }
 0x586   :  { %v5641_v8 = vsel %vm4929_vm12, %v8734_v27, %v5633_v7  ;;  %5764 = vmatpush1.msra.mxu1 %v5682_v0  ;;  %5833 = vmatpush1.msra.mxu0 %v5712_v32  ;;  %v5638_v0 = vsel %vm4929_vm12, %v8762_v56, %v8764_v30  ;;  %v5611_v56 = vsel %vm4864_vm4, %v8736_v42, %v8738_v5 }
 0x587   :  { %v5651_v10 = vmul.f32 %v5641_v8, %v8298_v17  ;;  %5765 = vmatprep.subr.mxu1 %v5679_v37  ;;  %5834 = vmatprep.subr.mxu0 %v5685_v25  ;;  %v5637_v35 = vpop.permute.xlu0 %5636  ;;  %v5579_v30 = vsel %vm4799_vm7, %v8740_v26, %v8742_v13  ;;  %v5547_v49 = vsel %vm4734_vm6, %v8744_v50, %v8746_v20  ;;  %v9748_v25 = vld [vmem:[#allocation43_spill] sm:$0xff] }
 0x588   :  { %v5639_v52 = vsel %vm4929_vm12, %v5633_v7, %v5637_v35  ;;  %v5645_v27 = vsel %vm4929_vm12, %v5637_v35, %v8732_v31  ;;  %5766 = vmatpush1.msra.mxu1 %v5678_v2  ;;  %5835 = vmatpush1.msra.mxu0 %v5684_v54  ;;  %v5578_v2 = vsel %vm4799_vm7, %v8685_v3, %v8690_v4  ;;  %v9749_v7 = vld [vmem:[#allocation48_spill] sm:$0xff] }
 0x589   :  { %v5652_v32 = vmul.f32 %v5639_v52, %v8356_v40  ;;  %v5653_v22 = vmul.f32 %v5645_v27, %v8365_v6  ;;  %v8879_v58 = vpop.permute.xlu1 %5718  ;;  %5767 = vmatprep.subr.mxu1 %v5651_v10  ;;  %5836 = vmatprep.subr.mxu0 %v5681_v36  ;;  %v5649_v31 = vmul.f32 %v5644_v61, %v8365_v6  ;;  %v9755_v35 = vld [vmem:[#allocation96_spill] sm:$0xff]  ;;  %v9756_v52 = vld [vmem:[#allocation99_spill] sm:$0xff] }
 0x58a   :  { %5768 = vmatpush1.msra.mxu1 %v5650_v11  ;;  %5837 = vmatpush1.msra.mxu0 %v5680_v53  ;;  %v5648_v34 = vmul.f32 %v5638_v0, %v8356_v40  ;;  %v5615_v16 = vmul.f32 %v8810_v51, %v9747_v19  ;;  %v8905_v43 = vmul.f32 %v5578_v2, %v7660_v14  ;;  %v9750_v11 = vld [vmem:[#allocation53_spill] sm:$0xff]  ;;  %v9751_v53 = vld [vmem:[#allocation71_spill] sm:$0xff] }
 0x58b   :  { %5769 = vmatprep.subr.mxu1 %v5647_v29  ;;  %5838 = vmatprep.subr.mxu0 %v5653_v22  ;;  %v8899_v46 = vpop.permute.xlu0 %5722  ;;  %v8909_v47 = vmul.f32 %v8706_v45, %v7676_v33  ;;  %v8913_v55 = vmul.f32 %v8722_v12, %v7680_v21  ;;  %v5619_v37 = vmul.f32 %v5611_v56, %v9747_v19  ;;  %v9754_v29 = vld [vmem:[#allocation63_spill] sm:$0xff]  ;;  %v9759_v56 = vld [vmem:[#allocation93_spill] sm:$0xff] }
 0x58c   :  { %5770 = vmatpush1.msra.mxu1 %v5646_v18  ;;  %5839 = vmatpush1.msra.mxu0 %v5652_v32  ;;  %v5587_v54 = vmul.f32 %v5579_v30, %v7660_v14  ;;  %v8919_v51 = vmul.f32 %v5547_v49, %v7676_v33  ;;  %v5606_v45 = vsel %vm4864_vm4, %v8766_v38, %v8768_v24  ;;  %v9757_v32 = vld [vmem:[#allocation47_spill] sm:$0xff]  ;;  %v9758_v18 = vld [vmem:[#allocation52_spill] sm:$0xff]  ;;  %v9761_v49 = vld [vmem:[#allocation65_spill] sm:$0xff] }
 0x58d   :  { %v5601_v44 = vpop.permute.xlu1 %5600  ;;  %5771 = vmatprep.subr.mxu1 %v8548_v62  ;;  %5840 = vmatprep.subr.mxu0 %v5649_v31  ;;  %v5612_v62 = vsel %vm4864_vm4, %v8768_v24, %v8673_v28  ;;  %v5515_v8 = vsel %vm4669_vm5, %v9751_v53, %v9750_v11  ;;  %v9752_v28 = vld [vmem:[#allocation44_spill] sm:$0xff]  ;;  %v5608_v10 = vsel %vm4864_vm4, %v9754_v29, %v8766_v38  ;;  %v9760_v38 = vld [vmem:[#allocation46_spill] sm:$0xff] }
 0x58e   :  { %5772 = vmatpush1.msra.mxu1 %v8542_v48  ;;  %5841 = vmatpush1.msra.mxu0 %v5648_v34  ;;  %v5609_v12 = vsel %vm4864_vm4, %v8738_v5, %v5601_v44  ;;  %v9753_v5 = vld [vmem:[#allocation110_spill] sm:$0xff]  ;;  %v5614_v22 = vmul.f32 %v5612_v62, %v9755_v35  ;;  %v5576_v2 = vsel %vm4799_vm7, %v8690_v4, %v9758_v18 }
 0x58f   :  { %5773 = vmatprep.subr.mxu1 %v9748_v25  ;;  %5842 = vmatprep.subr.mxu0 %v9749_v7  ;;  %v5605_v48 = vpop.permute.xlu0 %5604  ;;  %v5620_v30 = vmul.f32 %v5609_v12, %v9759_v56  ;;  %v5574_v31 = vsel %vm4799_vm7, %v9758_v18, %v9761_v49  ;;  %v5580_v34 = vsel %vm4799_vm7, %v9761_v49, %v8685_v3  ;;  %v9762_v12 = vld [vmem:[#allocation97_spill] sm:$0xff]  ;;  %v9763_v25 = vld [vmem:[#allocation98_spill] sm:$0xff] }
 0x590   :  { %v5607_v36 = vsel %vm4864_vm4, %v5601_v44, %v5605_v48  ;;  %v5613_v24 = vsel %vm4864_vm4, %v5605_v48, %v8736_v42  ;;  %5774 = vmatpush1.msra.mxu1 %v9752_v28  ;;  %5843 = vmatpush1.msra.mxu0 %v9753_v5  ;;  %v5617_v42 = vmul.f32 %v5606_v45, %v9756_v52  ;;  %v9764_v48 = vld [vmem:[#allocation103_spill] sm:$0xff]  ;;  %v9769_v18 = vld [vmem:[#allocation101_spill] sm:$0xff] }
 0x591   :  { %v5618_v61 = vmul.f32 %v5613_v24, %v9755_v35  ;;  %v5621_v27 = vmul.f32 %v5607_v36, %v9756_v52  ;;  %v5569_v0 = vpop.permute.xlu1 %5568  ;;  %5775 = vmatprep.subr.mxu1 %v5619_v37  ;;  %5844 = vmatprep.subr.mxu0 %v9757_v32  ;;  %v5616_v37 = vmul.f32 %v5608_v10, %v9759_v56  ;;  %v9767_v10 = vld [vmem:[#allocation62_spill] sm:$0xff] }
 0x592   :  { %5845 = vmatpush1.msra.mxu0 %v9760_v38  ;;  %v5577_v44 = vsel %vm4799_vm7, %v8742_v13, %v5569_v0  ;;  %v5584_v3 = vmul.f32 %v5576_v2, %v9762_v12  ;;  %v5582_v24 = vmul.f32 %v5580_v34, %v9763_v25  ;;  %v5585_v28 = vmul.f32 %v5574_v31, %v9764_v48  ;;  %v9771_v31 = vld [vmem:[#allocation100_spill] sm:$0xff] }
 0x593   :  { %5776 = vmatpush1.msra.mxu1 %v5618_v61  ;;  %5846 = vmatprep.subr.mxu0 %v5621_v27  ;;  %v5573_v4 = vpop.permute.xlu0 %5572  ;;  %v5588_v5 = vmul.f32 %v5577_v44, %v9762_v12  ;;  %v9768_v61 = vld [vmem:[#allocation79_spill] sm:$0xff] }
 0x594   :  { %v5575_v45 = vsel %vm4799_vm7, %v5569_v0, %v5573_v4  ;;  %v5581_v62 = vsel %vm4799_vm7, %v5573_v4, %v8740_v26  ;;  %5777 = vmatprep.subr.mxu1 %v5615_v16  ;;  %5847 = vmatpush1.msra.mxu0 %v5620_v30  ;;  %v9765_v26 = vld [vmem:[#allocation64_spill] sm:$0xff]  ;;  %v9766_v16 = vld [vmem:[#allocation45_spill] sm:$0xff]  ;;  %v5548_v27 = vsel %vm4734_vm6, %v9768_v61, %v9767_v10 }
 0x595   :  { %v5586_v7 = vmul.f32 %v5581_v62, %v9763_v25  ;;  %v5589_v13 = vmul.f32 %v5575_v45, %v9764_v48  ;;  %v5537_v36 = vpop.permute.xlu1 %5536  ;;  %5778 = vmatpush1.msra.mxu1 %v5614_v22  ;;  %5848 = vmatprep.subr.mxu0 %v5617_v42  ;;  %v5544_v29 = vsel %vm4734_vm6, %v9766_v16, %v9765_v26  ;;  %v9770_v30 = vld [vmem:[#allocation105_spill] sm:$0xff]  ;;  %v9779_v10 = vld [vmem:[#allocation88_spill] sm:$0xff] }
 0x596   :  { %5779 = vmatprep.subr.mxu1 %v5587_v54  ;;  %5849 = vmatpush1.msra.mxu0 %v5616_v37  ;;  %v5545_v0 = vsel %vm4734_vm6, %v8746_v20, %v5537_v36  ;;  %v5542_v54 = vsel %vm4734_vm6, %v9765_v26, %v9768_v61  ;;  %v5523_v20 = vmul.f32 %v5515_v8, %v7680_v21  ;;  %v9773_v8 = vld [vmem:[#allocation55_spill] sm:$0xff]  ;;  %v9780_v61 = vld [vmem:[#allocation102_spill] sm:$0xff] }
 0x597   :  { %5780 = vmatpush1.msra.mxu1 %v5586_v7  ;;  %5850 = vmatprep.subr.mxu0 %v5589_v13  ;;  %v5541_v32 = vpop.permute.xlu0 %5540  ;;  %v5552_v34 = vmul.f32 %v5544_v29, %v9771_v31  ;;  %v5550_v44 = vmul.f32 %v5548_v27, %v9769_v18  ;;  %v5556_v4 = vmul.f32 %v5545_v0, %v9771_v31  ;;  %v9774_v7 = vld [vmem:[#allocation77_spill] sm:$0xff]  ;;  %v9036_v29 = vld [vmem:[#allocation7 + $0x20] ss:$0 sm:$0xff] }
 0x598   :  { %v5543_v22 = vsel %vm4734_vm6, %v5537_v36, %v5541_v32  ;;  %v5549_v42 = vsel %vm4734_vm6, %v5541_v32, %v8744_v50  ;;  %5781 = vmatprep.subr.mxu1 %v8905_v43  ;;  %5851 = vmatpush1.msra.mxu0 %v5588_v5  ;;  %v5553_v50 = vmul.f32 %v5542_v54, %v9770_v30  ;;  %v9772_v43 = vld [vmem:[#allocation74_spill] sm:$0xff]  ;;  %v9781_v27 = vld [vmem:[#allocation89_spill] sm:$0xff] }
 0x599   :  { %v5554_v2 = vmul.f32 %v5549_v42, %v9769_v18  ;;  %v5557_v38 = vmul.f32 %v5543_v22, %v9770_v30  ;;  %v5505_v49 = vpop.permute.xlu1 %5504  ;;  %5782 = vmatpush1.msra.mxu1 %v5582_v24  ;;  %5852 = vmatprep.subr.mxu0 %v5585_v28  ;;  %v5510_v37 = vsel %vm4669_vm5, %v9773_v8, %v9772_v43  ;;  %v9776_v24 = vld [vmem:[#allocation104_spill] sm:$0xff]  ;;  %v9777_v5 = vld [vmem:[#allocation106_spill] sm:$0xff]  ;;  %v9046_v22 = vld [vmem:[#allocation7 + $0x28] ss:$0 sm:$0xff] }
 0x59a   :  { %5783 = vmatprep.subr.mxu1 %v8919_v51  ;;  %5853 = vmatpush1.msra.mxu0 %v5584_v3  ;;  %v5513_v45 = vsel %vm4669_vm5, %v9750_v11, %v5505_v49  ;;  %v5516_v51 = vsel %vm4669_vm5, %v9772_v43, %v9774_v7  ;;  %v9775_v11 = vld [vmem:[#allocation86_spill] sm:$0xff]  ;;  %9778 = vst [vmem:[#allocation54_spill] sm:$0xff] %v9036_v29  ;;  %9782 = vst [vmem:[#allocation95_spill] sm:$0xff] %v9046_v22 }
 0x59b   :  { %5784 = vmatpush1.msra.mxu1 %v5554_v2  ;;  %5854 = vmatprep.subr.mxu0 %v5557_v38  ;;  %v5509_v62 = vpop.permute.xlu0 %5508  ;;  %v5512_v36 = vsel %vm4669_vm5, %v9775_v11, %v9773_v8  ;;  %v5518_v32 = vmul.f32 %v5516_v51, %v9776_v24  ;;  %v5521_v54 = vmul.f32 %v5510_v37, %v9777_v5  ;;  %v9785_v43 = vld [vmem:[#allocation42_spill] sm:$0xff] }
 0x59c   :  { %v5511_v3 = vsel %vm4669_vm5, %v5505_v49, %v5509_v62  ;;  %v5517_v13 = vsel %vm4669_vm5, %v5509_v62, %v9751_v53  ;;  %5785 = vmatprep.subr.mxu1 %v8909_v47  ;;  %5855 = vmatpush1.msra.mxu0 %v5556_v4  ;;  %v5746_v53 = vmul.f32 %v9036_v29, %v9779_v10  ;;  %v9784_v4 = vld [vmem:[#allocation41_spill] sm:$0xff] }
 0x59d   :  { %v5522_v28 = vmul.f32 %v5517_v13, %v9776_v24  ;;  %v5525_v26 = vmul.f32 %v5511_v3, %v9777_v5  ;;  %v5729_v16 = vpop.permute.xlu1 %5728  ;;  %5786 = vmatpush1.msra.mxu1 %v5550_v44  ;;  %5856 = vmatprep.subr.mxu0 %v5553_v50  ;;  %v5524_v47 = vmul.f32 %v5513_v45, %v9780_v61  ;;  %v9783_v44 = vld [vmem:[#allocation50_spill] sm:$0xff] }
 0x59e   :  { %v5737_v0 = vsel %vm5124_vm9, %v9781_v27, %v5729_v16  ;;  %5787 = vmatprep.subr.mxu1 %v5523_v20  ;;  %5857 = vmatpush1.msra.mxu0 %v5552_v34  ;;  %v5520_v38 = vmul.f32 %v5512_v36, %v9780_v61  ;;  %v5738_v34 = vsel %vm5124_vm9, %v8879_v58, %v8899_v46  ;;  %v5492_v13 = vld [vmem:[#allocation16] sm:$0xff] }
 0x59f   :  { %v5747_v42 = vmul.f32 %v9046_v22, %v5737_v0  ;;  %5788 = vmatpush1.msra.mxu1 %v5522_v28  ;;  %5858 = vmatprep.subr.mxu0 %v5525_v26  ;;  %v5733_v2 = vpop.permute.xlu0 %5732  ;;  %v5742_v7 = vmul.f32 %v9036_v29, %v5738_v34 }
 0x5a0   :  { %v5735_v49 = vsel %vm5124_vm9, %v5729_v16, %v5733_v2  ;;  %v5741_v20 = vsel %vm5124_vm9, %v5733_v2, %v9783_v44  ;;  %5789 = vmatprep.subr.mxu1 %v8913_v55  ;;  %5859 = vmatpush1.msra.mxu0 %v5524_v47  ;;  %v6179_v2 = vld [vmem:[#allocation3] sm:$0x1] }
 0x5a1   :  { %v5748_v50 = vmul.f32 %v9784_v4, %v5735_v49  ;;  %v5749_v8 = vmul.f32 %v9785_v43, %v5741_v20  ;;  %v5727_v37 = vpop.permute.xlu1 %5726  ;;  %5790 = vmatpush1.msra.mxu1 %v5518_v32  ;;  %5860 = vmatprep.subr.mxu0 %v5521_v54 }
 0x5a2   :  { %v5736_v45 = vsel %vm5124_vm9, %v8899_v46, %v5727_v37  ;;  %5819 = vmatprep.subr.mxu1 %v5747_v42  ;;  %5861 = vmatpush1.msra.mxu0 %v5520_v38 }
 0x5a3   :  { %v5743_v55 = vmul.f32 %v9046_v22, %v5736_v45  ;;  %5820 = vmatpush2.msra.mxu1 %v5746_v53  ;;  %5890 = vmatprep.subr.mxu0 %v5749_v8  ;;  %v5731_v62 = vpop.permute.xlu0 %5730 }
 0x5a4   :  { %v5734_v51 = vsel %vm5124_vm9, %v5727_v37, %v5731_v62  ;;  %v5740_v3 = vsel %vm5124_vm9, %v5731_v62, %v8879_v58  ;;  %5891 = vmatpush2.msra.mxu0 %v5748_v50 }
 0x5a5   :  { %v5744_v46 = vmul.f32 %v9784_v4, %v5734_v51  ;;  %v5745_v11 = vmul.f32 %v9785_v43, %v5740_v3  ;;  %5821 = vmatprep.subr.mxu1 %v5743_v55 }
 0x5a6   :  { %5822 = vmatpush2.msra.mxu1 %v5742_v7 }
 0x5a7   :  { %5824 = vmatmul.mubr.f32.vlgmr.msra.gmra.mxu1 %v5492_v13  ;;  %5892 = vmatprep.subr.mxu0 %v5745_v11 }
 0x5a8   :  { %5893 = vmatpush2.msra.mxu0 %v5744_v46 }
 0x5a9   :  { %5895 = vmatmul.mubr.f32.vlgmr.msra.gmra.mxu0 %v5492_v13 }
 0x5ae   :  { %v5754_v36 = vpop.permute.xlu1 %5753 }
 0x5b0   :  { %v9146_v38 = vpop.permute.xlu0 %6044 }
 0x5b2   :  { %v9148_v49 = vpop.permute.xlu1 %6049 }
 0x5b4   :  { %v9150_v44 = vpop.permute.xlu0 %6054 }
 0x5b6   :  { %v9152_v20 = vpop.permute.xlu1 %6059 }
 0x5b8   :  { %v9154_v34 = vpop.permute.xlu0 %6064 }
 0x5ba   :  { %v9156_v4 = vpop.permute.xlu1 %6069 }
 0x5bc   :  { %v9158_v50 = vpop.permute.xlu0 %6074 }
 0x5be   :  { %v9160_v43 = vpop.permute.xlu1 %6079 }
 0x5c0   :  { %v9162_v8 = vpop.permute.xlu0 %6084 }
 0x5c1   :  { %9786 = vst [vmem:[#allocation94_spill] sm:$0xff] %v9162_v8 }
 0x667   :  { %v5825_v28 = vpop.f32.mrf.mxu1 }
 0x668   :  { %v5826_v26 = vadd.f32 %v5825_v28, %v5754_v36 }
 0x669   :  { %v5827_v58 = vpop.f32.mrf.mxu1  ;;  %v5896_v47 = vpop.f32.mrf.mxu0 }
 0x66a   :  { %v9074_v16 = vmax.f32 %v5826_v26, 0.0  ;;  %v5828_v10 = vadd.f32 %v5827_v58, %v5754_v36  ;;  %v5897_v27 = vadd.f32 %v5896_v47, %v5754_v36 }
 0x66b   :  { %v5898_v32 = vpop.f32.mrf.mxu0 }
 0x66c   :  { %5946 = vrot.lane.b32.xlu1 %v9074_v16, %s6609_s3  ;;  %5914 = vrot.lane.b32.xlu0 %v9074_v16, %s6611_s11  ;;  %v9088_v53 = vmax.f32 %v5828_v10, 0.0  ;;  %v9098_v0 = vmax.f32 %v5897_v27, 0.0  ;;  %v5899_v54 = vadd.f32 %v5898_v32, %v5754_v36 }
 0x66e   :  { %v9120_v42 = vmax.f32 %v5899_v54, 0.0 }
 0x670   :  { %5994 = vrot.lane.b32.xlu1 %v9074_v16, %s6613_s28  ;;  %5930 = vrot.lane.b32.xlu0 %v9074_v16, %s6610_s27 }
 0x674   :  { %6026 = vrot.lane.b32.xlu1 %v9074_v16, %s6607_s6  ;;  %5962 = vrot.lane.b32.xlu0 %v9074_v16, %s6608_s8 }
 0x678   :  { %5916 = vrot.lane.b32.xlu1 %v9088_v53, %s6611_s11  ;;  %5978 = vrot.lane.b32.xlu0 %v9074_v16, %s6614_s29 }
 0x67c   :  { %5932 = vrot.lane.b32.xlu1 %v9088_v53, %s6610_s27  ;;  %6010 = vrot.lane.b32.xlu0 %v9074_v16, %s6612_s5 }
 0x680   :  { %5950 = vrot.lane.b32.xlu1 %v9098_v0, %s6609_s3  ;;  %5918 = vrot.lane.b32.xlu0 %v9098_v0, %s6611_s11 }
 0x684   :  { %5964 = vrot.lane.b32.xlu1 %v9088_v53, %s6608_s8  ;;  %5934 = vrot.lane.b32.xlu0 %v9098_v0, %s6610_s27 }
 0x688   :  { %5980 = vrot.lane.b32.xlu1 %v9088_v53, %s6614_s29  ;;  %5948 = vrot.lane.b32.xlu0 %v9088_v53, %s6609_s3 }
 0x68c   :  { %5998 = vrot.lane.b32.xlu1 %v9098_v0, %s6613_s28  ;;  %5966 = vrot.lane.b32.xlu0 %v9098_v0, %s6608_s8 }
 0x690   :  { %6012 = vrot.lane.b32.xlu1 %v9088_v53, %s6612_s5  ;;  %5982 = vrot.lane.b32.xlu0 %v9098_v0, %s6614_s29 }
 0x694   :  { %5920 = vrot.lane.b32.xlu1 %v9120_v42, %s6611_s11  ;;  %5996 = vrot.lane.b32.xlu0 %v9088_v53, %s6613_s28 }
 0x698   :  { %5936 = vrot.lane.b32.xlu1 %v9120_v42, %s6610_s27  ;;  %6014 = vrot.lane.b32.xlu0 %v9098_v0, %s6612_s5 }
 0x69c   :  { %5968 = vrot.lane.b32.xlu1 %v9120_v42, %s6608_s8  ;;  %5952 = vrot.lane.b32.xlu0 %v9120_v42, %s6609_s3 }
 0x6a0   :  { %5984 = vrot.lane.b32.xlu1 %v9120_v42, %s6614_s29  ;;  %6028 = vrot.lane.b32.xlu0 %v9088_v53, %s6607_s6 }
 0x6a4   :  { %6016 = vrot.lane.b32.xlu1 %v9120_v42, %s6612_s5  ;;  %6000 = vrot.lane.b32.xlu0 %v9120_v42, %s6613_s28 }
 0x6a8   :  { %6030 = vrot.lane.b32.xlu1 %v9098_v0, %s6607_s6  ;;  %6032 = vrot.lane.b32.xlu0 %v9120_v42, %s6607_s6  ;;  %s6262_s6 = sshll.u32 %s6616_s10, 4  ;;  %s6263_s6 = int_to_ptr.vmem [resolvable:$true] %s6262_s6 }
 0x6a9   :  { %s6557_s8 = scalar_lea.vmem %s6263_s6, 64  ;;  %p6562_p13 = scmp.lt.s32.totalorder %s6263_s6, %s6263_s6 }
 0x6aa   :  { %p6558_p12 = scmp.ne.s32.totalorder %s6263_s6, %s6557_s8  ;;  %p6563_p0 = scmp.lt.s32.totalorder %s6557_s8, %s6557_s8 }
 0x6ac   :  { %6182 = vperm.xlu1 %6358, %v6179_v2   ;;  %p6564_p1 = por %p6563_p0, %p6562_p13 }
 0x6ae   :  { %p6565_p2 = pnand %p6564_p1, %p6558_p12 }
 0x6de   :  { %v9164_v37 = vpop.permute.xlu1 %5946  ;;  %v5915_v45 = vpop.permute.xlu0 %5914 }
 0x6e2   :  { %v9166_v55 = vpop.permute.xlu1 %5994  ;;  %v9168_v62 = vpop.permute.xlu0 %5930 }
 0x6e6   :  { %v9170_v7 = vpop.permute.xlu1 %6026  ;;  %v9172_v51 = vpop.permute.xlu0 %5962 }
 0x6ea   :  { %v5917_v3 = vpop.permute.xlu1 %5916  ;;  %v9174_v13 = vpop.permute.xlu0 %5978 }
 0x6eb   :  { %v5924_v58 = vsel %vm4669_vm5, %v5915_v45, %v5917_v3 }
 0x6ec   :  { %v5927_v32 = vmul.f32 %v5924_v58, %v7680_v21 }
 0x6ee   :  { %v5933_v46 = vpop.permute.xlu1 %5932  ;;  %v9176_v11 = vpop.permute.xlu0 %6010  ;;  %v6088_v21 = vmul.f32 %v9146_v38, %v5927_v32 }
 0x6ef   :  { %v5940_v26 = vsel %vm4734_vm6, %v9168_v62, %v5933_v46 }
 0x6f0   :  { %v5943_v10 = vmul.f32 %v5940_v26, %v7676_v33 }
 0x6f2   :  { %v9178_v36 = vpop.permute.xlu1 %5950  ;;  %v5919_v28 = vpop.permute.xlu0 %5918  ;;  %v6092_v39 = vmul.f32 %v9148_v49, %v5943_v10 }
 0x6f3   :  { %v5923_v54 = vsel %vm4669_vm5, %v5917_v3, %v5919_v28 }
 0x6f4   :  { %v5928_v33 = vmul.f32 %v5923_v54, %v9780_v61  ;;  %v6137_v54 = vadd.f32 %v6092_v39, %v6088_v21 }
 0x6f6   :  { %v5965_v47 = vpop.permute.xlu1 %5964  ;;  %v5935_v27 = vpop.permute.xlu0 %5934 }
 0x6f7   :  { %v5939_v2 = vsel %vm4734_vm6, %v5933_v46, %v5935_v27  ;;  %v5972_v22 = vsel %vm4864_vm4, %v9172_v51, %v5965_v47 }
 0x6f8   :  { %v5944_v8 = vmul.f32 %v5939_v2, %v9771_v31  ;;  %v5975_v46 = vmul.f32 %v5972_v22, %v9747_v19  ;;  %v6089_v2 = vmul.f32 %v9146_v38, %v5928_v33 }
 0x6fa   :  { %v5981_v26 = vpop.permute.xlu1 %5980  ;;  %v5949_v1 = vpop.permute.xlu0 %5948  ;;  %v6093_v58 = vmul.f32 %v9148_v49, %v5944_v8  ;;  %v6100_v19 = vmul.f32 %v9152_v20, %v5975_v46 }
 0x6fb   :  { %v5955_v3 = vsel %vm4799_vm7, %v5949_v1, %v9178_v36  ;;  %v5956_v31 = vsel %vm4799_vm7, %v9164_v37, %v5949_v1 }
 0x6fc   :  { %v5959_v10 = vmul.f32 %v5956_v31, %v7660_v14  ;;  %v5960_v61 = vmul.f32 %v5955_v3, %v9762_v12  ;;  %v6151_v22 = vadd.f32 %v6093_v58, %v6089_v2  ;;  %v6104_v3 = vmul.f32 %v9154_v34, %v9088_v53 }
 0x6fd   :  { %v6105_v58 = vmul.f32 %v9154_v34, %v9098_v0 }
 0x6fe   :  { %v6096_v32 = vmul.f32 %v9150_v44, %v5959_v10  ;;  %v6097_v29 = vmul.f32 %v9150_v44, %v5960_v61  ;;  %v9211_v9 = vpop.permute.xlu1 %5998  ;;  %v5967_v60 = vpop.permute.xlu0 %5966 }
 0x6ff   :  { %v5971_v1 = vsel %vm4864_vm4, %v5965_v47, %v5967_v60 }
 0x700   :  { %v6138_v8 = vadd.f32 %v6137_v54, %v6096_v32  ;;  %v5976_v14 = vmul.f32 %v5971_v1, %v9759_v56  ;;  %v6152_v39 = vadd.f32 %v6151_v22, %v6097_v29 }
 0x702   :  { %v6139_v12 = vadd.f32 %v6138_v8, %v6100_v19  ;;  %v6101_v33 = vmul.f32 %v9152_v20, %v5976_v14  ;;  %v6013_v21 = vpop.permute.xlu1 %6012  ;;  %v5983_v31 = vpop.permute.xlu0 %5982 }
 0x703   :  { %v5987_v10 = vsel %vm4929_vm12, %v5981_v26, %v5983_v31 }
 0x704   :  { %v6153_v61 = vadd.f32 %v6152_v39, %v6101_v33  ;;  %v6140_v47 = vadd.f32 %v6139_v12, %v6104_v3  ;;  %v5991_v46 = vmul.f32 %v5987_v10, %v8298_v17  ;;  %v5988_v3 = vsel %vm4929_vm12, %v9174_v13, %v5981_v26 }
 0x706   :  { %v6108_v56 = vmul.f32 %v9156_v4, %v5991_v46  ;;  %v5921_v29 = vpop.permute.xlu1 %5920  ;;  %v5997_v54 = vpop.permute.xlu0 %5996  ;;  %v9226_v2 = vadd.f32 %v6153_v61, %v6105_v58 }
 0x707   :  { %v6003_v53 = vsel %vm4994_vm10, %v5997_v54, %v9211_v9  ;;  %v5925_v1 = vsel %vm4669_vm5, %v5921_v29, %v5915_v45  ;;  %v5922_v17 = vsel %vm4669_vm5, %v5919_v28, %v5921_v29 }
 0x708   :  { %v6141_v32 = vadd.f32 %v6140_v47, %v6108_v56  ;;  %v6007_v19 = vmul.f32 %v6003_v53, %v9691_v57  ;;  %v5926_v45 = vmul.f32 %v5925_v1, %v9776_v24 }
 0x70a   :  { %v5937_v0 = vpop.permute.xlu1 %5936  ;;  %v6015_v22 = vpop.permute.xlu0 %6014  ;;  %v6112_v8 = vmul.f32 %v9158_v50, %v6007_v19  ;;  %v6087_v26 = vmul.f32 %v9146_v38, %v5926_v45 }
 0x70b   :  { %v5938_v14 = vsel %vm4734_vm6, %v5935_v27, %v5937_v0  ;;  %v5941_v12 = vsel %vm4734_vm6, %v5937_v0, %v9168_v62  ;;  %v6019_v39 = vsel %vm5059_vm8, %v6013_v21, %v6015_v22  ;;  %v5929_v27 = vmul.f32 %v5922_v17, %v9777_v5 }
 0x70c   :  { %v5942_v57 = vmul.f32 %v5941_v12, %v9769_v18  ;;  %v5945_v28 = vmul.f32 %v5938_v14, %v9770_v30  ;;  %v6023_v33 = vmul.f32 %v6019_v39, %v9642_v41  ;;  %v6142_v10 = vadd.f32 %v6141_v32, %v6112_v8 }
 0x70e   :  { %v6091_v62 = vmul.f32 %v9148_v49, %v5942_v57  ;;  %v6094_v61 = vmul.f32 %v9148_v49, %v5945_v28  ;;  %v6116_v47 = vmul.f32 %v9160_v43, %v6023_v33  ;;  %v5969_v24 = vpop.permute.xlu1 %5968  ;;  %v5953_v46 = vpop.permute.xlu0 %5952  ;;  %v6020_v49 = vsel %vm5059_vm8, %v9176_v11, %v6013_v21 }
 0x70f   :  { %v5970_v18 = vsel %vm4864_vm4, %v5967_v60, %v5969_v24  ;;  %v5973_v41 = vsel %vm4864_vm4, %v5969_v24, %v9172_v51  ;;  %v5954_v30 = vsel %vm4799_vm7, %v9178_v36, %v5953_v46  ;;  %v5957_v5 = vsel %vm4799_vm7, %v5953_v46, %v9164_v37  ;;  %v9789_v46 = vld [vmem:[#allocation54_spill] sm:$0xff] }
 0x710   :  { %v9270_v58 = vadd.f32 %v6142_v10, %v6116_v47  ;;  %v5974_v60 = vmul.f32 %v5973_v41, %v9755_v35  ;;  %v6090_v51 = vmul.f32 %v9146_v38, %v5929_v27  ;;  %v5977_v56 = vmul.f32 %v5970_v18, %v9756_v52  ;;  %v9790_v41 = vld [vmem:[#allocation111_spill] sm:$0xff] }
 0x711   :  { %v5958_v36 = vmul.f32 %v5957_v5, %v9763_v25  ;;  %v5961_v29 = vmul.f32 %v5954_v30, %v9764_v48  ;;  %v5990_v37 = vmul.f32 %v5988_v3, %v8294_v63  ;;  %v6004_v21 = vsel %vm4994_vm10, %v9166_v55, %v5997_v54 }
 0x712   :  { %v6123_v53 = vadd.f32 %v6091_v62, %v6087_v26  ;;  %v5985_v32 = vpop.permute.xlu1 %5984  ;;  %v6029_v1 = vpop.permute.xlu0 %6028  ;;  %v6165_v19 = vadd.f32 %v6094_v61, %v6090_v51  ;;  %v6022_v25 = vmul.f32 %v6020_v49, %v7664_v23  ;;  %v6099_v48 = vmul.f32 %v9152_v20, %v5974_v60  ;;  %v9788_v62 = vld [vmem:[#allocation40_spill] sm:$0xff]  ;;  %v9792_v51 = vld [vmem:[#allocation95_spill] sm:$0xff] }
 0x713   :  { %v6095_v35 = vmul.f32 %v9150_v44, %v5958_v36  ;;  %v6098_v38 = vmul.f32 %v9150_v44, %v5961_v29  ;;  %v5986_v52 = vsel %vm4929_vm12, %v5983_v31, %v5985_v32  ;;  %v5989_v63 = vsel %vm4929_vm12, %v5985_v32, %v9174_v13  ;;  %v6395_v29 = vld [vmem:[#allocation7 + $0x30] ss:$0 sm:$0xff] }
 0x714   :  { %v5992_v54 = vmul.f32 %v5986_v52, %v8356_v40  ;;  %v6102_v17 = vmul.f32 %v9152_v20, %v5977_v56  ;;  %v5993_v14 = vmul.f32 %v5989_v63, %v8365_v6  ;;  %v6006_v44 = vmul.f32 %v6004_v21, %v7781_v15 }
 0x715   :  { %v6124_v0 = vadd.f32 %v6123_v53, %v6095_v35  ;;  %v6166_v8 = vadd.f32 %v6165_v19, %v6098_v38  ;;  %v6103_v31 = vmul.f32 %v9154_v34, %v9074_v16  ;;  %v6106_v23 = vmul.f32 %v9154_v34, %v9120_v42  ;;  %v6396_v19 = vld [vmem:[#allocation7 + $0x38] ss:$0 sm:$0xff]  ;;  %v9793_v38 = vld [vmem:[#allocation94_spill] sm:$0xff] }
 0x716   :  { %v6109_v12 = vmul.f32 %v9156_v4, %v5992_v54  ;;  %v6017_v39 = vpop.permute.xlu1 %6016  ;;  %v6001_v13 = vpop.permute.xlu0 %6000  ;;  %v6107_v40 = vmul.f32 %v9156_v4, %v5990_v37  ;;  %v6036_v6 = vsel %vm5124_vm9, %v9170_v7, %v6029_v1  ;;  %v6115_v57 = vmul.f32 %v9160_v43, %v6022_v25 }
 0x717   :  { %v6125_v45 = vadd.f32 %v6124_v0, %v6099_v48  ;;  %v6167_v20 = vadd.f32 %v6166_v8, %v6102_v17  ;;  %v6018_v16 = vsel %vm5059_vm8, %v6015_v22, %v6017_v39  ;;  %v6021_v42 = vsel %vm5059_vm8, %v6017_v39, %v9176_v11 }
 0x718   :  { %v6155_v15 = vadd.f32 %v9226_v2, %v6109_v12  ;;  %v6002_v34 = vsel %vm4994_vm10, %v9211_v9, %v6001_v13  ;;  %v6110_v33 = vmul.f32 %v9156_v4, %v5993_v14  ;;  %v6111_v27 = vmul.f32 %v9158_v50, %v6006_v44  ;;  %v9787_v2 = vld [vmem:[#allocation107_spill] sm:$0xff] }
 0x719   :  { %v6126_v28 = vadd.f32 %v6125_v45, %v6103_v31  ;;  %v6168_v3 = vadd.f32 %v6167_v20, %v6106_v23  ;;  %v6024_v10 = vmul.f32 %v6018_v16, %v9787_v2  ;;  %v6005_v22 = vsel %vm4994_vm10, %v6001_v13, %v9166_v55  ;;  %v9791_v4 = vld [vmem:[#allocation39_spill] sm:$0xff] }
 0x71a   :  { %v6008_v11 = vmul.f32 %v6002_v34, %v9788_v62  ;;  %v6031_v61 = vpop.permute.xlu1 %6030  ;;  %v6033_v47 = vpop.permute.xlu0 %6032  ;;  %v6038_v18 = vmul.f32 %v9789_v46, %v6036_v6  ;;  %v6025_v30 = vmul.f32 %v6021_v42, %v9790_v41  ;;  %v6009_v5 = vmul.f32 %v6005_v22, %v9791_v4 }
 0x71b   :  { %v6169_v24 = vadd.f32 %v6168_v3, %v6110_v33  ;;  %v6127_v9 = vadd.f32 %v6126_v28, %v6107_v40  ;;  %v6035_v26 = vsel %vm5124_vm9, %v6029_v1, %v6031_v61  ;;  %v6034_v55 = vsel %vm5124_vm9, %v6031_v61, %v6033_v47 }
 0x71c   :  { %v6113_v49 = vmul.f32 %v9158_v50, %v6008_v11  ;;  %v6039_v56 = vmul.f32 %v9792_v51, %v6035_v26  ;;  %v6037_v36 = vsel %vm5124_vm9, %v6033_v47, %v9170_v7  ;;  %v6040_v37 = vmul.f32 %v6395_v29, %v6034_v55 }
 0x71d   :  { %v6128_v60 = vadd.f32 %v6127_v9, %v6111_v27  ;;  %v6117_v21 = vmul.f32 %v9160_v43, %v6024_v10  ;;  %v6114_v53 = vmul.f32 %v9158_v50, %v6009_v5  ;;  %v6041_v35 = vmul.f32 %v6396_v19, %v6037_v36  ;;  %v9794_v10 = vld [vmem:[#allocation25_spill] sm:$0xff] }
 0x71e   :  { %v6156_v32 = vadd.f32 %v6155_v15, %v6113_v49  ;;  %v6119_v52 = vmul.f32 %v9793_v38, %v6038_v18  ;;  %v6120_v25 = vmul.f32 %v9793_v38, %v6039_v56  ;;  %v6121_v48 = vmul.f32 %v9793_v38, %v6040_v37 }
 0x71f   :  { %v6129_v1 = vadd.f32 %v6128_v60, %v6115_v57  ;;  %v6118_v63 = vmul.f32 %v9160_v43, %v6025_v30  ;;  %v6170_v59 = vadd.f32 %v6169_v24, %v6114_v53  ;;  %v6122_v54 = vmul.f32 %v9793_v38, %v6041_v35 }
 0x720   :  { %v6157_v7 = vadd.f32 %v6156_v32, %v6117_v21  ;;  %v6144_v0 = vadd.f32 %v9270_v58, %v6120_v25 }
 0x721   :  { %v6130_v17 = vadd.f32 %v6129_v1, %v6119_v52  ;;  %v6171_v50 = vadd.f32 %v6170_v59, %v6118_v63  ;;  %v9795_v52 = vld [vmem:[#allocation26_spill] sm:$0xff] }
 0x722   :  { %v6158_v8 = vadd.f32 %v6157_v7, %v6121_v48  ;;  %v6145_v44 = vrot.slane %v6144_v0, 4 }
 0x723   :  { %v6131_v14 = vrot.slane %v6130_v17, 4  ;;  %v6172_v23 = vadd.f32 %v6171_v50, %v6122_v54 }
 0x724   :  { %v6159_v31 = vrot.slane %v6158_v8, 4  ;;  %v6146_v39 = vadd.f32 %v6145_v44, %v6144_v0 }
 0x725   :  { %v6132_v12 = vadd.f32 %v6131_v14, %v6130_v17  ;;  %v6173_v40 = vrot.slane %v6172_v23, 4 }
 0x726   :  { %v6160_v13 = vadd.f32 %v6159_v31, %v6158_v8  ;;  %v6147_v20 = vrot.slane %v6146_v39, 2 }
 0x727   :  { %v6133_v45 = vrot.slane %v6132_v12, 2  ;;  %v6174_v6 = vadd.f32 %v6173_v40, %v6172_v23  ;;  %v6183_v57 = vpop.permute.xlu1 %6182 }
 0x728   :  { %v6161_v43 = vrot.slane %v6160_v13, 2  ;;  %v6148_v16 = vadd.f32 %v6147_v20, %v6146_v39  ;;  %v6188_v22 = vrot.slane %v6183_v57, %v9794_v10 }
 0x729   :  { %v6134_v15 = vadd.f32 %v6133_v45, %v6132_v12  ;;  %v6175_v34 = vrot.slane %v6174_v6, 2 }
 0x72a   :  { %v6162_v42 = vadd.f32 %v6161_v43, %v6160_v13  ;;  %v6149_v28 = vrot.slane %v6148_v16, 1 }
 0x72b   :  { %v6135_v58 = vrot.slane %v6134_v15, 1  ;;  %v6176_v33 = vadd.f32 %v6175_v34, %v6174_v6 }
 0x72c   :  { %v6163_v3 = vrot.slane %v6162_v42, 1  ;;  %v6150_v2 = vadd.f32 %v6149_v28, %v6148_v16 }
 0x72d   :  { %v6136_v27 = vadd.f32 %v6135_v58, %v6134_v15  ;;  %v6177_v11 = vrot.slane %v6176_v33, 1 }
 0x72e   :  { %v6164_v62 = vadd.f32 %v6163_v3, %v6162_v42  ;;  %v6190_v47 = vadd.f32 %v6188_v22, %v6150_v2 }
 0x72f   :  { %v6189_v61 = vadd.f32 %v6188_v22, %v6136_v27  ;;  %v6178_v24 = vadd.f32 %v6177_v11, %v6176_v33 }
 0x730   :  { %v6191_v9 = vadd.f32 %v6188_v22, %v6164_v62  ;;  %v6194_v18 = vsub.f32 0.0, %v6190_v47 }
 0x731   :  { %v6193_v46 = vsub.f32 0.0, %v6189_v61  ;;  %v6192_v41 = vadd.f32 %v6188_v22, %v6178_v24 }
 0x732   :  { %v6195_v30 = vsub.f32 0.0, %v6191_v9  ;;  %v6199_v5 = vmul.f32 1.442695, %v6194_v18 }
 0x733   :  { %v6197_v4 = vmul.f32 1.442695, %v6193_v46  ;;  %v6196_v49 = vsub.f32 0.0, %v6192_v41 }
 0x734   :  { %v6201_v26 = vmul.f32 1.442695, %v6195_v30 }
 0x735   :  { %6359 = vpow2.f32 %v6197_v4  ;;  %v6203_v55 = vmul.f32 1.442695, %v6196_v49 }
 0x736   :  { %6361 = vpow2.f32 %v6199_v5 }
 0x737   :  { %6363 = vpow2.f32 %v6201_v26 }
 0x738   :  { %6365 = vpow2.f32 %v6203_v55 }
 0x742   :  { %v6360_v60 = vpop.eup %6359 }
 0x743   :  { %v6362_v51 = vpop.eup %6361  ;;  %v6205_v56 = vadd.f32 1.0, %v6360_v60 }
 0x744   :  { %v6364_v36 = vpop.eup %6363  ;;  %v6206_v29 = vadd.f32 1.0, %v6362_v51 }
 0x745   :  { %v6366_v37 = vpop.eup %6365  ;;  %v6207_v21 = vadd.f32 1.0, %v6364_v36  ;;  %6367 = vrcp.f32 %v6205_v56 }
 0x746   :  { %v6208_v53 = vadd.f32 1.0, %v6366_v37  ;;  %6369 = vrcp.f32 %v6206_v29 }
 0x747   :  { %6371 = vrcp.f32 %v6207_v21 }
 0x748   :  { %6373 = vrcp.f32 %v6208_v53 }
 0x752   :  { %v6368_v32 = vpop.eup %6367 }
 0x753   :  { %v6370_v19 = vpop.eup %6369 }
 0x754   :  { %v6372_v35 = vpop.eup %6371  ;;  %v6219_v1 = vcombine.low %v6368_v32, %v6370_v19 }
 0x755   :  { %v6374_v38 = vpop.eup %6373 }
 0x756   :  { %v6226_v25 = vrot.slane %v6219_v1, %v9795_v52  ;;  %v6238_v48 = vcombine.low %v6372_v35, %v6374_v38 }
 0x758   :  { %v6233_v63 = vrot.slane %v6226_v25, %v9795_v52  ;;  %v6245_v59 = vrot.slane %v6238_v48, %v9795_v52 }
 0x75a   :  { %6235 = vst.msk [vmem:[#allocation18] ss:$2 sm:$0x3] %vm6821_vm3, %v6233_v63  ;;  %v6252_v54 = vrot.slane %v6245_v59, %v9795_v52 }
 0x75c   :  { %6255 = vst.msk [vmem:[#allocation18 + $0x1] ss:$2 sm:$0x3] %vm6821_vm3, %v6252_v54 }
 0x75d   :  { %6568 = shalt.err (!%p6565_p2)
}
 0x75e   :  { %6265 = dma.vmem_to_hbm [thread:$0]  %s6263_s6, 64, %s9364_s12, [#allocation6]  }
 0x75f   :  { %6587 = dma.done.wait [#allocation6], 64  }
 0x760   :  { %6588 = vsyncadd [#allocation6], 4294967232 }
 0x761   :  { %6269 = vsyncpa [#allocation5], 1 }
 0x762   :  { %6270 = vsyncpa [#allocation8], 1 }
 0x763   :  { %6271 = vsyncpa [#allocation11], 1 }
 0x764   :  { %6272 = vsyncpa [#allocation14], 1 }
 0x765   :  { %6273 = vsyncpa [#allocation17], 1 }
 0x766   :  { %6274 = vsyncpa [#allocation6], 1 }

</bundles_post_ra>
